<compile_context>
chip_gen: v6e
topology: v6e:2x2x1
jax: 0.10.0
libtpu: 0.0.40
codegen_flags: <defaults>
</compile_context>

<pallas_src>
import functools

import jax
import jax.numpy as jnp
from jax.experimental import pallas as pl
from jax.experimental.pallas import tpu as pltpu

NEG_SLOPE = 0.01  # F.leaky_relu default negative_slope


def _leaky_relu(x):
    return jnp.where(x >= 0, x, NEG_SLOPE * x)


# ---------------------------------------------------------------------------
# The fused decoder kernel: one batch element per grid step, all 4 layers.
# ---------------------------------------------------------------------------
def _decoder_kernel(x_ref, w1, b1, w2, b2, w3, b3, w4, b4, o_ref,
                    xp1, xp2, xp3, xp4, *, h0, w0):
    """Layout: per-layer padded activation is a channel-major flat VMEM buffer
    (Cin, Hp*Wp) with Hp = Hin+5 (2 top / 3 bottom zero rows) and Wp = Win+4
    (2 left / 2 right zero cols).  Computing the correlation over the flat
    layout with shifts a*Wp+b is exact for output columns w < Wo; the 2
    wrap-around junk columns per row are discarded on re-pad / write-out."""
    w_refs = (w1, w2, w3, w4)
    b_refs = (b1, b2, b3, b4)
    xp_refs = (xp1, xp2, xp3, xp4)
    n_layers = 4

    # ---- scatter the (C0, H0*W0) input rows into the zero-padded canvas ----
    hin, win = h0, w0
    wp = win + 4
    xp1[...] = jnp.zeros_like(xp1)
    for h in range(hin):
        dst = (h + 2) * wp + 2
        xp1[:, dst:dst + win] = x_ref[0, :, h * win:(h + 1) * win]

    for layer in range(n_layers):
        w_ref = w_refs[layer]
        b_ref = b_refs[layer]
        xp = xp_refs[layer]
        wp = win + 4
        ho, wo = hin + 2, win + 2
        lo = ho * wp                       # compute over padded-width rows
        cout = w_ref.shape[1]

        acc = jnp.zeros((cout, lo), jnp.float32)
        for a in range(3):                 # 9 shifted-slice MXU matmuls
            for t in range(3):
                s = a * wp + t
                acc = acc + jnp.dot(w_ref[a * 3 + t], xp[:, s:s + lo],
                                    preferred_element_type=jnp.float32)
        acc = acc + b_ref[...]             # (Cout, 1) broadcasts over lanes
        acc = _leaky_relu(acc)

        if layer == n_layers - 1:
            acc = jnp.tanh(0.5 * acc)      # == sigmoid(x) * 2 - 1
            # drop junk columns -> lane-dense (Cout, Ho*Wo) output block
            for h in range(ho):
                o_ref[0, :, h * wo:(h + 1) * wo] = acc[:, h * wp:h * wp + wo]
        else:
            # re-pad the activation into the next layer's flat canvas (VMEM only)
            xp_next = xp_refs[layer + 1]
            wpn = wo + 4
            xp_next[...] = jnp.zeros_like(xp_next)
            for h in range(ho):
                dst = (h + 2) * wpn + 2
                xp_next[:, dst:dst + wo] = acc[:, h * wp:h * wp + wo]
            hin, win = ho, wo


# ---------------------------------------------------------------------------
# Wrapper: NCHW in / NCHW out, like the PyTorch module.
# ---------------------------------------------------------------------------
@jax.jit
def decoder_forward(x_nchw, params):
    N, c0, h0, w0 = x_nchw.shape
    n_layers = len(params)
    outc = int(params[-1][0].shape[1])

    # Per-tap transposed weights: Wt[a*3+b, co, ci] = w[ci, co, 2-a, 2-b]
    wts, bcols = [], []
    for (w, b) in params:
        cin, cout = int(w.shape[0]), int(w.shape[1])
        wf = jnp.transpose(jnp.flip(w, axis=(2, 3)), (2, 3, 1, 0))  # (3,3,Cout,Cin)
        wts.append(wf.reshape(9, cout, cin).astype(jnp.float32))
        bcols.append(b.reshape(cout, 1).astype(jnp.float32))

    x_flat = x_nchw.reshape(N, c0, h0 * w0).astype(jnp.float32)

    chans = [int(p[0].shape[0]) for p in params]                # layer input channels
    hs = [h0 + 2 * l for l in range(n_layers + 1)]
    wsp = [w0 + 2 * l for l in range(n_layers + 1)]
    flat_lens = [(hs[l] + 5) * (wsp[l] + 4) for l in range(n_layers)]
    out_h, out_w = hs[-1], wsp[-1]

    in_specs = [pl.BlockSpec((1, c0, h0 * w0), lambda n: (n, 0, 0))]
    operands = [x_flat]
    for l in range(n_layers):
        in_specs.append(pl.BlockSpec(wts[l].shape, lambda n: (0, 0, 0)))
        in_specs.append(pl.BlockSpec(bcols[l].shape, lambda n: (0, 0)))
        operands.extend([wts[l], bcols[l]])

    kernel = functools.partial(_decoder_kernel, h0=h0, w0=w0)

    y_flat = pl.pallas_call(
        kernel,
        out_shape=jax.ShapeDtypeStruct((N, outc, out_h * out_w), jnp.float32),
        grid_spec=pltpu.PrefetchScalarGridSpec(
            num_scalar_prefetch=0,
            grid=(N,),
            in_specs=in_specs,
            out_specs=pl.BlockSpec((1, outc, out_h * out_w), lambda n: (n, 0, 0)),
            scratch_shapes=[pltpu.VMEM((chans[l], flat_lens[l]), jnp.float32)
                            for l in range(n_layers)],
        ),
        compiler_params=pltpu.CompilerParams(
            dimension_semantics=("parallel",)),
    )(*operands)

    return y_flat.reshape(N, outc, out_h, out_w)


# ---------------------------------------------------------------------------
# Pure-JAX reference: direct scatter-form of ConvTranspose2d (independent of
# the flip/correlation rewrite used by the Pallas path).
# ---------------------------------------------------------------------------
def decoder_reference(x_nchw, params):
    y = x_nchw.astype(jnp.float32)
    n_layers = len(params)
    for idx, (w, b) in enumerate(params):
        n, cin, hh, ww = y.shape
        cout = w.shape[1]
        out = jnp.zeros((n, cout, hh + 2, ww + 2), jnp.float32)
        for a in range(3):
            for t in range(3):
                out = out.at[:, :, a:a + hh, t:t + ww].add(
                    jnp.einsum("ncij,co->noij", y, w[:, :, a, t],
                               precision=jax.lax.Precision.HIGHEST))
        out = out + b[None, :, None, None]
        out = jnp.where(out >= 0, out, NEG_SLOPE * out)
        if idx == n_layers - 1:
            out = jax.nn.sigmoid(out) * 2.0 - 1.0
        y = out
    return y


# ---------------------------------------------------------------------------
# Deterministic parameter init (matches PyTorch module shapes)
# ---------------------------------------------------------------------------
def init_params(key, outc=3):
    layer_channels = [(64, 32), (32, 16), (16, 8), (8, outc)]
    params = []
    for cin, cout in layer_channels:
        key, kw, kb = jax.random.split(key, 3)
        bound = 1.0 / (cin * 9) ** 0.5
        w = jax.random.uniform(kw, (cin, cout, 3, 3), jnp.float32, -bound, bound)
        b = jax.random.uniform(kb, (cout,), jnp.float32, -bound, bound)
        params.append((w, b))
    return params


if __name__ == "__main__":
    key = jax.random.PRNGKey(0)
    key, kx = jax.random.split(key)
    params = init_params(key, outc=3)

    # Decoder latent input: (N, 64, H, W); output is (N, 3, H+8, W+8).
    x = jax.random.normal(kx, (2, 64, 8, 8), jnp.float32)

    y = decoder_forward(x, params)
    y = jax.block_until_ready(y)

    y_ref = decoder_reference(x, params)
    assert y.shape == (2, 3, 16, 16), y.shape
    max_err = float(jnp.max(jnp.abs(y - y_ref)))
    assert jnp.allclose(y, y_ref, rtol=1e-4, atol=1e-4), max_err

    print("KERNEL_OK")
</pallas_src>

<mosaic_0001>
module attributes {stable_mosaic.version = 11 : i64} {
  func.func @_decoder_kernel(%arg0: i32, %arg1: memref<1x64x64xf32, #tpu.memory_space<vmem>>, %arg2: memref<9x32x64xf32, #tpu.memory_space<vmem>>, %arg3: memref<32x1xf32, #tpu.memory_space<vmem>>, %arg4: memref<9x16x32xf32, #tpu.memory_space<vmem>>, %arg5: memref<16x1xf32, #tpu.memory_space<vmem>>, %arg6: memref<9x8x16xf32, #tpu.memory_space<vmem>>, %arg7: memref<8x1xf32, #tpu.memory_space<vmem>>, %arg8: memref<9x3x8xf32, #tpu.memory_space<vmem>>, %arg9: memref<3x1xf32, #tpu.memory_space<vmem>>, %arg10: memref<1x3x256xf32, #tpu.memory_space<vmem>>, %arg11: memref<64x156xf32, #tpu.memory_space<vmem>>, %arg12: memref<32x210xf32, #tpu.memory_space<vmem>>, %arg13: memref<16x272xf32, #tpu.memory_space<vmem>>, %arg14: memref<8x342xf32, #tpu.memory_space<vmem>>) attributes {dimension_semantics = [#tpu.dimension_semantics<parallel>], iteration_bounds = array<i64: 2>, scalar_prefetch = 0 : i64, scratch_operands = 4 : i64, tpu.core_type = #tpu.core_type<tc>, window_params = [{transform_indices = @transform_0, window_bounds = array<i64: 1, 64, 64>}, {pipeline_mode = #tpu.pipeline_mode<synchronous>, transform_indices = @transform_1, window_bounds = array<i64: 9, 32, 64>}, {pipeline_mode = #tpu.pipeline_mode<synchronous>, transform_indices = @transform_2, window_bounds = array<i64: 32, 1>}, {pipeline_mode = #tpu.pipeline_mode<synchronous>, transform_indices = @transform_3, window_bounds = array<i64: 9, 16, 32>}, {pipeline_mode = #tpu.pipeline_mode<synchronous>, transform_indices = @transform_4, window_bounds = array<i64: 16, 1>}, {pipeline_mode = #tpu.pipeline_mode<synchronous>, transform_indices = @transform_5, window_bounds = array<i64: 9, 8, 16>}, {pipeline_mode = #tpu.pipeline_mode<synchronous>, transform_indices = @transform_6, window_bounds = array<i64: 8, 1>}, {pipeline_mode = #tpu.pipeline_mode<synchronous>, transform_indices = @transform_7, window_bounds = array<i64: 9, 3, 8>}, {pipeline_mode = #tpu.pipeline_mode<synchronous>, transform_indices = @transform_8, window_bounds = array<i64: 3, 1>}, {transform_indices = @transform_9, window_bounds = array<i64: 1, 3, 256>}]} {
    %cst = arith.constant 0.000000e+00 : f32
    %0 = vector.broadcast %cst : f32 to vector<64x156xf32>
    %c0 = arith.constant 0 : index
    %c0_0 = arith.constant 0 : index
    %1 = vector.load %arg11[%c0, %c0_0] : memref<64x156xf32, #tpu.memory_space<vmem>>, vector<64x156xf32>
    tpu.vector_store %arg11[%c0, %c0_0], %0 {strides = array<i32>} : memref<64x156xf32, #tpu.memory_space<vmem>>, vector<64x156xf32>,
    %c0_1 = arith.constant 0 : index
    %c0_2 = arith.constant 0 : index
    %c0_3 = arith.constant 0 : index
    %2 = vector.load %arg1[%c0_1, %c0_2, %c0_3] : memref<1x64x64xf32, #tpu.memory_space<vmem>>, vector<1x64x8xf32>
    %3 = vector.shape_cast %2 : vector<1x64x8xf32> to vector<64x8xf32>
    %c0_4 = arith.constant 0 : index
    %c26 = arith.constant 26 : index
    %4 = vector.load %arg11[%c0_4, %c26] : memref<64x156xf32, #tpu.memory_space<vmem>>, vector<64x8xf32>
    tpu.vector_store %arg11[%c0_4, %c26], %3 {strides = array<i32>} : memref<64x156xf32, #tpu.memory_space<vmem>>, vector<64x8xf32>,
    %c0_5 = arith.constant 0 : index
    %c0_6 = arith.constant 0 : index
    %c8 = arith.constant 8 : index
    %5 = vector.load %arg1[%c0_5, %c0_6, %c8] : memref<1x64x64xf32, #tpu.memory_space<vmem>>, vector<1x64x8xf32>
    %6 = vector.shape_cast %5 : vector<1x64x8xf32> to vector<64x8xf32>
    %c0_7 = arith.constant 0 : index
    %c38 = arith.constant 38 : index
    %7 = vector.load %arg11[%c0_7, %c38] : memref<64x156xf32, #tpu.memory_space<vmem>>, vector<64x8xf32>
    tpu.vector_store %arg11[%c0_7, %c38], %6 {strides = array<i32>} : memref<64x156xf32, #tpu.memory_space<vmem>>, vector<64x8xf32>,
    %c0_8 = arith.constant 0 : index
    %c0_9 = arith.constant 0 : index
    %c16 = arith.constant 16 : index
    %8 = vector.load %arg1[%c0_8, %c0_9, %c16] : memref<1x64x64xf32, #tpu.memory_space<vmem>>, vector<1x64x8xf32>
    %9 = vector.shape_cast %8 : vector<1x64x8xf32> to vector<64x8xf32>
    %c0_10 = arith.constant 0 : index
    %c50 = arith.constant 50 : index
    %10 = vector.load %arg11[%c0_10, %c50] : memref<64x156xf32, #tpu.memory_space<vmem>>, vector<64x8xf32>
    tpu.vector_store %arg11[%c0_10, %c50], %9 {strides = array<i32>} : memref<64x156xf32, #tpu.memory_space<vmem>>, vector<64x8xf32>,
    %c0_11 = arith.constant 0 : index
    %c0_12 = arith.constant 0 : index
    %c24 = arith.constant 24 : index
    %11 = vector.load %arg1[%c0_11, %c0_12, %c24] : memref<1x64x64xf32, #tpu.memory_space<vmem>>, vector<1x64x8xf32>
    %12 = vector.shape_cast %11 : vector<1x64x8xf32> to vector<64x8xf32>
    %c0_13 = arith.constant 0 : index
    %c62 = arith.constant 62 : index
    %13 = vector.load %arg11[%c0_13, %c62] : memref<64x156xf32, #tpu.memory_space<vmem>>, vector<64x8xf32>
    tpu.vector_store %arg11[%c0_13, %c62], %12 {strides = array<i32>} : memref<64x156xf32, #tpu.memory_space<vmem>>, vector<64x8xf32>,
    %c0_14 = arith.constant 0 : index
    %c0_15 = arith.constant 0 : index
    %c32 = arith.constant 32 : index
    %14 = vector.load %arg1[%c0_14, %c0_15, %c32] : memref<1x64x64xf32, #tpu.memory_space<vmem>>, vector<1x64x8xf32>
    %15 = vector.shape_cast %14 : vector<1x64x8xf32> to vector<64x8xf32>
    %c0_16 = arith.constant 0 : index
    %c74 = arith.constant 74 : index
    %16 = vector.load %arg11[%c0_16, %c74] : memref<64x156xf32, #tpu.memory_space<vmem>>, vector<64x8xf32>
    tpu.vector_store %arg11[%c0_16, %c74], %15 {strides = array<i32>} : memref<64x156xf32, #tpu.memory_space<vmem>>, vector<64x8xf32>,
    %c0_17 = arith.constant 0 : index
    %c0_18 = arith.constant 0 : index
    %c40 = arith.constant 40 : index
    %17 = vector.load %arg1[%c0_17, %c0_18, %c40] : memref<1x64x64xf32, #tpu.memory_space<vmem>>, vector<1x64x8xf32>
    %18 = vector.shape_cast %17 : vector<1x64x8xf32> to vector<64x8xf32>
    %c0_19 = arith.constant 0 : index
    %c86 = arith.constant 86 : index
    %19 = vector.load %arg11[%c0_19, %c86] : memref<64x156xf32, #tpu.memory_space<vmem>>, vector<64x8xf32>
    tpu.vector_store %arg11[%c0_19, %c86], %18 {strides = array<i32>} : memref<64x156xf32, #tpu.memory_space<vmem>>, vector<64x8xf32>,
    %c0_20 = arith.constant 0 : index
    %c0_21 = arith.constant 0 : index
    %c48 = arith.constant 48 : index
    %20 = vector.load %arg1[%c0_20, %c0_21, %c48] : memref<1x64x64xf32, #tpu.memory_space<vmem>>, vector<1x64x8xf32>
    %21 = vector.shape_cast %20 : vector<1x64x8xf32> to vector<64x8xf32>
    %c0_22 = arith.constant 0 : index
    %c98 = arith.constant 98 : index
    %22 = vector.load %arg11[%c0_22, %c98] : memref<64x156xf32, #tpu.memory_space<vmem>>, vector<64x8xf32>
    tpu.vector_store %arg11[%c0_22, %c98], %21 {strides = array<i32>} : memref<64x156xf32, #tpu.memory_space<vmem>>, vector<64x8xf32>,
    %c0_23 = arith.constant 0 : index
    %c0_24 = arith.constant 0 : index
    %c56 = arith.constant 56 : index
    %23 = vector.load %arg1[%c0_23, %c0_24, %c56] : memref<1x64x64xf32, #tpu.memory_space<vmem>>, vector<1x64x8xf32>
    %24 = vector.shape_cast %23 : vector<1x64x8xf32> to vector<64x8xf32>
    %c0_25 = arith.constant 0 : index
    %c110 = arith.constant 110 : index
    %25 = vector.load %arg11[%c0_25, %c110] : memref<64x156xf32, #tpu.memory_space<vmem>>, vector<64x8xf32>
    tpu.vector_store %arg11[%c0_25, %c110], %24 {strides = array<i32>} : memref<64x156xf32, #tpu.memory_space<vmem>>, vector<64x8xf32>,
    %cst_26 = arith.constant 0.000000e+00 : f32
    %26 = vector.broadcast %cst_26 : f32 to vector<32x120xf32>
    %c0_27 = arith.constant 0 : index
    %c0_28 = arith.constant 0 : index
    %c0_29 = arith.constant 0 : index
    %27 = vector.load %arg2[%c0_27, %c0_28, %c0_29] : memref<9x32x64xf32, #tpu.memory_space<vmem>>, vector<1x32x64xf32>
    %28 = vector.shape_cast %27 : vector<1x32x64xf32> to vector<32x64xf32>
    %c0_30 = arith.constant 0 : index
    %c0_31 = arith.constant 0 : index
    %29 = vector.load %arg11[%c0_30, %c0_31] : memref<64x156xf32, #tpu.memory_space<vmem>>, vector<64x120xf32>
    %cst_32 = arith.constant dense<0.000000e+00> : vector<32x120xf32>
    %30 = tpu.matmul %28, %29, %cst_32 {dimension_numbers = #tpu.dot_dimension_numbers<[1], [0], [0], [1], [0, 0, 1, 1], [], []>} : vector<32x64xf32>, vector<64x120xf32>, vector<32x120xf32> -> vector<32x120xf32>
    %31 = arith.addf %26, %30 : vector<32x120xf32>
    %c1 = arith.constant 1 : index
    %c0_33 = arith.constant 0 : index
    %c0_34 = arith.constant 0 : index
    %32 = vector.load %arg2[%c1, %c0_33, %c0_34] : memref<9x32x64xf32, #tpu.memory_space<vmem>>, vector<1x32x64xf32>
    %33 = vector.shape_cast %32 : vector<1x32x64xf32> to vector<32x64xf32>
    %c0_35 = arith.constant 0 : index
    %c1_36 = arith.constant 1 : index
    %34 = vector.load %arg11[%c0_35, %c1_36] : memref<64x156xf32, #tpu.memory_space<vmem>>, vector<64x120xf32>
    %cst_37 = arith.constant dense<0.000000e+00> : vector<32x120xf32>
    %35 = tpu.matmul %33, %34, %cst_37 {dimension_numbers = #tpu.dot_dimension_numbers<[1], [0], [0], [1], [0, 0, 1, 1], [], []>} : vector<32x64xf32>, vector<64x120xf32>, vector<32x120xf32> -> vector<32x120xf32>
    %36 = arith.addf %31, %35 : vector<32x120xf32>
    %c2 = arith.constant 2 : index
    %c0_38 = arith.constant 0 : index
    %c0_39 = arith.constant 0 : index
    %37 = vector.load %arg2[%c2, %c0_38, %c0_39] : memref<9x32x64xf32, #tpu.memory_space<vmem>>, vector<1x32x64xf32>
    %38 = vector.shape_cast %37 : vector<1x32x64xf32> to vector<32x64xf32>
    %c0_40 = arith.constant 0 : index
    %c2_41 = arith.constant 2 : index
    %39 = vector.load %arg11[%c0_40, %c2_41] : memref<64x156xf32, #tpu.memory_space<vmem>>, vector<64x120xf32>
    %cst_42 = arith.constant dense<0.000000e+00> : vector<32x120xf32>
    %40 = tpu.matmul %38, %39, %cst_42 {dimension_numbers = #tpu.dot_dimension_numbers<[1], [0], [0], [1], [0, 0, 1, 1], [], []>} : vector<32x64xf32>, vector<64x120xf32>, vector<32x120xf32> -> vector<32x120xf32>
    %41 = arith.addf %36, %40 : vector<32x120xf32>
    %c3 = arith.constant 3 : index
    %c0_43 = arith.constant 0 : index
    %c0_44 = arith.constant 0 : index
    %42 = vector.load %arg2[%c3, %c0_43, %c0_44] : memref<9x32x64xf32, #tpu.memory_space<vmem>>, vector<1x32x64xf32>
    %43 = vector.shape_cast %42 : vector<1x32x64xf32> to vector<32x64xf32>
    %c0_45 = arith.constant 0 : index
    %c12 = arith.constant 12 : index
    %44 = vector.load %arg11[%c0_45, %c12] : memref<64x156xf32, #tpu.memory_space<vmem>>, vector<64x120xf32>
    %cst_46 = arith.constant dense<0.000000e+00> : vector<32x120xf32>
    %45 = tpu.matmul %43, %44, %cst_46 {dimension_numbers = #tpu.dot_dimension_numbers<[1], [0], [0], [1], [0, 0, 1, 1], [], []>} : vector<32x64xf32>, vector<64x120xf32>, vector<32x120xf32> -> vector<32x120xf32>
    %46 = arith.addf %41, %45 : vector<32x120xf32>
    %c4 = arith.constant 4 : index
    %c0_47 = arith.constant 0 : index
    %c0_48 = arith.constant 0 : index
    %47 = vector.load %arg2[%c4, %c0_47, %c0_48] : memref<9x32x64xf32, #tpu.memory_space<vmem>>, vector<1x32x64xf32>
    %48 = vector.shape_cast %47 : vector<1x32x64xf32> to vector<32x64xf32>
    %c0_49 = arith.constant 0 : index
    %c13 = arith.constant 13 : index
    %49 = vector.load %arg11[%c0_49, %c13] : memref<64x156xf32, #tpu.memory_space<vmem>>, vector<64x120xf32>
    %cst_50 = arith.constant dense<0.000000e+00> : vector<32x120xf32>
    %50 = tpu.matmul %48, %49, %cst_50 {dimension_numbers = #tpu.dot_dimension_numbers<[1], [0], [0], [1], [0, 0, 1, 1], [], []>} : vector<32x64xf32>, vector<64x120xf32>, vector<32x120xf32> -> vector<32x120xf32>
    %51 = arith.addf %46, %50 : vector<32x120xf32>
    %c5 = arith.constant 5 : index
    %c0_51 = arith.constant 0 : index
    %c0_52 = arith.constant 0 : index
    %52 = vector.load %arg2[%c5, %c0_51, %c0_52] : memref<9x32x64xf32, #tpu.memory_space<vmem>>, vector<1x32x64xf32>
    %53 = vector.shape_cast %52 : vector<1x32x64xf32> to vector<32x64xf32>
    %c0_53 = arith.constant 0 : index
    %c14 = arith.constant 14 : index
    %54 = vector.load %arg11[%c0_53, %c14] : memref<64x156xf32, #tpu.memory_space<vmem>>, vector<64x120xf32>
    %cst_54 = arith.constant dense<0.000000e+00> : vector<32x120xf32>
    %55 = tpu.matmul %53, %54, %cst_54 {dimension_numbers = #tpu.dot_dimension_numbers<[1], [0], [0], [1], [0, 0, 1, 1], [], []>} : vector<32x64xf32>, vector<64x120xf32>, vector<32x120xf32> -> vector<32x120xf32>
    %56 = arith.addf %51, %55 : vector<32x120xf32>
    %c6 = arith.constant 6 : index
    %c0_55 = arith.constant 0 : index
    %c0_56 = arith.constant 0 : index
    %57 = vector.load %arg2[%c6, %c0_55, %c0_56] : memref<9x32x64xf32, #tpu.memory_space<vmem>>, vector<1x32x64xf32>
    %58 = vector.shape_cast %57 : vector<1x32x64xf32> to vector<32x64xf32>
    %c0_57 = arith.constant 0 : index
    %c24_58 = arith.constant 24 : index
    %59 = vector.load %arg11[%c0_57, %c24_58] : memref<64x156xf32, #tpu.memory_space<vmem>>, vector<64x120xf32>
    %cst_59 = arith.constant dense<0.000000e+00> : vector<32x120xf32>
    %60 = tpu.matmul %58, %59, %cst_59 {dimension_numbers = #tpu.dot_dimension_numbers<[1], [0], [0], [1], [0, 0, 1, 1], [], []>} : vector<32x64xf32>, vector<64x120xf32>, vector<32x120xf32> -> vector<32x120xf32>
    %61 = arith.addf %56, %60 : vector<32x120xf32>
    %c7 = arith.constant 7 : index
    %c0_60 = arith.constant 0 : index
    %c0_61 = arith.constant 0 : index
    %62 = vector.load %arg2[%c7, %c0_60, %c0_61] : memref<9x32x64xf32, #tpu.memory_space<vmem>>, vector<1x32x64xf32>
    %63 = vector.shape_cast %62 : vector<1x32x64xf32> to vector<32x64xf32>
    %c0_62 = arith.constant 0 : index
    %c25 = arith.constant 25 : index
    %64 = vector.load %arg11[%c0_62, %c25] : memref<64x156xf32, #tpu.memory_space<vmem>>, vector<64x120xf32>
    %cst_63 = arith.constant dense<0.000000e+00> : vector<32x120xf32>
    %65 = tpu.matmul %63, %64, %cst_63 {dimension_numbers = #tpu.dot_dimension_numbers<[1], [0], [0], [1], [0, 0, 1, 1], [], []>} : vector<32x64xf32>, vector<64x120xf32>, vector<32x120xf32> -> vector<32x120xf32>
    %66 = arith.addf %61, %65 : vector<32x120xf32>
    %c8_64 = arith.constant 8 : index
    %c0_65 = arith.constant 0 : index
    %c0_66 = arith.constant 0 : index
    %67 = vector.load %arg2[%c8_64, %c0_65, %c0_66] : memref<9x32x64xf32, #tpu.memory_space<vmem>>, vector<1x32x64xf32>
    %68 = vector.shape_cast %67 : vector<1x32x64xf32> to vector<32x64xf32>
    %c0_67 = arith.constant 0 : index
    %c26_68 = arith.constant 26 : index
    %69 = vector.load %arg11[%c0_67, %c26_68] : memref<64x156xf32, #tpu.memory_space<vmem>>, vector<64x120xf32>
    %cst_69 = arith.constant dense<0.000000e+00> : vector<32x120xf32>
    %70 = tpu.matmul %68, %69, %cst_69 {dimension_numbers = #tpu.dot_dimension_numbers<[1], [0], [0], [1], [0, 0, 1, 1], [], []>} : vector<32x64xf32>, vector<64x120xf32>, vector<32x120xf32> -> vector<32x120xf32>
    %71 = arith.addf %66, %70 : vector<32x120xf32>
    %c0_70 = arith.constant 0 : index
    %c0_71 = arith.constant 0 : index
    %72 = vector.load %arg3[%c0_70, %c0_71] : memref<32x1xf32, #tpu.memory_space<vmem>>, vector<32x1xf32>
    %73 = vector.broadcast %72 : vector<32x1xf32> to vector<32x120xf32>
    %74 = arith.addf %71, %73 : vector<32x120xf32>
    %cst_72 = arith.constant 0.000000e+00 : f32
    %75 = vector.broadcast %cst_72 : f32 to vector<32x120xf32>
    %76 = arith.cmpf oge, %74, %75 : vector<32x120xf32>
    %cst_73 = arith.constant 0.00999999977 : f32
    %77 = vector.broadcast %cst_73 : f32 to vector<32x120xf32>
    %78 = arith.mulf %77, %74 : vector<32x120xf32>
    %79 = arith.select %76, %74, %78 : vector<32x120xi1>, vector<32x120xf32>
    %cst_74 = arith.constant 0.000000e+00 : f32
    %80 = vector.broadcast %cst_74 : f32 to vector<32x210xf32>
    %c0_75 = arith.constant 0 : index
    %c0_76 = arith.constant 0 : index
    %81 = vector.load %arg12[%c0_75, %c0_76] : memref<32x210xf32, #tpu.memory_space<vmem>>, vector<32x210xf32>
    tpu.vector_store %arg12[%c0_75, %c0_76], %80 {strides = array<i32>} : memref<32x210xf32, #tpu.memory_space<vmem>>, vector<32x210xf32>,
    %82 = vector.extract_strided_slice %79 {offsets = [0, 0], sizes = [32, 10], strides = [1, 1]} : vector<32x120xf32> to vector<32x10xf32>
    %c0_77 = arith.constant 0 : index
    %c30 = arith.constant 30 : index
    %83 = vector.load %arg12[%c0_77, %c30] : memref<32x210xf32, #tpu.memory_space<vmem>>, vector<32x10xf32>
    tpu.vector_store %arg12[%c0_77, %c30], %82 {strides = array<i32>} : memref<32x210xf32, #tpu.memory_space<vmem>>, vector<32x10xf32>,
    %84 = vector.extract_strided_slice %79 {offsets = [0, 12], sizes = [32, 10], strides = [1, 1]} : vector<32x120xf32> to vector<32x10xf32>
    %c0_78 = arith.constant 0 : index
    %c44 = arith.constant 44 : index
    %85 = vector.load %arg12[%c0_78, %c44] : memref<32x210xf32, #tpu.memory_space<vmem>>, vector<32x10xf32>
    tpu.vector_store %arg12[%c0_78, %c44], %84 {strides = array<i32>} : memref<32x210xf32, #tpu.memory_space<vmem>>, vector<32x10xf32>,
    %86 = vector.extract_strided_slice %79 {offsets = [0, 24], sizes = [32, 10], strides = [1, 1]} : vector<32x120xf32> to vector<32x10xf32>
    %c0_79 = arith.constant 0 : index
    %c58 = arith.constant 58 : index
    %87 = vector.load %arg12[%c0_79, %c58] : memref<32x210xf32, #tpu.memory_space<vmem>>, vector<32x10xf32>
    tpu.vector_store %arg12[%c0_79, %c58], %86 {strides = array<i32>} : memref<32x210xf32, #tpu.memory_space<vmem>>, vector<32x10xf32>,
    %88 = vector.extract_strided_slice %79 {offsets = [0, 36], sizes = [32, 10], strides = [1, 1]} : vector<32x120xf32> to vector<32x10xf32>
    %c0_80 = arith.constant 0 : index
    %c72 = arith.constant 72 : index
    %89 = vector.load %arg12[%c0_80, %c72] : memref<32x210xf32, #tpu.memory_space<vmem>>, vector<32x10xf32>
    tpu.vector_store %arg12[%c0_80, %c72], %88 {strides = array<i32>} : memref<32x210xf32, #tpu.memory_space<vmem>>, vector<32x10xf32>,
    %90 = vector.extract_strided_slice %79 {offsets = [0, 48], sizes = [32, 10], strides = [1, 1]} : vector<32x120xf32> to vector<32x10xf32>
    %c0_81 = arith.constant 0 : index
    %c86_82 = arith.constant 86 : index
    %91 = vector.load %arg12[%c0_81, %c86_82] : memref<32x210xf32, #tpu.memory_space<vmem>>, vector<32x10xf32>
    tpu.vector_store %arg12[%c0_81, %c86_82], %90 {strides = array<i32>} : memref<32x210xf32, #tpu.memory_space<vmem>>, vector<32x10xf32>,
    %92 = vector.extract_strided_slice %79 {offsets = [0, 60], sizes = [32, 10], strides = [1, 1]} : vector<32x120xf32> to vector<32x10xf32>
    %c0_83 = arith.constant 0 : index
    %c100 = arith.constant 100 : index
    %93 = vector.load %arg12[%c0_83, %c100] : memref<32x210xf32, #tpu.memory_space<vmem>>, vector<32x10xf32>
    tpu.vector_store %arg12[%c0_83, %c100], %92 {strides = array<i32>} : memref<32x210xf32, #tpu.memory_space<vmem>>, vector<32x10xf32>,
    %94 = vector.extract_strided_slice %79 {offsets = [0, 72], sizes = [32, 10], strides = [1, 1]} : vector<32x120xf32> to vector<32x10xf32>
    %c0_84 = arith.constant 0 : index
    %c114 = arith.constant 114 : index
    %95 = vector.load %arg12[%c0_84, %c114] : memref<32x210xf32, #tpu.memory_space<vmem>>, vector<32x10xf32>
    tpu.vector_store %arg12[%c0_84, %c114], %94 {strides = array<i32>} : memref<32x210xf32, #tpu.memory_space<vmem>>, vector<32x10xf32>,
    %96 = vector.extract_strided_slice %79 {offsets = [0, 84], sizes = [32, 10], strides = [1, 1]} : vector<32x120xf32> to vector<32x10xf32>
    %c0_85 = arith.constant 0 : index
    %c128 = arith.constant 128 : index
    %97 = vector.load %arg12[%c0_85, %c128] : memref<32x210xf32, #tpu.memory_space<vmem>>, vector<32x10xf32>
    tpu.vector_store %arg12[%c0_85, %c128], %96 {strides = array<i32>} : memref<32x210xf32, #tpu.memory_space<vmem>>, vector<32x10xf32>,
    %98 = vector.extract_strided_slice %79 {offsets = [0, 96], sizes = [32, 10], strides = [1, 1]} : vector<32x120xf32> to vector<32x10xf32>
    %c0_86 = arith.constant 0 : index
    %c142 = arith.constant 142 : index
    %99 = vector.load %arg12[%c0_86, %c142] : memref<32x210xf32, #tpu.memory_space<vmem>>, vector<32x10xf32>
    tpu.vector_store %arg12[%c0_86, %c142], %98 {strides = array<i32>} : memref<32x210xf32, #tpu.memory_space<vmem>>, vector<32x10xf32>,
    %100 = vector.extract_strided_slice %79 {offsets = [0, 108], sizes = [32, 10], strides = [1, 1]} : vector<32x120xf32> to vector<32x10xf32>
    %c0_87 = arith.constant 0 : index
    %c156 = arith.constant 156 : index
    %101 = vector.load %arg12[%c0_87, %c156] : memref<32x210xf32, #tpu.memory_space<vmem>>, vector<32x10xf32>
    tpu.vector_store %arg12[%c0_87, %c156], %100 {strides = array<i32>} : memref<32x210xf32, #tpu.memory_space<vmem>>, vector<32x10xf32>,
    %cst_88 = arith.constant 0.000000e+00 : f32
    %102 = vector.broadcast %cst_88 : f32 to vector<16x168xf32>
    %c0_89 = arith.constant 0 : index
    %c0_90 = arith.constant 0 : index
    %c0_91 = arith.constant 0 : index
    %103 = vector.load %arg4[%c0_89, %c0_90, %c0_91] : memref<9x16x32xf32, #tpu.memory_space<vmem>>, vector<1x16x32xf32>
    %104 = vector.shape_cast %103 : vector<1x16x32xf32> to vector<16x32xf32>
    %c0_92 = arith.constant 0 : index
    %c0_93 = arith.constant 0 : index
    %105 = vector.load %arg12[%c0_92, %c0_93] : memref<32x210xf32, #tpu.memory_space<vmem>>, vector<32x168xf32>
    %cst_94 = arith.constant dense<0.000000e+00> : vector<16x168xf32>
    %106 = tpu.matmul %104, %105, %cst_94 {dimension_numbers = #tpu.dot_dimension_numbers<[1], [0], [0], [1], [0, 0, 1, 1], [], []>} : vector<16x32xf32>, vector<32x168xf32>, vector<16x168xf32> -> vector<16x168xf32>
    %107 = arith.addf %102, %106 : vector<16x168xf32>
    %c1_95 = arith.constant 1 : index
    %c0_96 = arith.constant 0 : index
    %c0_97 = arith.constant 0 : index
    %108 = vector.load %arg4[%c1_95, %c0_96, %c0_97] : memref<9x16x32xf32, #tpu.memory_space<vmem>>, vector<1x16x32xf32>
    %109 = vector.shape_cast %108 : vector<1x16x32xf32> to vector<16x32xf32>
    %c0_98 = arith.constant 0 : index
    %c1_99 = arith.constant 1 : index
    %110 = vector.load %arg12[%c0_98, %c1_99] : memref<32x210xf32, #tpu.memory_space<vmem>>, vector<32x168xf32>
    %cst_100 = arith.constant dense<0.000000e+00> : vector<16x168xf32>
    %111 = tpu.matmul %109, %110, %cst_100 {dimension_numbers = #tpu.dot_dimension_numbers<[1], [0], [0], [1], [0, 0, 1, 1], [], []>} : vector<16x32xf32>, vector<32x168xf32>, vector<16x168xf32> -> vector<16x168xf32>
    %112 = arith.addf %107, %111 : vector<16x168xf32>
    %c2_101 = arith.constant 2 : index
    %c0_102 = arith.constant 0 : index
    %c0_103 = arith.constant 0 : index
    %113 = vector.load %arg4[%c2_101, %c0_102, %c0_103] : memref<9x16x32xf32, #tpu.memory_space<vmem>>, vector<1x16x32xf32>
    %114 = vector.shape_cast %113 : vector<1x16x32xf32> to vector<16x32xf32>
    %c0_104 = arith.constant 0 : index
    %c2_105 = arith.constant 2 : index
    %115 = vector.load %arg12[%c0_104, %c2_105] : memref<32x210xf32, #tpu.memory_space<vmem>>, vector<32x168xf32>
    %cst_106 = arith.constant dense<0.000000e+00> : vector<16x168xf32>
    %116 = tpu.matmul %114, %115, %cst_106 {dimension_numbers = #tpu.dot_dimension_numbers<[1], [0], [0], [1], [0, 0, 1, 1], [], []>} : vector<16x32xf32>, vector<32x168xf32>, vector<16x168xf32> -> vector<16x168xf32>
    %117 = arith.addf %112, %116 : vector<16x168xf32>
    %c3_107 = arith.constant 3 : index
    %c0_108 = arith.constant 0 : index
    %c0_109 = arith.constant 0 : index
    %118 = vector.load %arg4[%c3_107, %c0_108, %c0_109] : memref<9x16x32xf32, #tpu.memory_space<vmem>>, vector<1x16x32xf32>
    %119 = vector.shape_cast %118 : vector<1x16x32xf32> to vector<16x32xf32>
    %c0_110 = arith.constant 0 : index
    %c14_111 = arith.constant 14 : index
    %120 = vector.load %arg12[%c0_110, %c14_111] : memref<32x210xf32, #tpu.memory_space<vmem>>, vector<32x168xf32>
    %cst_112 = arith.constant dense<0.000000e+00> : vector<16x168xf32>
    %121 = tpu.matmul %119, %120, %cst_112 {dimension_numbers = #tpu.dot_dimension_numbers<[1], [0], [0], [1], [0, 0, 1, 1], [], []>} : vector<16x32xf32>, vector<32x168xf32>, vector<16x168xf32> -> vector<16x168xf32>
    %122 = arith.addf %117, %121 : vector<16x168xf32>
    %c4_113 = arith.constant 4 : index
    %c0_114 = arith.constant 0 : index
    %c0_115 = arith.constant 0 : index
    %123 = vector.load %arg4[%c4_113, %c0_114, %c0_115] : memref<9x16x32xf32, #tpu.memory_space<vmem>>, vector<1x16x32xf32>
    %124 = vector.shape_cast %123 : vector<1x16x32xf32> to vector<16x32xf32>
    %c0_116 = arith.constant 0 : index
    %c15 = arith.constant 15 : index
    %125 = vector.load %arg12[%c0_116, %c15] : memref<32x210xf32, #tpu.memory_space<vmem>>, vector<32x168xf32>
    %cst_117 = arith.constant dense<0.000000e+00> : vector<16x168xf32>
    %126 = tpu.matmul %124, %125, %cst_117 {dimension_numbers = #tpu.dot_dimension_numbers<[1], [0], [0], [1], [0, 0, 1, 1], [], []>} : vector<16x32xf32>, vector<32x168xf32>, vector<16x168xf32> -> vector<16x168xf32>
    %127 = arith.addf %122, %126 : vector<16x168xf32>
    %c5_118 = arith.constant 5 : index
    %c0_119 = arith.constant 0 : index
    %c0_120 = arith.constant 0 : index
    %128 = vector.load %arg4[%c5_118, %c0_119, %c0_120] : memref<9x16x32xf32, #tpu.memory_space<vmem>>, vector<1x16x32xf32>
    %129 = vector.shape_cast %128 : vector<1x16x32xf32> to vector<16x32xf32>
    %c0_121 = arith.constant 0 : index
    %c16_122 = arith.constant 16 : index
    %130 = vector.load %arg12[%c0_121, %c16_122] : memref<32x210xf32, #tpu.memory_space<vmem>>, vector<32x168xf32>
    %cst_123 = arith.constant dense<0.000000e+00> : vector<16x168xf32>
    %131 = tpu.matmul %129, %130, %cst_123 {dimension_numbers = #tpu.dot_dimension_numbers<[1], [0], [0], [1], [0, 0, 1, 1], [], []>} : vector<16x32xf32>, vector<32x168xf32>, vector<16x168xf32> -> vector<16x168xf32>
    %132 = arith.addf %127, %131 : vector<16x168xf32>
    %c6_124 = arith.constant 6 : index
    %c0_125 = arith.constant 0 : index
    %c0_126 = arith.constant 0 : index
    %133 = vector.load %arg4[%c6_124, %c0_125, %c0_126] : memref<9x16x32xf32, #tpu.memory_space<vmem>>, vector<1x16x32xf32>
    %134 = vector.shape_cast %133 : vector<1x16x32xf32> to vector<16x32xf32>
    %c0_127 = arith.constant 0 : index
    %c28 = arith.constant 28 : index
    %135 = vector.load %arg12[%c0_127, %c28] : memref<32x210xf32, #tpu.memory_space<vmem>>, vector<32x168xf32>
    %cst_128 = arith.constant dense<0.000000e+00> : vector<16x168xf32>
    %136 = tpu.matmul %134, %135, %cst_128 {dimension_numbers = #tpu.dot_dimension_numbers<[1], [0], [0], [1], [0, 0, 1, 1], [], []>} : vector<16x32xf32>, vector<32x168xf32>, vector<16x168xf32> -> vector<16x168xf32>
    %137 = arith.addf %132, %136 : vector<16x168xf32>
    %c7_129 = arith.constant 7 : index
    %c0_130 = arith.constant 0 : index
    %c0_131 = arith.constant 0 : index
    %138 = vector.load %arg4[%c7_129, %c0_130, %c0_131] : memref<9x16x32xf32, #tpu.memory_space<vmem>>, vector<1x16x32xf32>
    %139 = vector.shape_cast %138 : vector<1x16x32xf32> to vector<16x32xf32>
    %c0_132 = arith.constant 0 : index
    %c29 = arith.constant 29 : index
    %140 = vector.load %arg12[%c0_132, %c29] : memref<32x210xf32, #tpu.memory_space<vmem>>, vector<32x168xf32>
    %cst_133 = arith.constant dense<0.000000e+00> : vector<16x168xf32>
    %141 = tpu.matmul %139, %140, %cst_133 {dimension_numbers = #tpu.dot_dimension_numbers<[1], [0], [0], [1], [0, 0, 1, 1], [], []>} : vector<16x32xf32>, vector<32x168xf32>, vector<16x168xf32> -> vector<16x168xf32>
    %142 = arith.addf %137, %141 : vector<16x168xf32>
    %c8_134 = arith.constant 8 : index
    %c0_135 = arith.constant 0 : index
    %c0_136 = arith.constant 0 : index
    %143 = vector.load %arg4[%c8_134, %c0_135, %c0_136] : memref<9x16x32xf32, #tpu.memory_space<vmem>>, vector<1x16x32xf32>
    %144 = vector.shape_cast %143 : vector<1x16x32xf32> to vector<16x32xf32>
    %c0_137 = arith.constant 0 : index
    %c30_138 = arith.constant 30 : index
    %145 = vector.load %arg12[%c0_137, %c30_138] : memref<32x210xf32, #tpu.memory_space<vmem>>, vector<32x168xf32>
    %cst_139 = arith.constant dense<0.000000e+00> : vector<16x168xf32>
    %146 = tpu.matmul %144, %145, %cst_139 {dimension_numbers = #tpu.dot_dimension_numbers<[1], [0], [0], [1], [0, 0, 1, 1], [], []>} : vector<16x32xf32>, vector<32x168xf32>, vector<16x168xf32> -> vector<16x168xf32>
    %147 = arith.addf %142, %146 : vector<16x168xf32>
    %c0_140 = arith.constant 0 : index
    %c0_141 = arith.constant 0 : index
    %148 = vector.load %arg5[%c0_140, %c0_141] : memref<16x1xf32, #tpu.memory_space<vmem>>, vector<16x1xf32>
    %149 = vector.broadcast %148 : vector<16x1xf32> to vector<16x168xf32>
    %150 = arith.addf %147, %149 : vector<16x168xf32>
    %cst_142 = arith.constant 0.000000e+00 : f32
    %151 = vector.broadcast %cst_142 : f32 to vector<16x168xf32>
    %152 = arith.cmpf oge, %150, %151 : vector<16x168xf32>
    %cst_143 = arith.constant 0.00999999977 : f32
    %153 = vector.broadcast %cst_143 : f32 to vector<16x168xf32>
    %154 = arith.mulf %153, %150 : vector<16x168xf32>
    %155 = arith.select %152, %150, %154 : vector<16x168xi1>, vector<16x168xf32>
    %cst_144 = arith.constant 0.000000e+00 : f32
    %156 = vector.broadcast %cst_144 : f32 to vector<16x272xf32>
    %c0_145 = arith.constant 0 : index
    %c0_146 = arith.constant 0 : index
    %157 = vector.load %arg13[%c0_145, %c0_146] : memref<16x272xf32, #tpu.memory_space<vmem>>, vector<16x272xf32>
    tpu.vector_store %arg13[%c0_145, %c0_146], %156 {strides = array<i32>} : memref<16x272xf32, #tpu.memory_space<vmem>>, vector<16x272xf32>,
    %158 = vector.extract_strided_slice %155 {offsets = [0, 0], sizes = [16, 12], strides = [1, 1]} : vector<16x168xf32> to vector<16x12xf32>
    %c0_147 = arith.constant 0 : index
    %c34 = arith.constant 34 : index
    %159 = vector.load %arg13[%c0_147, %c34] : memref<16x272xf32, #tpu.memory_space<vmem>>, vector<16x12xf32>
    tpu.vector_store %arg13[%c0_147, %c34], %158 {strides = array<i32>} : memref<16x272xf32, #tpu.memory_space<vmem>>, vector<16x12xf32>,
    %160 = vector.extract_strided_slice %155 {offsets = [0, 14], sizes = [16, 12], strides = [1, 1]} : vector<16x168xf32> to vector<16x12xf32>
    %c0_148 = arith.constant 0 : index
    %c50_149 = arith.constant 50 : index
    %161 = vector.load %arg13[%c0_148, %c50_149] : memref<16x272xf32, #tpu.memory_space<vmem>>, vector<16x12xf32>
    tpu.vector_store %arg13[%c0_148, %c50_149], %160 {strides = array<i32>} : memref<16x272xf32, #tpu.memory_space<vmem>>, vector<16x12xf32>,
    %162 = vector.extract_strided_slice %155 {offsets = [0, 28], sizes = [16, 12], strides = [1, 1]} : vector<16x168xf32> to vector<16x12xf32>
    %c0_150 = arith.constant 0 : index
    %c66 = arith.constant 66 : index
    %163 = vector.load %arg13[%c0_150, %c66] : memref<16x272xf32, #tpu.memory_space<vmem>>, vector<16x12xf32>
    tpu.vector_store %arg13[%c0_150, %c66], %162 {strides = array<i32>} : memref<16x272xf32, #tpu.memory_space<vmem>>, vector<16x12xf32>,
    %164 = vector.extract_strided_slice %155 {offsets = [0, 42], sizes = [16, 12], strides = [1, 1]} : vector<16x168xf32> to vector<16x12xf32>
    %c0_151 = arith.constant 0 : index
    %c82 = arith.constant 82 : index
    %165 = vector.load %arg13[%c0_151, %c82] : memref<16x272xf32, #tpu.memory_space<vmem>>, vector<16x12xf32>
    tpu.vector_store %arg13[%c0_151, %c82], %164 {strides = array<i32>} : memref<16x272xf32, #tpu.memory_space<vmem>>, vector<16x12xf32>,
    %166 = vector.extract_strided_slice %155 {offsets = [0, 56], sizes = [16, 12], strides = [1, 1]} : vector<16x168xf32> to vector<16x12xf32>
    %c0_152 = arith.constant 0 : index
    %c98_153 = arith.constant 98 : index
    %167 = vector.load %arg13[%c0_152, %c98_153] : memref<16x272xf32, #tpu.memory_space<vmem>>, vector<16x12xf32>
    tpu.vector_store %arg13[%c0_152, %c98_153], %166 {strides = array<i32>} : memref<16x272xf32, #tpu.memory_space<vmem>>, vector<16x12xf32>,
    %168 = vector.extract_strided_slice %155 {offsets = [0, 70], sizes = [16, 12], strides = [1, 1]} : vector<16x168xf32> to vector<16x12xf32>
    %c0_154 = arith.constant 0 : index
    %c114_155 = arith.constant 114 : index
    %169 = vector.load %arg13[%c0_154, %c114_155] : memref<16x272xf32, #tpu.memory_space<vmem>>, vector<16x12xf32>
    tpu.vector_store %arg13[%c0_154, %c114_155], %168 {strides = array<i32>} : memref<16x272xf32, #tpu.memory_space<vmem>>, vector<16x12xf32>,
    %170 = vector.extract_strided_slice %155 {offsets = [0, 84], sizes = [16, 12], strides = [1, 1]} : vector<16x168xf32> to vector<16x12xf32>
    %c0_156 = arith.constant 0 : index
    %c130 = arith.constant 130 : index
    %171 = vector.load %arg13[%c0_156, %c130] : memref<16x272xf32, #tpu.memory_space<vmem>>, vector<16x12xf32>
    tpu.vector_store %arg13[%c0_156, %c130], %170 {strides = array<i32>} : memref<16x272xf32, #tpu.memory_space<vmem>>, vector<16x12xf32>,
    %172 = vector.extract_strided_slice %155 {offsets = [0, 98], sizes = [16, 12], strides = [1, 1]} : vector<16x168xf32> to vector<16x12xf32>
    %c0_157 = arith.constant 0 : index
    %c146 = arith.constant 146 : index
    %173 = vector.load %arg13[%c0_157, %c146] : memref<16x272xf32, #tpu.memory_space<vmem>>, vector<16x12xf32>
    tpu.vector_store %arg13[%c0_157, %c146], %172 {strides = array<i32>} : memref<16x272xf32, #tpu.memory_space<vmem>>, vector<16x12xf32>,
    %174 = vector.extract_strided_slice %155 {offsets = [0, 112], sizes = [16, 12], strides = [1, 1]} : vector<16x168xf32> to vector<16x12xf32>
    %c0_158 = arith.constant 0 : index
    %c162 = arith.constant 162 : index
    %175 = vector.load %arg13[%c0_158, %c162] : memref<16x272xf32, #tpu.memory_space<vmem>>, vector<16x12xf32>
    tpu.vector_store %arg13[%c0_158, %c162], %174 {strides = array<i32>} : memref<16x272xf32, #tpu.memory_space<vmem>>, vector<16x12xf32>,
    %176 = vector.extract_strided_slice %155 {offsets = [0, 126], sizes = [16, 12], strides = [1, 1]} : vector<16x168xf32> to vector<16x12xf32>
    %c0_159 = arith.constant 0 : index
    %c178 = arith.constant 178 : index
    %177 = vector.load %arg13[%c0_159, %c178] : memref<16x272xf32, #tpu.memory_space<vmem>>, vector<16x12xf32>
    tpu.vector_store %arg13[%c0_159, %c178], %176 {strides = array<i32>} : memref<16x272xf32, #tpu.memory_space<vmem>>, vector<16x12xf32>,
    %178 = vector.extract_strided_slice %155 {offsets = [0, 140], sizes = [16, 12], strides = [1, 1]} : vector<16x168xf32> to vector<16x12xf32>
    %c0_160 = arith.constant 0 : index
    %c194 = arith.constant 194 : index
    %179 = vector.load %arg13[%c0_160, %c194] : memref<16x272xf32, #tpu.memory_space<vmem>>, vector<16x12xf32>
    tpu.vector_store %arg13[%c0_160, %c194], %178 {strides = array<i32>} : memref<16x272xf32, #tpu.memory_space<vmem>>, vector<16x12xf32>,
    %180 = vector.extract_strided_slice %155 {offsets = [0, 154], sizes = [16, 12], strides = [1, 1]} : vector<16x168xf32> to vector<16x12xf32>
    %c0_161 = arith.constant 0 : index
    %c210 = arith.constant 210 : index
    %181 = vector.load %arg13[%c0_161, %c210] : memref<16x272xf32, #tpu.memory_space<vmem>>, vector<16x12xf32>
    tpu.vector_store %arg13[%c0_161, %c210], %180 {strides = array<i32>} : memref<16x272xf32, #tpu.memory_space<vmem>>, vector<16x12xf32>,
    %cst_162 = arith.constant 0.000000e+00 : f32
    %182 = vector.broadcast %cst_162 : f32 to vector<8x224xf32>
    %c0_163 = arith.constant 0 : index
    %c0_164 = arith.constant 0 : index
    %c0_165 = arith.constant 0 : index
    %183 = vector.load %arg6[%c0_163, %c0_164, %c0_165] : memref<9x8x16xf32, #tpu.memory_space<vmem>>, vector<1x8x16xf32>
    %184 = vector.shape_cast %183 : vector<1x8x16xf32> to vector<8x16xf32>
    %c0_166 = arith.constant 0 : index
    %c0_167 = arith.constant 0 : index
    %185 = vector.load %arg13[%c0_166, %c0_167] : memref<16x272xf32, #tpu.memory_space<vmem>>, vector<16x224xf32>
    %cst_168 = arith.constant dense<0.000000e+00> : vector<8x224xf32>
    %186 = tpu.matmul %184, %185, %cst_168 {dimension_numbers = #tpu.dot_dimension_numbers<[1], [0], [0], [1], [0, 0, 1, 1], [], []>} : vector<8x16xf32>, vector<16x224xf32>, vector<8x224xf32> -> vector<8x224xf32>
    %187 = arith.addf %182, %186 : vector<8x224xf32>
    %c1_169 = arith.constant 1 : index
    %c0_170 = arith.constant 0 : index
    %c0_171 = arith.constant 0 : index
    %188 = vector.load %arg6[%c1_169, %c0_170, %c0_171] : memref<9x8x16xf32, #tpu.memory_space<vmem>>, vector<1x8x16xf32>
    %189 = vector.shape_cast %188 : vector<1x8x16xf32> to vector<8x16xf32>
    %c0_172 = arith.constant 0 : index
    %c1_173 = arith.constant 1 : index
    %190 = vector.load %arg13[%c0_172, %c1_173] : memref<16x272xf32, #tpu.memory_space<vmem>>, vector<16x224xf32>
    %cst_174 = arith.constant dense<0.000000e+00> : vector<8x224xf32>
    %191 = tpu.matmul %189, %190, %cst_174 {dimension_numbers = #tpu.dot_dimension_numbers<[1], [0], [0], [1], [0, 0, 1, 1], [], []>} : vector<8x16xf32>, vector<16x224xf32>, vector<8x224xf32> -> vector<8x224xf32>
    %192 = arith.addf %187, %191 : vector<8x224xf32>
    %c2_175 = arith.constant 2 : index
    %c0_176 = arith.constant 0 : index
    %c0_177 = arith.constant 0 : index
    %193 = vector.load %arg6[%c2_175, %c0_176, %c0_177] : memref<9x8x16xf32, #tpu.memory_space<vmem>>, vector<1x8x16xf32>
    %194 = vector.shape_cast %193 : vector<1x8x16xf32> to vector<8x16xf32>
    %c0_178 = arith.constant 0 : index
    %c2_179 = arith.constant 2 : index
    %195 = vector.load %arg13[%c0_178, %c2_179] : memref<16x272xf32, #tpu.memory_space<vmem>>, vector<16x224xf32>
    %cst_180 = arith.constant dense<0.000000e+00> : vector<8x224xf32>
    %196 = tpu.matmul %194, %195, %cst_180 {dimension_numbers = #tpu.dot_dimension_numbers<[1], [0], [0], [1], [0, 0, 1, 1], [], []>} : vector<8x16xf32>, vector<16x224xf32>, vector<8x224xf32> -> vector<8x224xf32>
    %197 = arith.addf %192, %196 : vector<8x224xf32>
    %c3_181 = arith.constant 3 : index
    %c0_182 = arith.constant 0 : index
    %c0_183 = arith.constant 0 : index
    %198 = vector.load %arg6[%c3_181, %c0_182, %c0_183] : memref<9x8x16xf32, #tpu.memory_space<vmem>>, vector<1x8x16xf32>
    %199 = vector.shape_cast %198 : vector<1x8x16xf32> to vector<8x16xf32>
    %c0_184 = arith.constant 0 : index
    %c16_185 = arith.constant 16 : index
    %200 = vector.load %arg13[%c0_184, %c16_185] : memref<16x272xf32, #tpu.memory_space<vmem>>, vector<16x224xf32>
    %cst_186 = arith.constant dense<0.000000e+00> : vector<8x224xf32>
    %201 = tpu.matmul %199, %200, %cst_186 {dimension_numbers = #tpu.dot_dimension_numbers<[1], [0], [0], [1], [0, 0, 1, 1], [], []>} : vector<8x16xf32>, vector<16x224xf32>, vector<8x224xf32> -> vector<8x224xf32>
    %202 = arith.addf %197, %201 : vector<8x224xf32>
    %c4_187 = arith.constant 4 : index
    %c0_188 = arith.constant 0 : index
    %c0_189 = arith.constant 0 : index
    %203 = vector.load %arg6[%c4_187, %c0_188, %c0_189] : memref<9x8x16xf32, #tpu.memory_space<vmem>>, vector<1x8x16xf32>
    %204 = vector.shape_cast %203 : vector<1x8x16xf32> to vector<8x16xf32>
    %c0_190 = arith.constant 0 : index
    %c17 = arith.constant 17 : index
    %205 = vector.load %arg13[%c0_190, %c17] : memref<16x272xf32, #tpu.memory_space<vmem>>, vector<16x224xf32>
    %cst_191 = arith.constant dense<0.000000e+00> : vector<8x224xf32>
    %206 = tpu.matmul %204, %205, %cst_191 {dimension_numbers = #tpu.dot_dimension_numbers<[1], [0], [0], [1], [0, 0, 1, 1], [], []>} : vector<8x16xf32>, vector<16x224xf32>, vector<8x224xf32> -> vector<8x224xf32>
    %207 = arith.addf %202, %206 : vector<8x224xf32>
    %c5_192 = arith.constant 5 : index
    %c0_193 = arith.constant 0 : index
    %c0_194 = arith.constant 0 : index
    %208 = vector.load %arg6[%c5_192, %c0_193, %c0_194] : memref<9x8x16xf32, #tpu.memory_space<vmem>>, vector<1x8x16xf32>
    %209 = vector.shape_cast %208 : vector<1x8x16xf32> to vector<8x16xf32>
    %c0_195 = arith.constant 0 : index
    %c18 = arith.constant 18 : index
    %210 = vector.load %arg13[%c0_195, %c18] : memref<16x272xf32, #tpu.memory_space<vmem>>, vector<16x224xf32>
    %cst_196 = arith.constant dense<0.000000e+00> : vector<8x224xf32>
    %211 = tpu.matmul %209, %210, %cst_196 {dimension_numbers = #tpu.dot_dimension_numbers<[1], [0], [0], [1], [0, 0, 1, 1], [], []>} : vector<8x16xf32>, vector<16x224xf32>, vector<8x224xf32> -> vector<8x224xf32>
    %212 = arith.addf %207, %211 : vector<8x224xf32>
    %c6_197 = arith.constant 6 : index
    %c0_198 = arith.constant 0 : index
    %c0_199 = arith.constant 0 : index
    %213 = vector.load %arg6[%c6_197, %c0_198, %c0_199] : memref<9x8x16xf32, #tpu.memory_space<vmem>>, vector<1x8x16xf32>
    %214 = vector.shape_cast %213 : vector<1x8x16xf32> to vector<8x16xf32>
    %c0_200 = arith.constant 0 : index
    %c32_201 = arith.constant 32 : index
    %215 = vector.load %arg13[%c0_200, %c32_201] : memref<16x272xf32, #tpu.memory_space<vmem>>, vector<16x224xf32>
    %cst_202 = arith.constant dense<0.000000e+00> : vector<8x224xf32>
    %216 = tpu.matmul %214, %215, %cst_202 {dimension_numbers = #tpu.dot_dimension_numbers<[1], [0], [0], [1], [0, 0, 1, 1], [], []>} : vector<8x16xf32>, vector<16x224xf32>, vector<8x224xf32> -> vector<8x224xf32>
    %217 = arith.addf %212, %216 : vector<8x224xf32>
    %c7_203 = arith.constant 7 : index
    %c0_204 = arith.constant 0 : index
    %c0_205 = arith.constant 0 : index
    %218 = vector.load %arg6[%c7_203, %c0_204, %c0_205] : memref<9x8x16xf32, #tpu.memory_space<vmem>>, vector<1x8x16xf32>
    %219 = vector.shape_cast %218 : vector<1x8x16xf32> to vector<8x16xf32>
    %c0_206 = arith.constant 0 : index
    %c33 = arith.constant 33 : index
    %220 = vector.load %arg13[%c0_206, %c33] : memref<16x272xf32, #tpu.memory_space<vmem>>, vector<16x224xf32>
    %cst_207 = arith.constant dense<0.000000e+00> : vector<8x224xf32>
    %221 = tpu.matmul %219, %220, %cst_207 {dimension_numbers = #tpu.dot_dimension_numbers<[1], [0], [0], [1], [0, 0, 1, 1], [], []>} : vector<8x16xf32>, vector<16x224xf32>, vector<8x224xf32> -> vector<8x224xf32>
    %222 = arith.addf %217, %221 : vector<8x224xf32>
    %c8_208 = arith.constant 8 : index
    %c0_209 = arith.constant 0 : index
    %c0_210 = arith.constant 0 : index
    %223 = vector.load %arg6[%c8_208, %c0_209, %c0_210] : memref<9x8x16xf32, #tpu.memory_space<vmem>>, vector<1x8x16xf32>
    %224 = vector.shape_cast %223 : vector<1x8x16xf32> to vector<8x16xf32>
    %c0_211 = arith.constant 0 : index
    %c34_212 = arith.constant 34 : index
    %225 = vector.load %arg13[%c0_211, %c34_212] : memref<16x272xf32, #tpu.memory_space<vmem>>, vector<16x224xf32>
    %cst_213 = arith.constant dense<0.000000e+00> : vector<8x224xf32>
    %226 = tpu.matmul %224, %225, %cst_213 {dimension_numbers = #tpu.dot_dimension_numbers<[1], [0], [0], [1], [0, 0, 1, 1], [], []>} : vector<8x16xf32>, vector<16x224xf32>, vector<8x224xf32> -> vector<8x224xf32>
    %227 = arith.addf %222, %226 : vector<8x224xf32>
    %c0_214 = arith.constant 0 : index
    %c0_215 = arith.constant 0 : index
    %228 = vector.load %arg7[%c0_214, %c0_215] : memref<8x1xf32, #tpu.memory_space<vmem>>, vector<8x1xf32>
    %229 = vector.broadcast %228 : vector<8x1xf32> to vector<8x224xf32>
    %230 = arith.addf %227, %229 : vector<8x224xf32>
    %cst_216 = arith.constant 0.000000e+00 : f32
    %231 = vector.broadcast %cst_216 : f32 to vector<8x224xf32>
    %232 = arith.cmpf oge, %230, %231 : vector<8x224xf32>
    %cst_217 = arith.constant 0.00999999977 : f32
    %233 = vector.broadcast %cst_217 : f32 to vector<8x224xf32>
    %234 = arith.mulf %233, %230 : vector<8x224xf32>
    %235 = arith.select %232, %230, %234 : vector<8x224xi1>, vector<8x224xf32>
    %cst_218 = arith.constant 0.000000e+00 : f32
    %236 = vector.broadcast %cst_218 : f32 to vector<8x342xf32>
    %c0_219 = arith.constant 0 : index
    %c0_220 = arith.constant 0 : index
    %237 = vector.load %arg14[%c0_219, %c0_220] : memref<8x342xf32, #tpu.memory_space<vmem>>, vector<8x342xf32>
    tpu.vector_store %arg14[%c0_219, %c0_220], %236 {strides = array<i32>} : memref<8x342xf32, #tpu.memory_space<vmem>>, vector<8x342xf32>,
    %238 = vector.extract_strided_slice %235 {offsets = [0, 0], sizes = [8, 14], strides = [1, 1]} : vector<8x224xf32> to vector<8x14xf32>
    %c0_221 = arith.constant 0 : index
    %c38_222 = arith.constant 38 : index
    %239 = vector.load %arg14[%c0_221, %c38_222] : memref<8x342xf32, #tpu.memory_space<vmem>>, vector<8x14xf32>
    tpu.vector_store %arg14[%c0_221, %c38_222], %238 {strides = array<i32>} : memref<8x342xf32, #tpu.memory_space<vmem>>, vector<8x14xf32>,
    %240 = vector.extract_strided_slice %235 {offsets = [0, 16], sizes = [8, 14], strides = [1, 1]} : vector<8x224xf32> to vector<8x14xf32>
    %c0_223 = arith.constant 0 : index
    %c56_224 = arith.constant 56 : index
    %241 = vector.load %arg14[%c0_223, %c56_224] : memref<8x342xf32, #tpu.memory_space<vmem>>, vector<8x14xf32>
    tpu.vector_store %arg14[%c0_223, %c56_224], %240 {strides = array<i32>} : memref<8x342xf32, #tpu.memory_space<vmem>>, vector<8x14xf32>,
    %242 = vector.extract_strided_slice %235 {offsets = [0, 32], sizes = [8, 14], strides = [1, 1]} : vector<8x224xf32> to vector<8x14xf32>
    %c0_225 = arith.constant 0 : index
    %c74_226 = arith.constant 74 : index
    %243 = vector.load %arg14[%c0_225, %c74_226] : memref<8x342xf32, #tpu.memory_space<vmem>>, vector<8x14xf32>
    tpu.vector_store %arg14[%c0_225, %c74_226], %242 {strides = array<i32>} : memref<8x342xf32, #tpu.memory_space<vmem>>, vector<8x14xf32>,
    %244 = vector.extract_strided_slice %235 {offsets = [0, 48], sizes = [8, 14], strides = [1, 1]} : vector<8x224xf32> to vector<8x14xf32>
    %c0_227 = arith.constant 0 : index
    %c92 = arith.constant 92 : index
    %245 = vector.load %arg14[%c0_227, %c92] : memref<8x342xf32, #tpu.memory_space<vmem>>, vector<8x14xf32>
    tpu.vector_store %arg14[%c0_227, %c92], %244 {strides = array<i32>} : memref<8x342xf32, #tpu.memory_space<vmem>>, vector<8x14xf32>,
    %246 = vector.extract_strided_slice %235 {offsets = [0, 64], sizes = [8, 14], strides = [1, 1]} : vector<8x224xf32> to vector<8x14xf32>
    %c0_228 = arith.constant 0 : index
    %c110_229 = arith.constant 110 : index
    %247 = vector.load %arg14[%c0_228, %c110_229] : memref<8x342xf32, #tpu.memory_space<vmem>>, vector<8x14xf32>
    tpu.vector_store %arg14[%c0_228, %c110_229], %246 {strides = array<i32>} : memref<8x342xf32, #tpu.memory_space<vmem>>, vector<8x14xf32>,
    %248 = vector.extract_strided_slice %235 {offsets = [0, 80], sizes = [8, 14], strides = [1, 1]} : vector<8x224xf32> to vector<8x14xf32>
    %c0_230 = arith.constant 0 : index
    %c128_231 = arith.constant 128 : index
    %249 = vector.load %arg14[%c0_230, %c128_231] : memref<8x342xf32, #tpu.memory_space<vmem>>, vector<8x14xf32>
    tpu.vector_store %arg14[%c0_230, %c128_231], %248 {strides = array<i32>} : memref<8x342xf32, #tpu.memory_space<vmem>>, vector<8x14xf32>,
    %250 = vector.extract_strided_slice %235 {offsets = [0, 96], sizes = [8, 14], strides = [1, 1]} : vector<8x224xf32> to vector<8x14xf32>
    %c0_232 = arith.constant 0 : index
    %c146_233 = arith.constant 146 : index
    %251 = vector.load %arg14[%c0_232, %c146_233] : memref<8x342xf32, #tpu.memory_space<vmem>>, vector<8x14xf32>
    tpu.vector_store %arg14[%c0_232, %c146_233], %250 {strides = array<i32>} : memref<8x342xf32, #tpu.memory_space<vmem>>, vector<8x14xf32>,
    %252 = vector.extract_strided_slice %235 {offsets = [0, 112], sizes = [8, 14], strides = [1, 1]} : vector<8x224xf32> to vector<8x14xf32>
    %c0_234 = arith.constant 0 : index
    %c164 = arith.constant 164 : index
    %253 = vector.load %arg14[%c0_234, %c164] : memref<8x342xf32, #tpu.memory_space<vmem>>, vector<8x14xf32>
    tpu.vector_store %arg14[%c0_234, %c164], %252 {strides = array<i32>} : memref<8x342xf32, #tpu.memory_space<vmem>>, vector<8x14xf32>,
    %254 = vector.extract_strided_slice %235 {offsets = [0, 128], sizes = [8, 14], strides = [1, 1]} : vector<8x224xf32> to vector<8x14xf32>
    %c0_235 = arith.constant 0 : index
    %c182 = arith.constant 182 : index
    %255 = vector.load %arg14[%c0_235, %c182] : memref<8x342xf32, #tpu.memory_space<vmem>>, vector<8x14xf32>
    tpu.vector_store %arg14[%c0_235, %c182], %254 {strides = array<i32>} : memref<8x342xf32, #tpu.memory_space<vmem>>, vector<8x14xf32>,
    %256 = vector.extract_strided_slice %235 {offsets = [0, 144], sizes = [8, 14], strides = [1, 1]} : vector<8x224xf32> to vector<8x14xf32>
    %c0_236 = arith.constant 0 : index
    %c200 = arith.constant 200 : index
    %257 = vector.load %arg14[%c0_236, %c200] : memref<8x342xf32, #tpu.memory_space<vmem>>, vector<8x14xf32>
    tpu.vector_store %arg14[%c0_236, %c200], %256 {strides = array<i32>} : memref<8x342xf32, #tpu.memory_space<vmem>>, vector<8x14xf32>,
    %258 = vector.extract_strided_slice %235 {offsets = [0, 160], sizes = [8, 14], strides = [1, 1]} : vector<8x224xf32> to vector<8x14xf32>
    %c0_237 = arith.constant 0 : index
    %c218 = arith.constant 218 : index
    %259 = vector.load %arg14[%c0_237, %c218] : memref<8x342xf32, #tpu.memory_space<vmem>>, vector<8x14xf32>
    tpu.vector_store %arg14[%c0_237, %c218], %258 {strides = array<i32>} : memref<8x342xf32, #tpu.memory_space<vmem>>, vector<8x14xf32>,
    %260 = vector.extract_strided_slice %235 {offsets = [0, 176], sizes = [8, 14], strides = [1, 1]} : vector<8x224xf32> to vector<8x14xf32>
    %c0_238 = arith.constant 0 : index
    %c236 = arith.constant 236 : index
    %261 = vector.load %arg14[%c0_238, %c236] : memref<8x342xf32, #tpu.memory_space<vmem>>, vector<8x14xf32>
    tpu.vector_store %arg14[%c0_238, %c236], %260 {strides = array<i32>} : memref<8x342xf32, #tpu.memory_space<vmem>>, vector<8x14xf32>,
    %262 = vector.extract_strided_slice %235 {offsets = [0, 192], sizes = [8, 14], strides = [1, 1]} : vector<8x224xf32> to vector<8x14xf32>
    %c0_239 = arith.constant 0 : index
    %c254 = arith.constant 254 : index
    %263 = vector.load %arg14[%c0_239, %c254] : memref<8x342xf32, #tpu.memory_space<vmem>>, vector<8x14xf32>
    tpu.vector_store %arg14[%c0_239, %c254], %262 {strides = array<i32>} : memref<8x342xf32, #tpu.memory_space<vmem>>, vector<8x14xf32>,
    %264 = vector.extract_strided_slice %235 {offsets = [0, 208], sizes = [8, 14], strides = [1, 1]} : vector<8x224xf32> to vector<8x14xf32>
    %c0_240 = arith.constant 0 : index
    %c272 = arith.constant 272 : index
    %265 = vector.load %arg14[%c0_240, %c272] : memref<8x342xf32, #tpu.memory_space<vmem>>, vector<8x14xf32>
    tpu.vector_store %arg14[%c0_240, %c272], %264 {strides = array<i32>} : memref<8x342xf32, #tpu.memory_space<vmem>>, vector<8x14xf32>,
    %cst_241 = arith.constant 0.000000e+00 : f32
    %266 = vector.broadcast %cst_241 : f32 to vector<3x288xf32>
    %c0_242 = arith.constant 0 : index
    %c0_243 = arith.constant 0 : index
    %c0_244 = arith.constant 0 : index
    %267 = vector.load %arg8[%c0_242, %c0_243, %c0_244] : memref<9x3x8xf32, #tpu.memory_space<vmem>>, vector<1x3x8xf32>
    %268 = vector.shape_cast %267 : vector<1x3x8xf32> to vector<3x8xf32>
    %c0_245 = arith.constant 0 : index
    %c0_246 = arith.constant 0 : index
    %269 = vector.load %arg14[%c0_245, %c0_246] : memref<8x342xf32, #tpu.memory_space<vmem>>, vector<8x288xf32>
    %cst_247 = arith.constant dense<0.000000e+00> : vector<3x288xf32>
    %270 = tpu.matmul %268, %269, %cst_247 {dimension_numbers = #tpu.dot_dimension_numbers<[1], [0], [0], [1], [0, 0, 1, 1], [], []>} : vector<3x8xf32>, vector<8x288xf32>, vector<3x288xf32> -> vector<3x288xf32>
    %271 = arith.addf %266, %270 : vector<3x288xf32>
    %c1_248 = arith.constant 1 : index
    %c0_249 = arith.constant 0 : index
    %c0_250 = arith.constant 0 : index
    %272 = vector.load %arg8[%c1_248, %c0_249, %c0_250] : memref<9x3x8xf32, #tpu.memory_space<vmem>>, vector<1x3x8xf32>
    %273 = vector.shape_cast %272 : vector<1x3x8xf32> to vector<3x8xf32>
    %c0_251 = arith.constant 0 : index
    %c1_252 = arith.constant 1 : index
    %274 = vector.load %arg14[%c0_251, %c1_252] : memref<8x342xf32, #tpu.memory_space<vmem>>, vector<8x288xf32>
    %cst_253 = arith.constant dense<0.000000e+00> : vector<3x288xf32>
    %275 = tpu.matmul %273, %274, %cst_253 {dimension_numbers = #tpu.dot_dimension_numbers<[1], [0], [0], [1], [0, 0, 1, 1], [], []>} : vector<3x8xf32>, vector<8x288xf32>, vector<3x288xf32> -> vector<3x288xf32>
    %276 = arith.addf %271, %275 : vector<3x288xf32>
    %c2_254 = arith.constant 2 : index
    %c0_255 = arith.constant 0 : index
    %c0_256 = arith.constant 0 : index
    %277 = vector.load %arg8[%c2_254, %c0_255, %c0_256] : memref<9x3x8xf32, #tpu.memory_space<vmem>>, vector<1x3x8xf32>
    %278 = vector.shape_cast %277 : vector<1x3x8xf32> to vector<3x8xf32>
    %c0_257 = arith.constant 0 : index
    %c2_258 = arith.constant 2 : index
    %279 = vector.load %arg14[%c0_257, %c2_258] : memref<8x342xf32, #tpu.memory_space<vmem>>, vector<8x288xf32>
    %cst_259 = arith.constant dense<0.000000e+00> : vector<3x288xf32>
    %280 = tpu.matmul %278, %279, %cst_259 {dimension_numbers = #tpu.dot_dimension_numbers<[1], [0], [0], [1], [0, 0, 1, 1], [], []>} : vector<3x8xf32>, vector<8x288xf32>, vector<3x288xf32> -> vector<3x288xf32>
    %281 = arith.addf %276, %280 : vector<3x288xf32>
    %c3_260 = arith.constant 3 : index
    %c0_261 = arith.constant 0 : index
    %c0_262 = arith.constant 0 : index
    %282 = vector.load %arg8[%c3_260, %c0_261, %c0_262] : memref<9x3x8xf32, #tpu.memory_space<vmem>>, vector<1x3x8xf32>
    %283 = vector.shape_cast %282 : vector<1x3x8xf32> to vector<3x8xf32>
    %c0_263 = arith.constant 0 : index
    %c18_264 = arith.constant 18 : index
    %284 = vector.load %arg14[%c0_263, %c18_264] : memref<8x342xf32, #tpu.memory_space<vmem>>, vector<8x288xf32>
    %cst_265 = arith.constant dense<0.000000e+00> : vector<3x288xf32>
    %285 = tpu.matmul %283, %284, %cst_265 {dimension_numbers = #tpu.dot_dimension_numbers<[1], [0], [0], [1], [0, 0, 1, 1], [], []>} : vector<3x8xf32>, vector<8x288xf32>, vector<3x288xf32> -> vector<3x288xf32>
    %286 = arith.addf %281, %285 : vector<3x288xf32>
    %c4_266 = arith.constant 4 : index
    %c0_267 = arith.constant 0 : index
    %c0_268 = arith.constant 0 : index
    %287 = vector.load %arg8[%c4_266, %c0_267, %c0_268] : memref<9x3x8xf32, #tpu.memory_space<vmem>>, vector<1x3x8xf32>
    %288 = vector.shape_cast %287 : vector<1x3x8xf32> to vector<3x8xf32>
    %c0_269 = arith.constant 0 : index
    %c19 = arith.constant 19 : index
    %289 = vector.load %arg14[%c0_269, %c19] : memref<8x342xf32, #tpu.memory_space<vmem>>, vector<8x288xf32>
    %cst_270 = arith.constant dense<0.000000e+00> : vector<3x288xf32>
    %290 = tpu.matmul %288, %289, %cst_270 {dimension_numbers = #tpu.dot_dimension_numbers<[1], [0], [0], [1], [0, 0, 1, 1], [], []>} : vector<3x8xf32>, vector<8x288xf32>, vector<3x288xf32> -> vector<3x288xf32>
    %291 = arith.addf %286, %290 : vector<3x288xf32>
    %c5_271 = arith.constant 5 : index
    %c0_272 = arith.constant 0 : index
    %c0_273 = arith.constant 0 : index
    %292 = vector.load %arg8[%c5_271, %c0_272, %c0_273] : memref<9x3x8xf32, #tpu.memory_space<vmem>>, vector<1x3x8xf32>
    %293 = vector.shape_cast %292 : vector<1x3x8xf32> to vector<3x8xf32>
    %c0_274 = arith.constant 0 : index
    %c20 = arith.constant 20 : index
    %294 = vector.load %arg14[%c0_274, %c20] : memref<8x342xf32, #tpu.memory_space<vmem>>, vector<8x288xf32>
    %cst_275 = arith.constant dense<0.000000e+00> : vector<3x288xf32>
    %295 = tpu.matmul %293, %294, %cst_275 {dimension_numbers = #tpu.dot_dimension_numbers<[1], [0], [0], [1], [0, 0, 1, 1], [], []>} : vector<3x8xf32>, vector<8x288xf32>, vector<3x288xf32> -> vector<3x288xf32>
    %296 = arith.addf %291, %295 : vector<3x288xf32>
    %c6_276 = arith.constant 6 : index
    %c0_277 = arith.constant 0 : index
    %c0_278 = arith.constant 0 : index
    %297 = vector.load %arg8[%c6_276, %c0_277, %c0_278] : memref<9x3x8xf32, #tpu.memory_space<vmem>>, vector<1x3x8xf32>
    %298 = vector.shape_cast %297 : vector<1x3x8xf32> to vector<3x8xf32>
    %c0_279 = arith.constant 0 : index
    %c36 = arith.constant 36 : index
    %299 = vector.load %arg14[%c0_279, %c36] : memref<8x342xf32, #tpu.memory_space<vmem>>, vector<8x288xf32>
    %cst_280 = arith.constant dense<0.000000e+00> : vector<3x288xf32>
    %300 = tpu.matmul %298, %299, %cst_280 {dimension_numbers = #tpu.dot_dimension_numbers<[1], [0], [0], [1], [0, 0, 1, 1], [], []>} : vector<3x8xf32>, vector<8x288xf32>, vector<3x288xf32> -> vector<3x288xf32>
    %301 = arith.addf %296, %300 : vector<3x288xf32>
    %c7_281 = arith.constant 7 : index
    %c0_282 = arith.constant 0 : index
    %c0_283 = arith.constant 0 : index
    %302 = vector.load %arg8[%c7_281, %c0_282, %c0_283] : memref<9x3x8xf32, #tpu.memory_space<vmem>>, vector<1x3x8xf32>
    %303 = vector.shape_cast %302 : vector<1x3x8xf32> to vector<3x8xf32>
    %c0_284 = arith.constant 0 : index
    %c37 = arith.constant 37 : index
    %304 = vector.load %arg14[%c0_284, %c37] : memref<8x342xf32, #tpu.memory_space<vmem>>, vector<8x288xf32>
    %cst_285 = arith.constant dense<0.000000e+00> : vector<3x288xf32>
    %305 = tpu.matmul %303, %304, %cst_285 {dimension_numbers = #tpu.dot_dimension_numbers<[1], [0], [0], [1], [0, 0, 1, 1], [], []>} : vector<3x8xf32>, vector<8x288xf32>, vector<3x288xf32> -> vector<3x288xf32>
    %306 = arith.addf %301, %305 : vector<3x288xf32>
    %c8_286 = arith.constant 8 : index
    %c0_287 = arith.constant 0 : index
    %c0_288 = arith.constant 0 : index
    %307 = vector.load %arg8[%c8_286, %c0_287, %c0_288] : memref<9x3x8xf32, #tpu.memory_space<vmem>>, vector<1x3x8xf32>
    %308 = vector.shape_cast %307 : vector<1x3x8xf32> to vector<3x8xf32>
    %c0_289 = arith.constant 0 : index
    %c38_290 = arith.constant 38 : index
    %309 = vector.load %arg14[%c0_289, %c38_290] : memref<8x342xf32, #tpu.memory_space<vmem>>, vector<8x288xf32>
    %cst_291 = arith.constant dense<0.000000e+00> : vector<3x288xf32>
    %310 = tpu.matmul %308, %309, %cst_291 {dimension_numbers = #tpu.dot_dimension_numbers<[1], [0], [0], [1], [0, 0, 1, 1], [], []>} : vector<3x8xf32>, vector<8x288xf32>, vector<3x288xf32> -> vector<3x288xf32>
    %311 = arith.addf %306, %310 : vector<3x288xf32>
    %c0_292 = arith.constant 0 : index
    %c0_293 = arith.constant 0 : index
    %312 = vector.load %arg9[%c0_292, %c0_293] : memref<3x1xf32, #tpu.memory_space<vmem>>, vector<3x1xf32>
    %313 = vector.broadcast %312 : vector<3x1xf32> to vector<3x288xf32>
    %314 = arith.addf %311, %313 : vector<3x288xf32>
    %cst_294 = arith.constant 0.000000e+00 : f32
    %315 = vector.broadcast %cst_294 : f32 to vector<3x288xf32>
    %316 = arith.cmpf oge, %314, %315 : vector<3x288xf32>
    %cst_295 = arith.constant 0.00999999977 : f32
    %317 = vector.broadcast %cst_295 : f32 to vector<3x288xf32>
    %318 = arith.mulf %317, %314 : vector<3x288xf32>
    %319 = arith.select %316, %314, %318 : vector<3x288xi1>, vector<3x288xf32>
    %cst_296 = arith.constant 5.000000e-01 : f32
    %320 = vector.broadcast %cst_296 : f32 to vector<3x288xf32>
    %321 = arith.mulf %320, %319 : vector<3x288xf32>
    %322 = math.tanh %321 : vector<3x288xf32>
    %323 = vector.extract_strided_slice %322 {offsets = [0, 0], sizes = [3, 16], strides = [1, 1]} : vector<3x288xf32> to vector<3x16xf32>
    %c0_297 = arith.constant 0 : index
    %c0_298 = arith.constant 0 : index
    %c0_299 = arith.constant 0 : index
    %324 = vector.load %arg10[%c0_297, %c0_298, %c0_299] : memref<1x3x256xf32, #tpu.memory_space<vmem>>, vector<1x3x16xf32>
    %325 = vector.shape_cast %324 : vector<1x3x16xf32> to vector<3x16xf32>
    %326 = vector.shape_cast %323 : vector<3x16xf32> to vector<1x3x16xf32>
    tpu.vector_store %arg10[%c0_297, %c0_298, %c0_299], %326 {strides = array<i32>} : memref<1x3x256xf32, #tpu.memory_space<vmem>>, vector<1x3x16xf32>,
    %327 = vector.extract_strided_slice %322 {offsets = [0, 18], sizes = [3, 16], strides = [1, 1]} : vector<3x288xf32> to vector<3x16xf32>
    %c0_300 = arith.constant 0 : index
    %c0_301 = arith.constant 0 : index
    %c16_302 = arith.constant 16 : index
    %328 = vector.load %arg10[%c0_300, %c0_301, %c16_302] : memref<1x3x256xf32, #tpu.memory_space<vmem>>, vector<1x3x16xf32>
    %329 = vector.shape_cast %328 : vector<1x3x16xf32> to vector<3x16xf32>
    %330 = vector.shape_cast %327 : vector<3x16xf32> to vector<1x3x16xf32>
    tpu.vector_store %arg10[%c0_300, %c0_301, %c16_302], %330 {strides = array<i32>} : memref<1x3x256xf32, #tpu.memory_space<vmem>>, vector<1x3x16xf32>,
    %331 = vector.extract_strided_slice %322 {offsets = [0, 36], sizes = [3, 16], strides = [1, 1]} : vector<3x288xf32> to vector<3x16xf32>
    %c0_303 = arith.constant 0 : index
    %c0_304 = arith.constant 0 : index
    %c32_305 = arith.constant 32 : index
    %332 = vector.load %arg10[%c0_303, %c0_304, %c32_305] : memref<1x3x256xf32, #tpu.memory_space<vmem>>, vector<1x3x16xf32>
    %333 = vector.shape_cast %332 : vector<1x3x16xf32> to vector<3x16xf32>
    %334 = vector.shape_cast %331 : vector<3x16xf32> to vector<1x3x16xf32>
    tpu.vector_store %arg10[%c0_303, %c0_304, %c32_305], %334 {strides = array<i32>} : memref<1x3x256xf32, #tpu.memory_space<vmem>>, vector<1x3x16xf32>,
    %335 = vector.extract_strided_slice %322 {offsets = [0, 54], sizes = [3, 16], strides = [1, 1]} : vector<3x288xf32> to vector<3x16xf32>
    %c0_306 = arith.constant 0 : index
    %c0_307 = arith.constant 0 : index
    %c48_308 = arith.constant 48 : index
    %336 = vector.load %arg10[%c0_306, %c0_307, %c48_308] : memref<1x3x256xf32, #tpu.memory_space<vmem>>, vector<1x3x16xf32>
    %337 = vector.shape_cast %336 : vector<1x3x16xf32> to vector<3x16xf32>
    %338 = vector.shape_cast %335 : vector<3x16xf32> to vector<1x3x16xf32>
    tpu.vector_store %arg10[%c0_306, %c0_307, %c48_308], %338 {strides = array<i32>} : memref<1x3x256xf32, #tpu.memory_space<vmem>>, vector<1x3x16xf32>,
    %339 = vector.extract_strided_slice %322 {offsets = [0, 72], sizes = [3, 16], strides = [1, 1]} : vector<3x288xf32> to vector<3x16xf32>
    %c0_309 = arith.constant 0 : index
    %c0_310 = arith.constant 0 : index
    %c64 = arith.constant 64 : index
    %340 = vector.load %arg10[%c0_309, %c0_310, %c64] : memref<1x3x256xf32, #tpu.memory_space<vmem>>, vector<1x3x16xf32>
    %341 = vector.shape_cast %340 : vector<1x3x16xf32> to vector<3x16xf32>
    %342 = vector.shape_cast %339 : vector<3x16xf32> to vector<1x3x16xf32>
    tpu.vector_store %arg10[%c0_309, %c0_310, %c64], %342 {strides = array<i32>} : memref<1x3x256xf32, #tpu.memory_space<vmem>>, vector<1x3x16xf32>,
    %343 = vector.extract_strided_slice %322 {offsets = [0, 90], sizes = [3, 16], strides = [1, 1]} : vector<3x288xf32> to vector<3x16xf32>
    %c0_311 = arith.constant 0 : index
    %c0_312 = arith.constant 0 : index
    %c80 = arith.constant 80 : index
    %344 = vector.load %arg10[%c0_311, %c0_312, %c80] : memref<1x3x256xf32, #tpu.memory_space<vmem>>, vector<1x3x16xf32>
    %345 = vector.shape_cast %344 : vector<1x3x16xf32> to vector<3x16xf32>
    %346 = vector.shape_cast %343 : vector<3x16xf32> to vector<1x3x16xf32>
    tpu.vector_store %arg10[%c0_311, %c0_312, %c80], %346 {strides = array<i32>} : memref<1x3x256xf32, #tpu.memory_space<vmem>>, vector<1x3x16xf32>,
    %347 = vector.extract_strided_slice %322 {offsets = [0, 108], sizes = [3, 16], strides = [1, 1]} : vector<3x288xf32> to vector<3x16xf32>
    %c0_313 = arith.constant 0 : index
    %c0_314 = arith.constant 0 : index
    %c96 = arith.constant 96 : index
    %348 = vector.load %arg10[%c0_313, %c0_314, %c96] : memref<1x3x256xf32, #tpu.memory_space<vmem>>, vector<1x3x16xf32>
    %349 = vector.shape_cast %348 : vector<1x3x16xf32> to vector<3x16xf32>
    %350 = vector.shape_cast %347 : vector<3x16xf32> to vector<1x3x16xf32>
    tpu.vector_store %arg10[%c0_313, %c0_314, %c96], %350 {strides = array<i32>} : memref<1x3x256xf32, #tpu.memory_space<vmem>>, vector<1x3x16xf32>,
    %351 = vector.extract_strided_slice %322 {offsets = [0, 126], sizes = [3, 16], strides = [1, 1]} : vector<3x288xf32> to vector<3x16xf32>
    %c0_315 = arith.constant 0 : index
    %c0_316 = arith.constant 0 : index
    %c112 = arith.constant 112 : index
    %352 = vector.load %arg10[%c0_315, %c0_316, %c112] : memref<1x3x256xf32, #tpu.memory_space<vmem>>, vector<1x3x16xf32>
    %353 = vector.shape_cast %352 : vector<1x3x16xf32> to vector<3x16xf32>
    %354 = vector.shape_cast %351 : vector<3x16xf32> to vector<1x3x16xf32>
    tpu.vector_store %arg10[%c0_315, %c0_316, %c112], %354 {strides = array<i32>} : memref<1x3x256xf32, #tpu.memory_space<vmem>>, vector<1x3x16xf32>,
    %355 = vector.extract_strided_slice %322 {offsets = [0, 144], sizes = [3, 16], strides = [1, 1]} : vector<3x288xf32> to vector<3x16xf32>
    %c0_317 = arith.constant 0 : index
    %c0_318 = arith.constant 0 : index
    %c128_319 = arith.constant 128 : index
    %356 = vector.load %arg10[%c0_317, %c0_318, %c128_319] : memref<1x3x256xf32, #tpu.memory_space<vmem>>, vector<1x3x16xf32>
    %357 = vector.shape_cast %356 : vector<1x3x16xf32> to vector<3x16xf32>
    %358 = vector.shape_cast %355 : vector<3x16xf32> to vector<1x3x16xf32>
    tpu.vector_store %arg10[%c0_317, %c0_318, %c128_319], %358 {strides = array<i32>} : memref<1x3x256xf32, #tpu.memory_space<vmem>>, vector<1x3x16xf32>,
    %359 = vector.extract_strided_slice %322 {offsets = [0, 162], sizes = [3, 16], strides = [1, 1]} : vector<3x288xf32> to vector<3x16xf32>
    %c0_320 = arith.constant 0 : index
    %c0_321 = arith.constant 0 : index
    %c144 = arith.constant 144 : index
    %360 = vector.load %arg10[%c0_320, %c0_321, %c144] : memref<1x3x256xf32, #tpu.memory_space<vmem>>, vector<1x3x16xf32>
    %361 = vector.shape_cast %360 : vector<1x3x16xf32> to vector<3x16xf32>
    %362 = vector.shape_cast %359 : vector<3x16xf32> to vector<1x3x16xf32>
    tpu.vector_store %arg10[%c0_320, %c0_321, %c144], %362 {strides = array<i32>} : memref<1x3x256xf32, #tpu.memory_space<vmem>>, vector<1x3x16xf32>,
    %363 = vector.extract_strided_slice %322 {offsets = [0, 180], sizes = [3, 16], strides = [1, 1]} : vector<3x288xf32> to vector<3x16xf32>
    %c0_322 = arith.constant 0 : index
    %c0_323 = arith.constant 0 : index
    %c160 = arith.constant 160 : index
    %364 = vector.load %arg10[%c0_322, %c0_323, %c160] : memref<1x3x256xf32, #tpu.memory_space<vmem>>, vector<1x3x16xf32>
    %365 = vector.shape_cast %364 : vector<1x3x16xf32> to vector<3x16xf32>
    %366 = vector.shape_cast %363 : vector<3x16xf32> to vector<1x3x16xf32>
    tpu.vector_store %arg10[%c0_322, %c0_323, %c160], %366 {strides = array<i32>} : memref<1x3x256xf32, #tpu.memory_space<vmem>>, vector<1x3x16xf32>,
    %367 = vector.extract_strided_slice %322 {offsets = [0, 198], sizes = [3, 16], strides = [1, 1]} : vector<3x288xf32> to vector<3x16xf32>
    %c0_324 = arith.constant 0 : index
    %c0_325 = arith.constant 0 : index
    %c176 = arith.constant 176 : index
    %368 = vector.load %arg10[%c0_324, %c0_325, %c176] : memref<1x3x256xf32, #tpu.memory_space<vmem>>, vector<1x3x16xf32>
    %369 = vector.shape_cast %368 : vector<1x3x16xf32> to vector<3x16xf32>
    %370 = vector.shape_cast %367 : vector<3x16xf32> to vector<1x3x16xf32>
    tpu.vector_store %arg10[%c0_324, %c0_325, %c176], %370 {strides = array<i32>} : memref<1x3x256xf32, #tpu.memory_space<vmem>>, vector<1x3x16xf32>,
    %371 = vector.extract_strided_slice %322 {offsets = [0, 216], sizes = [3, 16], strides = [1, 1]} : vector<3x288xf32> to vector<3x16xf32>
    %c0_326 = arith.constant 0 : index
    %c0_327 = arith.constant 0 : index
    %c192 = arith.constant 192 : index
    %372 = vector.load %arg10[%c0_326, %c0_327, %c192] : memref<1x3x256xf32, #tpu.memory_space<vmem>>, vector<1x3x16xf32>
    %373 = vector.shape_cast %372 : vector<1x3x16xf32> to vector<3x16xf32>
    %374 = vector.shape_cast %371 : vector<3x16xf32> to vector<1x3x16xf32>
    tpu.vector_store %arg10[%c0_326, %c0_327, %c192], %374 {strides = array<i32>} : memref<1x3x256xf32, #tpu.memory_space<vmem>>, vector<1x3x16xf32>,
    %375 = vector.extract_strided_slice %322 {offsets = [0, 234], sizes = [3, 16], strides = [1, 1]} : vector<3x288xf32> to vector<3x16xf32>
    %c0_328 = arith.constant 0 : index
    %c0_329 = arith.constant 0 : index
    %c208 = arith.constant 208 : index
    %376 = vector.load %arg10[%c0_328, %c0_329, %c208] : memref<1x3x256xf32, #tpu.memory_space<vmem>>, vector<1x3x16xf32>
    %377 = vector.shape_cast %376 : vector<1x3x16xf32> to vector<3x16xf32>
    %378 = vector.shape_cast %375 : vector<3x16xf32> to vector<1x3x16xf32>
    tpu.vector_store %arg10[%c0_328, %c0_329, %c208], %378 {strides = array<i32>} : memref<1x3x256xf32, #tpu.memory_space<vmem>>, vector<1x3x16xf32>,
    %379 = vector.extract_strided_slice %322 {offsets = [0, 252], sizes = [3, 16], strides = [1, 1]} : vector<3x288xf32> to vector<3x16xf32>
    %c0_330 = arith.constant 0 : index
    %c0_331 = arith.constant 0 : index
    %c224 = arith.constant 224 : index
    %380 = vector.load %arg10[%c0_330, %c0_331, %c224] : memref<1x3x256xf32, #tpu.memory_space<vmem>>, vector<1x3x16xf32>
    %381 = vector.shape_cast %380 : vector<1x3x16xf32> to vector<3x16xf32>
    %382 = vector.shape_cast %379 : vector<3x16xf32> to vector<1x3x16xf32>
    tpu.vector_store %arg10[%c0_330, %c0_331, %c224], %382 {strides = array<i32>} : memref<1x3x256xf32, #tpu.memory_space<vmem>>, vector<1x3x16xf32>,
    %383 = vector.extract_strided_slice %322 {offsets = [0, 270], sizes = [3, 16], strides = [1, 1]} : vector<3x288xf32> to vector<3x16xf32>
    %c0_332 = arith.constant 0 : index
    %c0_333 = arith.constant 0 : index
    %c240 = arith.constant 240 : index
    %384 = vector.load %arg10[%c0_332, %c0_333, %c240] : memref<1x3x256xf32, #tpu.memory_space<vmem>>, vector<1x3x16xf32>
    %385 = vector.shape_cast %384 : vector<1x3x16xf32> to vector<3x16xf32>
    %386 = vector.shape_cast %383 : vector<3x16xf32> to vector<1x3x16xf32>
    tpu.vector_store %arg10[%c0_332, %c0_333, %c240], %386 {strides = array<i32>} : memref<1x3x256xf32, #tpu.memory_space<vmem>>, vector<1x3x16xf32>,
    return
  }
  func.func @transform_0(%arg0: i32) -> (i32, i32, i32) {
    %c0_i32 = arith.constant 0 : i32
    %c0_i32_0 = arith.constant 0 : i32
    %c0_i32_1 = arith.constant 0 : i32
    return %arg0, %c0_i32, %c0_i32_0 : i32, i32, i32
  }
  func.func @transform_1(%arg0: i32) -> (i32, i32, i32) {
    %c0_i32 = arith.constant 0 : i32
    %c0_i32_0 = arith.constant 0 : i32
    %c0_i32_1 = arith.constant 0 : i32
    %c0_i32_2 = arith.constant 0 : i32
    return %c0_i32, %c0_i32_0, %c0_i32_1 : i32, i32, i32
  }
  func.func @transform_2(%arg0: i32) -> (i32, i32) {
    %c0_i32 = arith.constant 0 : i32
    %c0_i32_0 = arith.constant 0 : i32
    %c0_i32_1 = arith.constant 0 : i32
    return %c0_i32, %c0_i32_0 : i32, i32
  }
  func.func @transform_3(%arg0: i32) -> (i32, i32, i32) {
    %c0_i32 = arith.constant 0 : i32
    %c0_i32_0 = arith.constant 0 : i32
    %c0_i32_1 = arith.constant 0 : i32
    %c0_i32_2 = arith.constant 0 : i32
    return %c0_i32, %c0_i32_0, %c0_i32_1 : i32, i32, i32
  }
  func.func @transform_4(%arg0: i32) -> (i32, i32) {
    %c0_i32 = arith.constant 0 : i32
    %c0_i32_0 = arith.constant 0 : i32
    %c0_i32_1 = arith.constant 0 : i32
    return %c0_i32, %c0_i32_0 : i32, i32
  }
  func.func @transform_5(%arg0: i32) -> (i32, i32, i32) {
    %c0_i32 = arith.constant 0 : i32
    %c0_i32_0 = arith.constant 0 : i32
    %c0_i32_1 = arith.constant 0 : i32
    %c0_i32_2 = arith.constant 0 : i32
    return %c0_i32, %c0_i32_0, %c0_i32_1 : i32, i32, i32
  }
  func.func @transform_6(%arg0: i32) -> (i32, i32) {
    %c0_i32 = arith.constant 0 : i32
    %c0_i32_0 = arith.constant 0 : i32
    %c0_i32_1 = arith.constant 0 : i32
    return %c0_i32, %c0_i32_0 : i32, i32
  }
  func.func @transform_7(%arg0: i32) -> (i32, i32, i32) {
    %c0_i32 = arith.constant 0 : i32
    %c0_i32_0 = arith.constant 0 : i32
    %c0_i32_1 = arith.constant 0 : i32
    %c0_i32_2 = arith.constant 0 : i32
    return %c0_i32, %c0_i32_0, %c0_i32_1 : i32, i32, i32
  }
  func.func @transform_8(%arg0: i32) -> (i32, i32) {
    %c0_i32 = arith.constant 0 : i32
    %c0_i32_0 = arith.constant 0 : i32
    %c0_i32_1 = arith.constant 0 : i32
    return %c0_i32, %c0_i32_0 : i32, i32
  }
  func.func @transform_9(%arg0: i32) -> (i32, i32, i32) {
    %c0_i32 = arith.constant 0 : i32
    %c0_i32_0 = arith.constant 0 : i32
    %c0_i32_1 = arith.constant 0 : i32
    return %arg0, %c0_i32, %c0_i32_0 : i32, i32, i32
  }
}

</mosaic_0001>

<bundles_post_ra>
// kernel: decoder_forward.1
= control target key start
LH: loop header
LB: loop body
LE: loop exit
PB: predicated region body
PF: predicated region fallthrough
CT: control target
= control target key end

     0   :  { %s6732_s30 = smov 0   ;;  %s8307_s0 = inlined_call_operand.vmem [shape: f32[2,64,64], index: 0, kind: input, shape index: {}]   ;;  %s8308_s1 = inlined_call_operand.vmem [shape: f32[9,32,64], index: 1, kind: input, shape index: {}]   ;;  %s8309_s2 = inlined_call_operand.vmem [shape: f32[32,1], index: 2, kind: input, shape index: {}]   ;;  %s8310_s3 = inlined_call_operand.vmem [shape: f32[9,16,32], index: 3, kind: input, shape index: {}]   ;;  %s8311_s4 = inlined_call_operand.vmem [shape: f32[16,1], index: 4, kind: input, shape index: {}]   ;;  %s8312_s5 = inlined_call_operand.vmem [shape: f32[9,8,16], index: 5, kind: input, shape index: {}]   ;;  %s8313_s6 = inlined_call_operand.vmem [shape: f32[8,1], index: 6, kind: input, shape index: {}]   ;;  %s8314_s7 = inlined_call_operand.vmem [shape: f32[9,3,8], index: 7, kind: input, shape index: {}]   ;;  %s8315_s8 = inlined_call_operand.vmem [shape: f32[3,1], index: 8, kind: input, shape index: {}]   ;;  %s8316_s9 = inlined_call_operand.vmem [shape: f32[2,3,256], index: 9, kind: output, shape index: {}]  }
   0x1 LB: > { %s6029_s10 = sadd.s32 4294967295, %s6630_s30   ;;  %p6033_p0 = scmp.ge.s32.totalorder %s6630_s30, 1  ;;  %s6630_s30 = sphi %s6732_s30, %s19_s30  }
   0x2   : > { %p287_p1 = scmp.lt.s32.totalorder %s6630_s30, 3 }
   0x4   : > { %p288_p2 = pnand %p6033_p0, %p287_p1 }
   0x5   : > { %p6740_p3 = scmp.lt.s32.totalorder (!%p288_p2), %s6029_s10, 1  ;;  %s6633_s16 = smov (!%p288_p2), 26  }
   0x6   : > { %291 = sbr.rel (%p288_p2) target bundleno = 2610 (0xa32), region = 56  ;;  %s6634_s17 = smov (!%p288_p2), 30  }
   0x7   : > { %s6635_s18 = smov (!%p288_p2), 34   ;;  %s6636_s19 = smov (!%p288_p2), 38  }
   0x8   : > { %s6637_s20 = smov (!%p288_p2), 42   ;;  %s6638_s21 = smov (!%p288_p2), 46  }
   0x9   : > { %s6639_s22 = smov (!%p288_p2), 50   ;;  %s6640_s23 = smov (!%p288_p2), 54  }
   0xa   : > { %s6641_s24 = smov (!%p288_p2), 127   ;;  %s6642_s27 = smov (!%p288_p2), 126  }
   0xb   : > { %v6632_v0 = vmov 0.0   ;;  %s8333_s10 = smov (!%p6740_p3, %s6029_s10), 1  ;;  %vm390_vm0 = vcmask 277712   ;;  %vm439_vm1 = vcmask 376112   ;;  %vm488_vm2 = vcmask 474512   ;;  %s8317_s13 = smov 116  }
   0xc   : > { %348 = vst [vmem:[#allocation2 + $0x70] sm:$0xff] %v6632_v0  ;;  %333 = vst [vmem:[#allocation2] sm:$0xff] %v6632_v0  ;;  %s6185_s12 = sshll.u32 %s8333_s10, 6  ;;  %vm537_vm3 = vcmask 572912   ;;  %vm334_vm4 = vcmask 228352   ;;  %vm586_vm5 = vcmask 671312  }
   0xd   : > { %336 = vst [vmem:[#allocation2 + $0x10] sm:$0xff] %v6632_v0  ;;  %338 = vst [vmem:[#allocation2 + $0x20] sm:$0xff] %v6632_v0  ;;  %s6770_s15 = scalar_lea.vmem %s8307_s0, %s6185_s12  ;;  %vm635_vm6 = vcmask 769712   ;;  %vm684_vm7 = vcmask 868112   ;;  %vm733_vm8 = vcmask 966512   ;;  %vm791_vm9 = vcmask 523264  }
   0xe   : > { %340 = vst [vmem:[#allocation2 + $0x30] sm:$0xff] %v6632_v0  ;;  %342 = vst [vmem:[#allocation2 + $0x40] sm:$0xff] %v6632_v0  ;;  %v357_v1 = vld [vmem:[%s6770_s15 + $0x38] sm:$0xff]  ;;  %v356_v2 = vld [vmem:[%s6770_s15 + $0x30] sm:$0xff]  ;;  %s6644_s14 = smov 115   ;;  %s8319_s11 = smov 114  }
   0xf   : > { %344 = vst [vmem:[#allocation2 + $0x50] sm:$0xff] %v6632_v0  ;;  %346 = vst [vmem:[#allocation2 + $0x60] sm:$0xff] %v6632_v0  ;;  %380 = vrot.lane.b32.xlu0 %v357_v1, %s6633_s16  ;;  %378 = vrot.lane.b32.xlu1 %v356_v2, %s6633_s16  ;;  %v355_v3 = vld [vmem:[%s6770_s15 + $0x28] sm:$0xff]  ;;  %v354_v4 = vld [vmem:[%s6770_s15 + $0x20] sm:$0xff]  ;;  %s8320_s12 = smov 104   ;;  %vm1185_vm10 = vcmask 949248  }
  0x10   : > { %2118 = vst [vmem:[#allocation3] sm:$0xff] %v6632_v0  ;;  %2121 = vst [vmem:[#allocation3 + $0x10] sm:$0xff] %v6632_v0  ;;  %v353_v5 = vld [vmem:[%s6770_s15 + $0x18] sm:$0xff]  ;;  %v352_v6 = vld [vmem:[%s6770_s15 + $0x10] sm:$0xff]  ;;  %vm1340_vm11 = vcmask 941056   ;;  %s8318_s25 = smov 102  }
  0x11   : > { %2123 = vst [vmem:[#allocation3 + $0x20] sm:$0xff] %v6632_v0  ;;  %2125 = vst [vmem:[#allocation3 + $0x30] sm:$0xff] %v6632_v0  ;;  %v351_v7 = vld [vmem:[%s6770_s15 + $0x8] sm:$0xff]  ;;  %v350_v8 = vld [vmem:[%s6770_s15] sm:$0xff]  ;;  %vm1495_vm12 = vcmask 932864   ;;  %vm1650_vm13 = vcmask 850944  }
  0x12   : > { %3378 = vst [vmem:[#allocation4] sm:$0xff] %v6632_v0  ;;  %3379 = vst [vmem:[#allocation4 + $0x8] sm:$0xff] %v6632_v0  ;;  %vm1805_vm14 = vcmask 842752   ;;  %vm1960_vm15 = vcmask 834560   ;;  %s6651_s28 = smov 32   ;;  %s6652_s29 = smov 40  }
  0x13   : > { %3382 = vst [vmem:[#allocation4 + $0x18] sm:$0xff] %v6632_v0  ;;  %3383 = vst [vmem:[#allocation4 + $0x20] sm:$0xff] %v6632_v0  ;;  %429 = vrot.lane.b32.xlu0 %v357_v1, %s6634_s17  ;;  %478 = vrot.lane.b32.xlu1 %v357_v1, %s6635_s18  ;;  %s6654_s15 = smov 48   ;;  %s8323_s26 = smov 112  }
  0x14   : > { %4360 = vst [vmem:[#allocation5] sm:$0xff] %v6632_v0  ;;  %4361 = vst [vmem:[#allocation5 + $0x8] sm:$0xff] %v6632_v0 }
  0x15   : > { %349 = vst.msk [vmem:[#allocation2 + $0x78] sm:$0xff] %vm334_vm4, %v6632_v0  ;;  %335 = vst.msk [vmem:[#allocation2 + $0x8] sm:$0xff] %vm334_vm4, %v6632_v0 }
  0x16   : > { %337 = vst.msk [vmem:[#allocation2 + $0x18] sm:$0xff] %vm334_vm4, %v6632_v0  ;;  %339 = vst.msk [vmem:[#allocation2 + $0x28] sm:$0xff] %vm334_vm4, %v6632_v0 }
  0x17   : > { %427 = vrot.lane.b32.xlu0 %v356_v2, %s6634_s17  ;;  %527 = vrot.lane.b32.xlu1 %v357_v1, %s6636_s19  ;;  %341 = vst.msk [vmem:[#allocation2 + $0x38] sm:$0xff] %vm334_vm4, %v6632_v0  ;;  %343 = vst.msk [vmem:[#allocation2 + $0x48] sm:$0xff] %vm334_vm4, %v6632_v0 }
  0x18   : > { %345 = vst.msk [vmem:[#allocation2 + $0x58] sm:$0xff] %vm334_vm4, %v6632_v0  ;;  %347 = vst.msk [vmem:[#allocation2 + $0x68] sm:$0xff] %vm334_vm4, %v6632_v0 }
  0x1b   : > { %476 = vrot.lane.b32.xlu1 %v356_v2, %s6635_s18  ;;  %376 = vrot.lane.b32.xlu0 %v355_v3, %s6633_s16 }
  0x1f   : > { %425 = vrot.lane.b32.xlu1 %v355_v3, %s6634_s17  ;;  %576 = vrot.lane.b32.xlu0 %v357_v1, %s6637_s20 }
  0x23   : > { %625 = vrot.lane.b32.xlu1 %v357_v1, %s6638_s21  ;;  %525 = vrot.lane.b32.xlu0 %v356_v2, %s6636_s19 }
  0x27   : > { %474 = vrot.lane.b32.xlu1 %v355_v3, %s6635_s18  ;;  %374 = vrot.lane.b32.xlu0 %v354_v4, %s6633_s16 }
  0x2b   : > { %674 = vrot.lane.b32.xlu1 %v357_v1, %s6639_s22  ;;  %574 = vrot.lane.b32.xlu0 %v356_v2, %s6637_s20 }
  0x2f   : > { %523 = vrot.lane.b32.xlu1 %v355_v3, %s6636_s19  ;;  %423 = vrot.lane.b32.xlu0 %v354_v4, %s6634_s17 }
  0x33   : > { %723 = vrot.lane.b32.xlu1 %v357_v1, %s6640_s23  ;;  %623 = vrot.lane.b32.xlu0 %v356_v2, %s6638_s21 }
  0x37   : > { %472 = vrot.lane.b32.xlu1 %v354_v4, %s6635_s18  ;;  %372 = vrot.lane.b32.xlu0 %v353_v5, %s6633_s16 }
  0x3b   : > { %672 = vrot.lane.b32.xlu1 %v356_v2, %s6639_s22  ;;  %572 = vrot.lane.b32.xlu0 %v355_v3, %s6637_s20 }
  0x3f   : > { %521 = vrot.lane.b32.xlu1 %v354_v4, %s6636_s19  ;;  %421 = vrot.lane.b32.xlu0 %v353_v5, %s6634_s17 }
  0x43   : > { %721 = vrot.lane.b32.xlu1 %v356_v2, %s6640_s23  ;;  %621 = vrot.lane.b32.xlu0 %v355_v3, %s6638_s21 }
  0x47   : > { %470 = vrot.lane.b32.xlu1 %v353_v5, %s6635_s18  ;;  %370 = vrot.lane.b32.xlu0 %v352_v6, %s6633_s16 }
  0x4b   : > { %670 = vrot.lane.b32.xlu1 %v355_v3, %s6639_s22  ;;  %570 = vrot.lane.b32.xlu0 %v354_v4, %s6637_s20 }
  0x4f   : > { %519 = vrot.lane.b32.xlu1 %v353_v5, %s6636_s19  ;;  %419 = vrot.lane.b32.xlu0 %v352_v6, %s6634_s17 }
  0x53   : > { %719 = vrot.lane.b32.xlu1 %v355_v3, %s6640_s23  ;;  %619 = vrot.lane.b32.xlu0 %v354_v4, %s6638_s21 }
  0x57   : > { %468 = vrot.lane.b32.xlu1 %v352_v6, %s6635_s18  ;;  %368 = vrot.lane.b32.xlu0 %v351_v7, %s6633_s16 }
  0x5b   : > { %668 = vrot.lane.b32.xlu1 %v354_v4, %s6639_s22  ;;  %568 = vrot.lane.b32.xlu0 %v353_v5, %s6637_s20 }
  0x5f   : > { %517 = vrot.lane.b32.xlu1 %v352_v6, %s6636_s19  ;;  %417 = vrot.lane.b32.xlu0 %v351_v7, %s6634_s17 }
  0x63   : > { %717 = vrot.lane.b32.xlu1 %v354_v4, %s6640_s23  ;;  %617 = vrot.lane.b32.xlu0 %v353_v5, %s6638_s21 }
  0x67   : > { %466 = vrot.lane.b32.xlu1 %v351_v7, %s6635_s18  ;;  %366 = vrot.lane.b32.xlu0 %v350_v8, %s6633_s16  ;;  %s6647_s16 = smov 103  }
  0x6b   : > { %666 = vrot.lane.b32.xlu1 %v353_v5, %s6639_s22  ;;  %566 = vrot.lane.b32.xlu0 %v352_v6, %s6637_s20 }
  0x6f   : > { %515 = vrot.lane.b32.xlu1 %v351_v7, %s6636_s19  ;;  %415 = vrot.lane.b32.xlu0 %v350_v8, %s6634_s17 }
  0x73   : > { %715 = vrot.lane.b32.xlu1 %v353_v5, %s6640_s23  ;;  %615 = vrot.lane.b32.xlu0 %v352_v6, %s6638_s21 }
  0x77   : > { %564 = vrot.lane.b32.xlu1 %v351_v7, %s6637_s20  ;;  %464 = vrot.lane.b32.xlu0 %v350_v8, %s6635_s18 }
  0x7b   : > { %513 = vrot.lane.b32.xlu1 %v350_v8, %s6636_s19  ;;  %664 = vrot.lane.b32.xlu0 %v352_v6, %s6639_s22 }
  0x7f   : > { %713 = vrot.lane.b32.xlu1 %v352_v6, %s6640_s23  ;;  %613 = vrot.lane.b32.xlu0 %v351_v7, %s6638_s21 }
  0x81   : > { %v381_v9 = vpop.permute.xlu0 %380  ;;  %v379_v10 = vpop.permute.xlu1 %378 }
  0x82   : > { %398 = vst.msk [vmem:[#allocation2 + $0x70] sm:$0xff] %vm390_vm0, %v381_v9  ;;  %397 = vst.msk [vmem:[#allocation2 + $0x60] sm:$0xff] %vm390_vm0, %v379_v10 }
  0x83   : > { %662 = vrot.lane.b32.xlu1 %v351_v7, %s6639_s22  ;;  %562 = vrot.lane.b32.xlu0 %v350_v8, %s6637_s20 }
  0x85   : > { %v430_v11 = vpop.permute.xlu0 %429  ;;  %v479_v12 = vpop.permute.xlu1 %478 }
  0x86   : > { %447 = vst.msk [vmem:[#allocation2 + $0x70] sm:$0xff] %vm439_vm1, %v430_v11 }
  0x87   : > { %496 = vst.msk [vmem:[#allocation2 + $0x70] sm:$0xff] %vm488_vm2, %v479_v12  ;;  %711 = vrot.lane.b32.xlu1 %v351_v7, %s6640_s23  ;;  %611 = vrot.lane.b32.xlu0 %v350_v8, %s6638_s21 }
  0x89   : > { %v428_v13 = vpop.permute.xlu0 %427  ;;  %v528_v14 = vpop.permute.xlu1 %527 }
  0x8a   : > { %446 = vst.msk [vmem:[#allocation2 + $0x60] sm:$0xff] %vm439_vm1, %v428_v13  ;;  %v6038_v13 = vld [vmem:[%s8308_s1 + $0x20] sm:$0xff] }
  0x8b   : > { %545 = vst.msk [vmem:[#allocation2 + $0x70] sm:$0xff] %vm537_vm3, %v528_v14  ;;  %660 = vrot.lane.b32.xlu0 %v350_v8, %s6639_s22  ;;  %709 = vrot.lane.b32.xlu1 %v350_v8, %s6640_s23 }
  0x8c   : > { %6329 = vmatprep.mubr.msk.f32.mxu0 %vm791_vm9, %v6038_v13 }
  0x8d   : > { %v477_v15 = vpop.permute.xlu1 %476  ;;  %v377_v16 = vpop.permute.xlu0 %376 }
  0x8e   : > { %495 = vst.msk [vmem:[#allocation2 + $0x60] sm:$0xff] %vm488_vm2, %v477_v15 }
  0x8f   : > { %396 = vst.msk [vmem:[#allocation2 + $0x50] sm:$0xff] %vm390_vm0, %v377_v16 }
  0x91   : > { %v426_v17 = vpop.permute.xlu1 %425  ;;  %v577_v18 = vpop.permute.xlu0 %576 }
  0x92   : > { %445 = vst.msk [vmem:[#allocation2 + $0x50] sm:$0xff] %vm439_vm1, %v426_v17 }
  0x93   : > { %594 = vst.msk [vmem:[#allocation2 + $0x70] sm:$0xff] %vm586_vm5, %v577_v18  ;;  %v742_v18 = vld [vmem:[%s8308_s1] sm:$0xff] }
  0x94   : > { %6351 = vmatprep.mubr.msk.f32.mxu1 %vm791_vm9, %v742_v18 }
  0x95   : > { %v626_v19 = vpop.permute.xlu1 %625  ;;  %v526_v20 = vpop.permute.xlu0 %525 }
  0x96   : > { %643 = vst.msk [vmem:[#allocation2 + $0x70] sm:$0xff] %vm635_vm6, %v626_v19  ;;  %v743_v19 = vld [vmem:[%s8308_s1 + $0x8] sm:$0xff] }
  0x97   : > { %544 = vst.msk [vmem:[#allocation2 + $0x60] sm:$0xff] %vm537_vm3, %v526_v20  ;;  %v6990_v20 = vld [vmem:[#allocation2 + $0x78] sm:$0xff] }
  0x99   : > { %v475_v21 = vpop.permute.xlu1 %474  ;;  %v375_v22 = vpop.permute.xlu0 %374 }
  0x9a   : > { %494 = vst.msk [vmem:[#allocation2 + $0x50] sm:$0xff] %vm488_vm2, %v475_v21  ;;  %v7000_v21 = vld [vmem:[#allocation2 + $0x68] sm:$0xff] }
  0x9b   : > { %395 = vst.msk [vmem:[#allocation2 + $0x40] sm:$0xff] %vm390_vm0, %v375_v22 }
  0x9d   : > { %v675_v23 = vpop.permute.xlu1 %674  ;;  %v575_v24 = vpop.permute.xlu0 %574 }
  0x9e   : > { %692 = vst.msk [vmem:[#allocation2 + $0x70] sm:$0xff] %vm684_vm7, %v675_v23  ;;  %v7010_v23 = vld [vmem:[#allocation2 + $0x58] sm:$0xff] }
  0x9f   : > { %593 = vst.msk [vmem:[#allocation2 + $0x60] sm:$0xff] %vm586_vm5, %v575_v24  ;;  %v7020_v24 = vld [vmem:[#allocation2 + $0x48] sm:$0xff] }
  0xa1   : > { %v524_v25 = vpop.permute.xlu1 %523  ;;  %v424_v26 = vpop.permute.xlu0 %423 }
  0xa2   : > { %543 = vst.msk [vmem:[#allocation2 + $0x50] sm:$0xff] %vm537_vm3, %v524_v25 }
  0xa3   : > { %444 = vst.msk [vmem:[#allocation2 + $0x40] sm:$0xff] %vm439_vm1, %v424_v26  ;;  %v7030_v26 = vld [vmem:[#allocation2 + $0x38] sm:$0xff] }
  0xa5   : > { %v724_v27 = vpop.permute.xlu1 %723  ;;  %v624_v28 = vpop.permute.xlu0 %623 }
  0xa6   : > { %741 = vst.msk [vmem:[#allocation2 + $0x70] sm:$0xff] %vm733_vm8, %v724_v27  ;;  %v7040_v27 = vld [vmem:[#allocation2 + $0x28] sm:$0xff] }
  0xa7   : > { %642 = vst.msk [vmem:[#allocation2 + $0x60] sm:$0xff] %vm635_vm6, %v624_v28 }
  0xa9   : > { %v473_v29 = vpop.permute.xlu1 %472  ;;  %v373_v30 = vpop.permute.xlu0 %372 }
  0xaa   : > { %493 = vst.msk [vmem:[#allocation2 + $0x40] sm:$0xff] %vm488_vm2, %v473_v29  ;;  %v7050_v29 = vld [vmem:[#allocation2 + $0x18] sm:$0xff] }
  0xab   : > { %394 = vst.msk [vmem:[#allocation2 + $0x30] sm:$0xff] %vm390_vm0, %v373_v30  ;;  %v744_v30 = vld [vmem:[%s8308_s1 + $0x10] sm:$0xff] }
  0xad   : > { %v673_v31 = vpop.permute.xlu1 %672  ;;  %v573_v32 = vpop.permute.xlu0 %572  ;;  %v6874_v33 = vld [vmem:[#allocation2 + $0x70] sm:$0xff] }
  0xae   : > { %691 = vst.msk [vmem:[#allocation2 + $0x60] sm:$0xff] %vm684_vm7, %v673_v31  ;;  %6335 = vmatprep.subr.mxu1 %v6874_v33  ;;  %781 = vrot.lane.b32.xlu0 %v6874_v33, %s6641_s24  ;;  %v745_v31 = vld [vmem:[%s8308_s1 + $0x18] sm:$0xff] }
  0xaf   : > { %592 = vst.msk [vmem:[#allocation2 + $0x50] sm:$0xff] %vm586_vm5, %v573_v32  ;;  %6336 = vmatpush3.msra.mxu1 %v6874_v33  ;;  %v7067_v32 = vld [vmem:[#allocation2 + $0x8] sm:$0xff] }
  0xb1   : > { %v522_v34 = vpop.permute.xlu1 %521  ;;  %v422_v35 = vpop.permute.xlu0 %421 }
  0xb2   : > { %542 = vst.msk [vmem:[#allocation2 + $0x40] sm:$0xff] %vm537_vm3, %v522_v34  ;;  %v6058_v34 = vld [vmem:[%s8308_s1 + $0x60] sm:$0xff] }
  0xb3   : > { %443 = vst.msk [vmem:[#allocation2 + $0x30] sm:$0xff] %vm439_vm1, %v422_v35 }
  0xb5   : > { %v722_v36 = vpop.permute.xlu1 %721  ;;  %v622_v37 = vpop.permute.xlu0 %621 }
  0xb6   : > { %740 = vst.msk [vmem:[#allocation2 + $0x60] sm:$0xff] %vm733_vm8, %v722_v36 }
  0xb7   : > { %641 = vst.msk [vmem:[#allocation2 + $0x50] sm:$0xff] %vm635_vm6, %v622_v37 }
  0xb9   : > { %v471_v38 = vpop.permute.xlu1 %470  ;;  %v371_v39 = vpop.permute.xlu0 %370 }
  0xba   : > { %492 = vst.msk [vmem:[#allocation2 + $0x30] sm:$0xff] %vm488_vm2, %v471_v38 }
  0xbb   : > { %393 = vst.msk [vmem:[#allocation2 + $0x20] sm:$0xff] %vm390_vm0, %v371_v39 }
  0xbd   : > { %v671_v40 = vpop.permute.xlu1 %670  ;;  %v571_v41 = vpop.permute.xlu0 %570  ;;  %v6888_v42 = vld [vmem:[#allocation2 + $0x60] sm:$0xff] }
  0xbe   : > { %690 = vst.msk [vmem:[#allocation2 + $0x50] sm:$0xff] %vm684_vm7, %v671_v40  ;;  %779 = vrot.lane.b32.xlu1 %v6888_v42, %s6641_s24  ;;  %6337 = vmatprep.subr.mxu1 %v6888_v42 }
  0xbf   : > { %591 = vst.msk [vmem:[#allocation2 + $0x40] sm:$0xff] %vm586_vm5, %v571_v41  ;;  %6338 = vmatpush3.msra.mxu1 %v6888_v42  ;;  %v6039_v41 = vld [vmem:[%s8308_s1 + $0x28] sm:$0xff] }
  0xc1   : > { %v520_v43 = vpop.permute.xlu1 %519  ;;  %v420_v44 = vpop.permute.xlu0 %419 }
  0xc2   : > { %541 = vst.msk [vmem:[#allocation2 + $0x30] sm:$0xff] %vm537_vm3, %v520_v43  ;;  %v6040_v43 = vld [vmem:[%s8308_s1 + $0x30] sm:$0xff] }
  0xc3   : > { %442 = vst.msk [vmem:[#allocation2 + $0x20] sm:$0xff] %vm439_vm1, %v420_v44 }
  0xc5   : > { %v720_v45 = vpop.permute.xlu1 %719  ;;  %v620_v46 = vpop.permute.xlu0 %619 }
  0xc6   : > { %739 = vst.msk [vmem:[#allocation2 + $0x50] sm:$0xff] %vm733_vm8, %v720_v45 }
  0xc7   : > { %640 = vst.msk [vmem:[#allocation2 + $0x40] sm:$0xff] %vm635_vm6, %v620_v46  ;;  %v6041_v46 = vld [vmem:[%s8308_s1 + $0x38] sm:$0xff] }
  0xc9   : > { %v469_v47 = vpop.permute.xlu1 %468  ;;  %v369_v48 = vpop.permute.xlu0 %368 }
  0xca   : > { %491 = vst.msk [vmem:[#allocation2 + $0x20] sm:$0xff] %vm488_vm2, %v469_v47  ;;  %v6050_v47 = vld [vmem:[%s8308_s1 + $0x40] sm:$0xff] }
  0xcb   : > { %392 = vst.msk [vmem:[#allocation2 + $0x10] sm:$0xff] %vm390_vm0, %v369_v48 }
  0xcd   : > { %v669_v49 = vpop.permute.xlu1 %668  ;;  %v569_v50 = vpop.permute.xlu0 %568  ;;  %v6902_v51 = vld [vmem:[#allocation2 + $0x50] sm:$0xff] }
  0xce   : > { %689 = vst.msk [vmem:[#allocation2 + $0x40] sm:$0xff] %vm684_vm7, %v669_v49  ;;  %6339 = vmatprep.subr.mxu1 %v6902_v51  ;;  %777 = vrot.lane.b32.xlu0 %v6902_v51, %s6641_s24 }
  0xcf   : > { %590 = vst.msk [vmem:[#allocation2 + $0x30] sm:$0xff] %vm586_vm5, %v569_v50  ;;  %6340 = vmatpush3.msra.mxu1 %v6902_v51 }
  0xd1   : > { %v518_v52 = vpop.permute.xlu1 %517  ;;  %v418_v53 = vpop.permute.xlu0 %417 }
  0xd2   : > { %540 = vst.msk [vmem:[#allocation2 + $0x20] sm:$0xff] %vm537_vm3, %v518_v52 }
  0xd3   : > { %441 = vst.msk [vmem:[#allocation2 + $0x10] sm:$0xff] %vm439_vm1, %v418_v53 }
  0xd5   : > { %v718_v54 = vpop.permute.xlu1 %717  ;;  %v618_v55 = vpop.permute.xlu0 %617 }
  0xd6   : > { %738 = vst.msk [vmem:[#allocation2 + $0x40] sm:$0xff] %vm733_vm8, %v718_v54 }
  0xd7   : > { %639 = vst.msk [vmem:[#allocation2 + $0x30] sm:$0xff] %vm635_vm6, %v618_v55 }
  0xd9   : > { %v467_v56 = vpop.permute.xlu1 %466  ;;  %v367_v57 = vpop.permute.xlu0 %366 }
  0xda   : > { %490 = vst.msk [vmem:[#allocation2 + $0x10] sm:$0xff] %vm488_vm2, %v467_v56 }
  0xdb   : > { %391 = vst.msk [vmem:[#allocation2] sm:$0xff] %vm390_vm0, %v367_v57 }
  0xdd   : > { %v667_v58 = vpop.permute.xlu1 %666  ;;  %v567_v59 = vpop.permute.xlu0 %566  ;;  %v6916_v60 = vld [vmem:[#allocation2 + $0x40] sm:$0xff] }
  0xde   : > { %688 = vst.msk [vmem:[#allocation2 + $0x30] sm:$0xff] %vm684_vm7, %v667_v58  ;;  %775 = vrot.lane.b32.xlu1 %v6916_v60, %s6641_s24  ;;  %6341 = vmatprep.subr.mxu1 %v6916_v60  ;;  %v6051_v58 = vld [vmem:[%s8308_s1 + $0x48] sm:$0xff] }
  0xdf   : > { %589 = vst.msk [vmem:[#allocation2 + $0x20] sm:$0xff] %vm586_vm5, %v567_v59  ;;  %6342 = vmatpush3.msra.mxu1 %v6916_v60  ;;  %v6052_v59 = vld [vmem:[%s8308_s1 + $0x50] sm:$0xff] }
  0xe1   : > { %v516_v61 = vpop.permute.xlu1 %515  ;;  %v416_v62 = vpop.permute.xlu0 %415 }
  0xe2   : > { %539 = vst.msk [vmem:[#allocation2 + $0x10] sm:$0xff] %vm537_vm3, %v516_v61 }
  0xe3   : > { %440 = vst.msk [vmem:[#allocation2] sm:$0xff] %vm439_vm1, %v416_v62  ;;  %vm2119_vm1 = vcmask 670720  }
  0xe5   : > { %v716_v63 = vpop.permute.xlu1 %715  ;;  %v616_v0 = vpop.permute.xlu0 %615 }
  0xe6   : > { %737 = vst.msk [vmem:[#allocation2 + $0x30] sm:$0xff] %vm733_vm8, %v716_v63  ;;  %v6053_v63 = vld [vmem:[%s8308_s1 + $0x58] sm:$0xff] }
  0xe7   : > { %638 = vst.msk [vmem:[#allocation2 + $0x20] sm:$0xff] %vm635_vm6, %v616_v0 }
  0xe9   : > { %v565_v1 = vpop.permute.xlu1 %564  ;;  %v465_v2 = vpop.permute.xlu0 %464 }
  0xea   : > { %588 = vst.msk [vmem:[#allocation2 + $0x10] sm:$0xff] %vm586_vm5, %v565_v1  ;;  %v6066_v1 = vld [vmem:[%s8308_s1 + $0x80] sm:$0xff] }
  0xeb   : > { %489 = vst.msk [vmem:[#allocation2] sm:$0xff] %vm488_vm2, %v465_v2 }
  0xed   : > { %v514_v3 = vpop.permute.xlu1 %513  ;;  %v665_v4 = vpop.permute.xlu0 %664  ;;  %v6930_v5 = vld [vmem:[#allocation2 + $0x30] sm:$0xff] }
  0xee   : > { %538 = vst.msk [vmem:[#allocation2] sm:$0xff] %vm537_vm3, %v514_v3  ;;  %6343 = vmatprep.subr.mxu1 %v6930_v5  ;;  %773 = vrot.lane.b32.xlu0 %v6930_v5, %s6641_s24 }
  0xef   : > { %687 = vst.msk [vmem:[#allocation2 + $0x20] sm:$0xff] %vm684_vm7, %v665_v4  ;;  %6344 = vmatpush3.msra.mxu1 %v6930_v5 }
  0xf1   : > { %v714_v6 = vpop.permute.xlu1 %713  ;;  %v614_v7 = vpop.permute.xlu0 %613 }
  0xf2   : > { %736 = vst.msk [vmem:[#allocation2 + $0x20] sm:$0xff] %vm733_vm8, %v714_v6 }
  0xf3   : > { %637 = vst.msk [vmem:[#allocation2 + $0x10] sm:$0xff] %vm635_vm6, %v614_v7 }
  0xf5   : > { %v663_v8 = vpop.permute.xlu1 %662  ;;  %v563_v9 = vpop.permute.xlu0 %562 }
  0xf6   : > { %686 = vst.msk [vmem:[#allocation2 + $0x10] sm:$0xff] %vm684_vm7, %v663_v8 }
  0xf7   : > { %587 = vst.msk [vmem:[#allocation2] sm:$0xff] %vm586_vm5, %v563_v9  ;;  %vm2143_vm5 = vcmask 326896  }
  0xf9   : > { %v712_v10 = vpop.permute.xlu1 %711  ;;  %v612_v11 = vpop.permute.xlu0 %611  ;;  %v6942_v12 = vld [vmem:[#allocation2 + $0x20] sm:$0xff] }
  0xfa   : > { %735 = vst.msk [vmem:[#allocation2 + $0x10] sm:$0xff] %vm733_vm8, %v712_v10  ;;  %771 = vrot.lane.b32.xlu1 %v6942_v12, %s6641_s24  ;;  %6345 = vmatprep.subr.mxu1 %v6942_v12 }
  0xfb   : > { %636 = vst.msk [vmem:[#allocation2] sm:$0xff] %vm635_vm6, %v612_v11  ;;  %6346 = vmatpush3.msra.mxu1 %v6942_v12  ;;  %vm2160_vm6 = vcmask 441696  }
  0xfd   : > { %v661_v14 = vpop.permute.xlu0 %660  ;;  %v710_v15 = vpop.permute.xlu1 %709 }
  0xfe   : > { %685 = vst.msk [vmem:[#allocation2] sm:$0xff] %vm684_vm7, %v661_v14  ;;  %vm2177_vm7 = vcmask 556496  }
  0xff   : > { %734 = vst.msk [vmem:[#allocation2] sm:$0xff] %vm733_vm8, %v710_v15  ;;  %vm2194_vm8 = vcmask 671296  }
 0x101   : > { %v6956_v16 = vld [vmem:[#allocation2 + $0x10] sm:$0xff] }
 0x102   : > { %769 = vrot.lane.b32.xlu0 %v6956_v16, %s6641_s24  ;;  %6347 = vmatprep.subr.mxu1 %v6956_v16 }
 0x103   : > { %6348 = vmatpush3.msra.mxu1 %v6956_v16 }
 0x106   : > { %1005 = vrot.lane.b32.xlu0 %v6874_v33, %s6642_s27  ;;  %v6964_v17 = vld [vmem:[#allocation2] sm:$0xff] }
 0x107   : > { %767 = vrot.lane.b32.xlu1 %v6964_v17, %s6641_s24  ;;  %6349 = vmatprep.subr.mxu1 %v6964_v17 }
 0x108   : > { %6350 = vmatpush3.msra.mxu1 %v6964_v17 }
 0x109   : > { %6352 = vmatmul.mubr.msk.f32.vlgmr.msra.gmra.mxu1 %vm791_vm9, %v743_v19 }
 0x10a   : > { %1001 = vrot.lane.b32.xlu0 %v6902_v51, %s6642_s27  ;;  %6354 = vmatprep.mubr.msk.f32.mxu1 %vm791_vm9, %v744_v30 }
 0x10b   : > { %1003 = vrot.lane.b32.xlu1 %v6888_v42, %s6642_s27 }
 0x10d   : > { %6355 = vmatmul.mubr.msk.f32.gmra.mxu1 %vm791_vm9, %v745_v31 }
 0x10e   : > { %997 = vrot.lane.b32.xlu0 %v6930_v5, %s6642_s27  ;;  %6395 = vmatprep.mubr.msk.f32.mxu1 %vm791_vm9, %v6058_v34 }
 0x10f   : > { %999 = vrot.lane.b32.xlu1 %v6916_v60, %s6642_s27 }
 0x112   : > { %993 = vrot.lane.b32.xlu0 %v6956_v16, %s6642_s27 }
 0x113   : > { %995 = vrot.lane.b32.xlu1 %v6942_v12, %s6642_s27 }
 0x116   : > { %1183 = vrot.lane.b32.xlu0 %v6990_v20, %s8317_s13 }
 0x117   : > { %1181 = vrot.lane.b32.xlu1 %v6874_v33, %s8317_s13 }
 0x11a   : > { %1177 = vrot.lane.b32.xlu0 %v6888_v42, %s8317_s13 }
 0x11b   : > { %991 = vrot.lane.b32.xlu1 %v6964_v17, %s6642_s27 }
 0x11e   : > { %1336 = vrot.lane.b32.xlu0 %v6874_v33, %s6644_s14 }
 0x11f   : > { %1179 = vrot.lane.b32.xlu1 %v7000_v21, %s8317_s13 }
 0x120   : > { %v782_v22 = vpop.permute.xlu0 %781 }
 0x121   : > { %6313 = vmatprep.subr.mxu0 %v782_v22 }
 0x122   : > { %1173 = vrot.lane.b32.xlu0 %v6902_v51, %s8317_s13  ;;  %6314 = vmatpush3.msra.mxu0 %v782_v22 }
 0x123   : > { %1338 = vrot.lane.b32.xlu1 %v6990_v20, %s6644_s14 }
 0x126   : > { %1332 = vrot.lane.b32.xlu0 %v6888_v42, %s6644_s14 }
 0x127   : > { %1175 = vrot.lane.b32.xlu1 %v7010_v23, %s8317_s13 }
 0x12a   : > { %1169 = vrot.lane.b32.xlu0 %v6916_v60, %s8317_s13 }
 0x12b   : > { %1334 = vrot.lane.b32.xlu1 %v7000_v21, %s6644_s14 }
 0x12e   : > { %1328 = vrot.lane.b32.xlu0 %v6902_v51, %s6644_s14 }
 0x12f   : > { %1171 = vrot.lane.b32.xlu1 %v7020_v24, %s8317_s13 }
 0x130   : > { %v780_v25 = vpop.permute.xlu1 %779 }
 0x131   : > { %6315 = vmatprep.subr.mxu0 %v780_v25 }
 0x132   : > { %1165 = vrot.lane.b32.xlu0 %v6930_v5, %s8317_s13  ;;  %6316 = vmatpush3.msra.mxu0 %v780_v25 }
 0x133   : > { %1330 = vrot.lane.b32.xlu1 %v7010_v23, %s6644_s14 }
 0x136   : > { %1324 = vrot.lane.b32.xlu0 %v6916_v60, %s6644_s14 }
 0x137   : > { %1167 = vrot.lane.b32.xlu1 %v7030_v26, %s8317_s13 }
 0x13a   : > { %1161 = vrot.lane.b32.xlu0 %v6942_v12, %s8317_s13 }
 0x13b   : > { %1326 = vrot.lane.b32.xlu1 %v7020_v24, %s6644_s14 }
 0x13e   : > { %1320 = vrot.lane.b32.xlu0 %v6930_v5, %s6644_s14 }
 0x13f   : > { %1163 = vrot.lane.b32.xlu1 %v7040_v27, %s8317_s13 }
 0x140   : > { %v778_v28 = vpop.permute.xlu0 %777 }
 0x141   : > { %6317 = vmatprep.subr.mxu0 %v778_v28 }
 0x142   : > { %1157 = vrot.lane.b32.xlu0 %v6956_v16, %s8317_s13  ;;  %6318 = vmatpush3.msra.mxu0 %v778_v28 }
 0x143   : > { %1322 = vrot.lane.b32.xlu1 %v7030_v26, %s6644_s14 }
 0x146   : > { %1316 = vrot.lane.b32.xlu0 %v6942_v12, %s6644_s14 }
 0x147   : > { %1159 = vrot.lane.b32.xlu1 %v7050_v29, %s8317_s13 }
 0x14a   : > { %1153 = vrot.lane.b32.xlu0 %v6964_v17, %s8317_s13 }
 0x14b   : > { %1318 = vrot.lane.b32.xlu1 %v7040_v27, %s6644_s14 }
 0x14e   : > { %1312 = vrot.lane.b32.xlu0 %v6956_v16, %s6644_s14 }
 0x14f   : > { %1155 = vrot.lane.b32.xlu1 %v7067_v32, %s8317_s13  ;;  %s6658_s13 = smov 99  }
 0x150   : > { %v776_v35 = vpop.permute.xlu1 %775 }
 0x151   : > { %6319 = vmatprep.subr.mxu0 %v776_v35 }
 0x152   : > { %1308 = vrot.lane.b32.xlu0 %v6964_v17, %s6644_s14  ;;  %6320 = vmatpush3.msra.mxu0 %v776_v35 }
 0x153   : > { %1314 = vrot.lane.b32.xlu1 %v7050_v29, %s6644_s14 }
 0x156   : > { %1491 = vrot.lane.b32.xlu0 %v6874_v33, %s8319_s11 }
 0x157   : > { %1310 = vrot.lane.b32.xlu1 %v7067_v32, %s6644_s14  ;;  %s6653_s14 = smov 44  }
 0x15a   : > { %1487 = vrot.lane.b32.xlu0 %v6888_v42, %s8319_s11 }
 0x15b   : > { %1493 = vrot.lane.b32.xlu1 %v6990_v20, %s8319_s11 }
 0x15e   : > { %1646 = vrot.lane.b32.xlu0 %v6874_v33, %s8320_s12 }
 0x15f   : > { %1489 = vrot.lane.b32.xlu1 %v7000_v21, %s8319_s11 }
 0x160   : > { %v774_v36 = vpop.permute.xlu0 %773 }
 0x161   : > { %6321 = vmatprep.subr.mxu0 %v774_v36 }
 0x162   : > { %1483 = vrot.lane.b32.xlu0 %v6902_v51, %s8319_s11  ;;  %6322 = vmatpush3.msra.mxu0 %v774_v36 }
 0x163   : > { %1648 = vrot.lane.b32.xlu1 %v6990_v20, %s8320_s12 }
 0x166   : > { %1642 = vrot.lane.b32.xlu0 %v6888_v42, %s8320_s12 }
 0x167   : > { %1485 = vrot.lane.b32.xlu1 %v7010_v23, %s8319_s11 }
 0x16a   : > { %1479 = vrot.lane.b32.xlu0 %v6916_v60, %s8319_s11 }
 0x16b   : > { %1644 = vrot.lane.b32.xlu1 %v7000_v21, %s8320_s12 }
 0x16c   : > { %v772_v37 = vpop.permute.xlu1 %771 }
 0x16d   : > { %6323 = vmatprep.subr.mxu0 %v772_v37 }
 0x16e   : > { %1638 = vrot.lane.b32.xlu0 %v6902_v51, %s8320_s12  ;;  %6324 = vmatpush3.msra.mxu0 %v772_v37 }
 0x16f   : > { %1481 = vrot.lane.b32.xlu1 %v7020_v24, %s8319_s11 }
 0x172   : > { %1475 = vrot.lane.b32.xlu0 %v6930_v5, %s8319_s11 }
 0x173   : > { %1640 = vrot.lane.b32.xlu1 %v7010_v23, %s8320_s12 }
 0x174   : > { %v770_v38 = vpop.permute.xlu0 %769 }
 0x175   : > { %6325 = vmatprep.subr.mxu0 %v770_v38 }
 0x176   : > { %1634 = vrot.lane.b32.xlu0 %v6916_v60, %s8320_s12  ;;  %6326 = vmatpush3.msra.mxu0 %v770_v38 }
 0x177   : > { %1477 = vrot.lane.b32.xlu1 %v7030_v26, %s8319_s11 }
 0x178   : > { %v1006_v39 = vpop.permute.xlu0 %1005 }
 0x179   : > { %v768_v40 = vpop.permute.xlu1 %767 }
 0x17a   : > { %1471 = vrot.lane.b32.xlu0 %v6942_v12, %s8319_s11  ;;  %6327 = vmatprep.subr.mxu0 %v768_v40 }
 0x17b   : > { %1636 = vrot.lane.b32.xlu1 %v7020_v24, %s8320_s12  ;;  %6328 = vmatpush3.msra.mxu0 %v768_v40 }
 0x17c   : > { %6357 = vmatprep.subr.mxu0 %v1006_v39  ;;  %v1002_v44 = vpop.permute.xlu0 %1001  ;;  %6330 = vmatmul.mubr.msk.f32.vlgmr.msra.gmra.mxu0 %vm791_vm9, %v6039_v41 }
 0x17d   : > { %v1004_v45 = vpop.permute.xlu1 %1003  ;;  %6358 = vmatpush3.msra.mxu0 %v1006_v39  ;;  %6332 = vmatprep.mubr.msk.f32.mxu0 %vm791_vm9, %v6040_v43 }
 0x17e   : > { %1630 = vrot.lane.b32.xlu0 %v6930_v5, %s8320_s12  ;;  %6359 = vmatprep.subr.mxu0 %v1004_v45 }
 0x17f   : > { %1473 = vrot.lane.b32.xlu1 %v7040_v27, %s8319_s11  ;;  %6360 = vmatpush3.msra.mxu0 %v1004_v45 }
 0x180   : > { %6361 = vmatprep.subr.mxu0 %v1002_v44  ;;  %v998_v48 = vpop.permute.xlu0 %997  ;;  %6333 = vmatmul.mubr.msk.f32.gmra.mxu0 %vm791_vm9, %v6041_v46 }
 0x181   : > { %v1000_v49 = vpop.permute.xlu1 %999  ;;  %6362 = vmatpush3.msra.mxu0 %v1002_v44  ;;  %6373 = vmatprep.mubr.msk.f32.mxu0 %vm791_vm9, %v6050_v47  ;;  %v6059_v44 = vld [vmem:[%s8308_s1 + $0x68] sm:$0xff] }
 0x182   : > { %1467 = vrot.lane.b32.xlu0 %v6956_v16, %s8319_s11  ;;  %6363 = vmatprep.subr.mxu0 %v1000_v49 }
 0x183   : > { %1632 = vrot.lane.b32.xlu1 %v7030_v26, %s8320_s12  ;;  %6364 = vmatpush3.msra.mxu0 %v1000_v49 }
 0x184   : > { %6365 = vmatprep.subr.mxu0 %v998_v48  ;;  %v994_v50 = vpop.permute.xlu0 %993 }
 0x185   : > { %v996_v52 = vpop.permute.xlu1 %995  ;;  %6366 = vmatpush3.msra.mxu0 %v998_v48  ;;  %v6074_v48 = vld [vmem:[%s8308_s1 + $0xa0] sm:$0xff] }
 0x186   : > { %1626 = vrot.lane.b32.xlu0 %v6942_v12, %s8320_s12  ;;  %6367 = vmatprep.subr.mxu0 %v996_v52 }
 0x187   : > { %1469 = vrot.lane.b32.xlu1 %v7050_v29, %s8319_s11  ;;  %6368 = vmatpush3.msra.mxu0 %v996_v52  ;;  %v6067_v52 = vld [vmem:[%s8308_s1 + $0x88] sm:$0xff] }
 0x188   : > { %6369 = vmatprep.subr.mxu0 %v994_v50  ;;  %v1184_v53 = vpop.permute.xlu0 %1183 }
 0x189   : > { %v1182_v54 = vpop.permute.xlu1 %1181  ;;  %6370 = vmatpush3.msra.mxu0 %v994_v50 }
 0x18a   : > { %1463 = vrot.lane.b32.xlu0 %v6964_v17, %s8319_s11  ;;  %v1193_v55 = vsel %vm1185_vm10, %v1182_v54, %v1184_v53  ;;  %v6068_v53 = vld [vmem:[%s8308_s1 + $0x90] sm:$0xff] }
 0x18b   : > { %1628 = vrot.lane.b32.xlu1 %v7040_v27, %s8320_s12  ;;  %6379 = vmatprep.subr.mxu1 %v1193_v55 }
 0x18c   : > { %6380 = vmatpush3.msra.mxu1 %v1193_v55  ;;  %v1178_v56 = vpop.permute.xlu0 %1177 }
 0x18d   : > { %v992_v57 = vpop.permute.xlu1 %991 }
 0x18e   : > { %1622 = vrot.lane.b32.xlu0 %v6956_v16, %s8320_s12  ;;  %6371 = vmatprep.subr.mxu0 %v992_v57 }
 0x18f   : > { %1465 = vrot.lane.b32.xlu1 %v7067_v32, %s8319_s11  ;;  %6372 = vmatpush3.msra.mxu0 %v992_v57  ;;  %v6082_v57 = vld [vmem:[%s8308_s1 + $0xc0] sm:$0xff] }
 0x190   : > { %v1337_v61 = vpop.permute.xlu0 %1336  ;;  %6374 = vmatmul.mubr.msk.f32.vlgmr.msra.gmra.mxu0 %vm791_vm9, %v6051_v58 }
 0x191   : > { %v1180_v62 = vpop.permute.xlu1 %1179  ;;  %6376 = vmatprep.mubr.msk.f32.mxu0 %vm791_vm9, %v6052_v59 }
 0x192   : > { %1618 = vrot.lane.b32.xlu0 %v6964_v17, %s8320_s12  ;;  %v1192_v0 = vsel %vm1185_vm10, %v1178_v56, %v1180_v62 }
 0x193   : > { %1624 = vrot.lane.b32.xlu1 %v7050_v29, %s8320_s12  ;;  %6381 = vmatprep.subr.mxu1 %v1192_v0 }
 0x194   : > { %6382 = vmatpush3.msra.mxu1 %v1192_v0  ;;  %v1174_v2 = vpop.permute.xlu0 %1173  ;;  %6377 = vmatmul.mubr.msk.f32.gmra.mxu0 %vm791_vm9, %v6053_v63  ;;  %v6649_v63 = vmov 0  }
 0x195   : > { %v1339_v3 = vpop.permute.xlu1 %1338  ;;  %6417 = vmatprep.mubr.msk.f32.mxu0 %vm791_vm9, %v6066_v1  ;;  %6615 = vset.pattern.permute.xlu1 %v6649_v63 }
 0x196   : > { %1801 = vrot.lane.b32.xlu0 %v6874_v33, %s6647_s16  ;;  %v1348_v4 = vsel %vm1340_vm11, %v1337_v61, %v1339_v3  ;;  %v2081_v61 = vld [vmem:[%s8309_s2 + $0x18] sm:$0xff] }
 0x197   : > { %1620 = vrot.lane.b32.xlu1 %v7067_v32, %s8320_s12  ;;  %6401 = vmatprep.subr.mxu0 %v1348_v4 }
 0x198   : > { %6402 = vmatpush3.msra.mxu0 %v1348_v4  ;;  %v1333_v6 = vpop.permute.xlu0 %1332  ;;  %6614 = vset.pattern.permute.xlu0 %v6649_v63 }
 0x199   : > { %v1176_v7 = vpop.permute.xlu1 %1175 }
 0x19a   : > { %1797 = vrot.lane.b32.xlu0 %v6888_v42, %s6647_s16  ;;  %v1191_v8 = vsel %vm1185_vm10, %v1174_v2, %v1176_v7  ;;  %v2080_v2 = vld [vmem:[%s8309_s2 + $0x10] sm:$0xff] }
 0x19b   : > { %1803 = vrot.lane.b32.xlu1 %v6990_v20, %s6647_s16  ;;  %6383 = vmatprep.subr.mxu1 %v1191_v8 }
 0x19c   : > { %6384 = vmatpush3.msra.mxu1 %v1191_v8  ;;  %v1170_v9 = vpop.permute.xlu0 %1169 }
 0x19d   : > { %v1335_v10 = vpop.permute.xlu1 %1334 }
 0x19e   : > { %1956 = vrot.lane.b32.xlu0 %v6874_v33, %s8318_s25  ;;  %v1347_v11 = vsel %vm1340_vm11, %v1333_v6, %v1335_v10 }
 0x19f   : > { %1799 = vrot.lane.b32.xlu1 %v7000_v21, %s6647_s16  ;;  %6403 = vmatprep.subr.mxu0 %v1347_v11 }
 0x1a0   : > { %6404 = vmatpush3.msra.mxu0 %v1347_v11  ;;  %v1329_v13 = vpop.permute.xlu0 %1328 }
 0x1a1   : > { %v1172_v14 = vpop.permute.xlu1 %1171 }
 0x1a2   : > { %1793 = vrot.lane.b32.xlu0 %v6902_v51, %s6647_s16  ;;  %v1190_v15 = vsel %vm1185_vm10, %v1170_v9, %v1172_v14 }
 0x1a3   : > { %1958 = vrot.lane.b32.xlu1 %v6990_v20, %s8318_s25  ;;  %6385 = vmatprep.subr.mxu1 %v1190_v15 }
 0x1a4   : > { %6386 = vmatpush3.msra.mxu1 %v1190_v15  ;;  %v1166_v33 = vpop.permute.xlu0 %1165 }
 0x1a5   : > { %v1331_v18 = vpop.permute.xlu1 %1330 }
 0x1a6   : > { %1952 = vrot.lane.b32.xlu0 %v6888_v42, %s8318_s25  ;;  %v1346_v19 = vsel %vm1340_vm11, %v1329_v13, %v1331_v18 }
 0x1a7   : > { %1795 = vrot.lane.b32.xlu1 %v7010_v23, %s6647_s16  ;;  %6405 = vmatprep.subr.mxu0 %v1346_v19 }
 0x1a8   : > { %6406 = vmatpush3.msra.mxu0 %v1346_v19  ;;  %v1325_v22 = vpop.permute.xlu0 %1324 }
 0x1a9   : > { %v1168_v25 = vpop.permute.xlu1 %1167 }
 0x1aa   : > { %1789 = vrot.lane.b32.xlu0 %v6916_v60, %s6647_s16  ;;  %v1189_v20 = vsel %vm1185_vm10, %v1166_v33, %v1168_v25 }
 0x1ab   : > { %1954 = vrot.lane.b32.xlu1 %v7000_v21, %s8318_s25  ;;  %6387 = vmatprep.subr.mxu1 %v1189_v20 }
 0x1ac   : > { %6388 = vmatpush3.msra.mxu1 %v1189_v20  ;;  %v1162_v42 = vpop.permute.xlu0 %1161 }
 0x1ad   : > { %v1327_v28 = vpop.permute.xlu1 %1326 }
 0x1ae   : > { %1948 = vrot.lane.b32.xlu0 %v6902_v51, %s8318_s25  ;;  %v1345_v30 = vsel %vm1340_vm11, %v1325_v22, %v1327_v28 }
 0x1af   : > { %1791 = vrot.lane.b32.xlu1 %v7020_v24, %s6647_s16  ;;  %6407 = vmatprep.subr.mxu0 %v1345_v30 }
 0x1b0   : > { %6408 = vmatpush3.msra.mxu0 %v1345_v30  ;;  %v1321_v31 = vpop.permute.xlu0 %1320 }
 0x1b1   : > { %v1164_v34 = vpop.permute.xlu1 %1163 }
 0x1b2   : > { %1785 = vrot.lane.b32.xlu0 %v6930_v5, %s6647_s16  ;;  %v1188_v21 = vsel %vm1185_vm10, %v1162_v42, %v1164_v34 }
 0x1b3   : > { %1950 = vrot.lane.b32.xlu1 %v7010_v23, %s8318_s25  ;;  %6389 = vmatprep.subr.mxu1 %v1188_v21 }
 0x1b4   : > { %6390 = vmatpush3.msra.mxu1 %v1188_v21  ;;  %v1158_v51 = vpop.permute.xlu0 %1157 }
 0x1b5   : > { %v1323_v35 = vpop.permute.xlu1 %1322 }
 0x1b6   : > { %1944 = vrot.lane.b32.xlu0 %v6916_v60, %s8318_s25  ;;  %v1344_v36 = vsel %vm1340_vm11, %v1321_v31, %v1323_v35 }
 0x1b7   : > { %1787 = vrot.lane.b32.xlu1 %v7030_v26, %s6647_s16  ;;  %6409 = vmatprep.subr.mxu0 %v1344_v36 }
 0x1b8   : > { %6410 = vmatpush3.msra.mxu0 %v1344_v36  ;;  %v1317_v37 = vpop.permute.xlu0 %1316 }
 0x1b9   : > { %v1160_v38 = vpop.permute.xlu1 %1159 }
 0x1ba   : > { %1781 = vrot.lane.b32.xlu0 %v6942_v12, %s6647_s16  ;;  %v1187_v23 = vsel %vm1185_vm10, %v1158_v51, %v1160_v38 }
 0x1bb   : > { %1946 = vrot.lane.b32.xlu1 %v7020_v24, %s8318_s25  ;;  %6391 = vmatprep.subr.mxu1 %v1187_v23 }
 0x1bc   : > { %6392 = vmatpush3.msra.mxu1 %v1187_v23  ;;  %v1154_v60 = vpop.permute.xlu0 %1153 }
 0x1bd   : > { %v1319_v39 = vpop.permute.xlu1 %1318 }
 0x1be   : > { %1940 = vrot.lane.b32.xlu0 %v6930_v5, %s8318_s25  ;;  %v1343_v40 = vsel %vm1340_vm11, %v1317_v37, %v1319_v39  ;;  %v6060_v5 = vld [vmem:[%s8308_s1 + $0x70] sm:$0xff] }
 0x1bf   : > { %1783 = vrot.lane.b32.xlu1 %v7040_v27, %s6647_s16  ;;  %6411 = vmatprep.subr.mxu0 %v1343_v40 }
 0x1c0   : > { %6412 = vmatpush3.msra.mxu0 %v1343_v40  ;;  %v1313_v41 = vpop.permute.xlu0 %1312 }
 0x1c1   : > { %v1156_v43 = vpop.permute.xlu1 %1155 }
 0x1c2   : > { %1777 = vrot.lane.b32.xlu0 %v6956_v16, %s6647_s16  ;;  %v1186_v24 = vsel %vm1185_vm10, %v1154_v60, %v1156_v43  ;;  %v6076_v43 = vld [vmem:[%s8308_s1 + $0xb0] sm:$0xff]  ;;  %vm2228_vm10 = vcmask 900896  }
 0x1c3   : > { %1942 = vrot.lane.b32.xlu1 %v7030_v26, %s8318_s25  ;;  %6393 = vmatprep.subr.mxu1 %v1186_v24  ;;  %v6061_v26 = vld [vmem:[%s8308_s1 + $0x78] sm:$0xff] }
 0x1c4   : > { %6394 = vmatpush3.msra.mxu1 %v1186_v24  ;;  %v1309_v45 = vpop.permute.xlu0 %1308 }
 0x1c5   : > { %v1315_v46 = vpop.permute.xlu1 %1314  ;;  %6396 = vmatmul.mubr.msk.f32.vlgmr.msra.gmra.mxu1 %vm791_vm9, %v6059_v44 }
 0x1c6   : > { %1936 = vrot.lane.b32.xlu0 %v6942_v12, %s8318_s25  ;;  %v1342_v47 = vsel %vm1340_vm11, %v1313_v41, %v1315_v46  ;;  %6398 = vmatprep.mubr.msk.f32.mxu1 %vm791_vm9, %v6060_v5  ;;  %v6075_v41 = vld [vmem:[%s8308_s1 + $0xa8] sm:$0xff]  ;;  %v6090_v46 = vld [vmem:[%s8308_s1 + $0xe0] sm:$0xff] }
 0x1c7   : > { %1779 = vrot.lane.b32.xlu1 %v7050_v29, %s6647_s16  ;;  %6413 = vmatprep.subr.mxu0 %v1342_v47 }
 0x1c8   : > { %6414 = vmatpush3.msra.mxu0 %v1342_v47  ;;  %v1492_v49 = vpop.permute.xlu0 %1491 }
 0x1c9   : > { %v1311_v50 = vpop.permute.xlu1 %1310  ;;  %6399 = vmatmul.mubr.msk.f32.gmra.mxu1 %vm791_vm9, %v6061_v26 }
 0x1ca   : > { %1773 = vrot.lane.b32.xlu0 %v6964_v17, %s6647_s16  ;;  %v1341_v12 = vsel %vm1340_vm11, %v1309_v45, %v1311_v50  ;;  %6439 = vmatprep.mubr.msk.f32.mxu1 %vm791_vm9, %v6074_v48  ;;  %v6077_v45 = vld [vmem:[%s8308_s1 + $0xb8] sm:$0xff]  ;;  %v6084_v50 = vld [vmem:[%s8308_s1 + $0xd0] sm:$0xff]  ;;  %vm2262_vm11 = vcmask 80896  }
 0x1cb   : > { %1938 = vrot.lane.b32.xlu1 %v7040_v27, %s8318_s25  ;;  %6415 = vmatprep.subr.mxu0 %v1341_v12  ;;  %v6069_v27 = vld [vmem:[%s8308_s1 + $0x98] sm:$0xff] }
 0x1cc   : > { %6416 = vmatpush3.msra.mxu0 %v1341_v12  ;;  %v1488_v54 = vpop.permute.xlu0 %1487 }
 0x1cd   : > { %v1494_v55 = vpop.permute.xlu1 %1493  ;;  %6418 = vmatmul.mubr.msk.f32.vlgmr.msra.gmra.mxu0 %vm791_vm9, %v6067_v52 }
 0x1ce   : > { %1932 = vrot.lane.b32.xlu0 %v6956_v16, %s8318_s25  ;;  %v1503_v56 = vsel %vm1495_vm12, %v1492_v49, %v1494_v55  ;;  %6420 = vmatprep.mubr.msk.f32.mxu0 %vm791_vm9, %v6068_v53  ;;  %v6083_v49 = vld [vmem:[%s8308_s1 + $0xc8] sm:$0xff]  ;;  %v6098_v55 = vld [vmem:[%s8308_s1 + $0x100] sm:$0xff] }
 0x1cf   : > { %1775 = vrot.lane.b32.xlu1 %v7067_v32, %s6647_s16  ;;  %6423 = vmatprep.subr.mxu1 %v1503_v56  ;;  %s6650_s16 = smov 36  }
 0x1d0   : > { %6424 = vmatpush3.msra.mxu1 %v1503_v56  ;;  %v1647_v58 = vpop.permute.xlu0 %1646 }
 0x1d1   : > { %v1490_v59 = vpop.permute.xlu1 %1489  ;;  %6421 = vmatmul.mubr.msk.f32.gmra.mxu0 %vm791_vm9, %v6069_v27 }
 0x1d2   : > { %1928 = vrot.lane.b32.xlu0 %v6964_v17, %s8318_s25  ;;  %v1502_v16 = vsel %vm1495_vm12, %v1488_v54, %v1490_v59  ;;  %6461 = vmatprep.mubr.msk.f32.mxu0 %vm791_vm9, %v6082_v57  ;;  %v6085_v54 = vld [vmem:[%s8308_s1 + $0xd8] sm:$0xff] }
 0x1d3   : > { %1934 = vrot.lane.b32.xlu1 %v7050_v29, %s8318_s25  ;;  %6425 = vmatprep.subr.mxu1 %v1502_v16  ;;  %v2078_v29 = vld [vmem:[%s8309_s2] sm:$0xff] }
 0x1d4   : > { %6426 = vmatpush3.msra.mxu1 %v1502_v16  ;;  %v1484_v62 = vpop.permute.xlu0 %1483 }
 0x1d5   : > { %v1649_v0 = vpop.permute.xlu1 %1648 }
 0x1d6   : > { %v1658_v17 = vsel %vm1650_vm13, %v1647_v58, %v1649_v0  ;;  %2099 = vperm.xlu0 %6614, %v2081_v61  }
 0x1d7   : > { %1930 = vrot.lane.b32.xlu1 %v7067_v32, %s8318_s25  ;;  %6445 = vmatprep.subr.mxu0 %v1658_v17  ;;  %v2079_v32 = vld [vmem:[%s8309_s2 + $0x8] sm:$0xff]  ;;  %s8321_s25 = smov 98  }
 0x1d8   : > { %6446 = vmatpush3.msra.mxu0 %v1658_v17  ;;  %v1643_v1 = vpop.permute.xlu0 %1642 }
 0x1d9   : > { %v1486_v3 = vpop.permute.xlu1 %1485 }
 0x1da   : > { %v1501_v4 = vsel %vm1495_vm12, %v1484_v62, %v1486_v3  ;;  %2084 = vperm.xlu0 %6614, %v2078_v29  }
 0x1db   : > { %6427 = vmatprep.subr.mxu1 %v1501_v4  ;;  %2094 = vperm.xlu1 %6615, %v2080_v2  }
 0x1dc   : > { %6428 = vmatpush3.msra.mxu1 %v1501_v4  ;;  %v1480_v6 = vpop.permute.xlu0 %1479 }
 0x1dd   : > { %v1645_v7 = vpop.permute.xlu1 %1644 }
 0x1de   : > { %v1657_v8 = vsel %vm1650_vm13, %v1643_v1, %v1645_v7 }
 0x1df   : > { %6447 = vmatprep.subr.mxu0 %v1657_v8  ;;  %2089 = vperm.xlu1 %6615, %v2079_v32  }
 0x1e0   : > { %6448 = vmatpush3.msra.mxu0 %v1657_v8  ;;  %v1639_v9 = vpop.permute.xlu0 %1638 }
 0x1e1   : > { %v1482_v10 = vpop.permute.xlu1 %1481 }
 0x1e2   : > { %v1500_v11 = vsel %vm1495_vm12, %v1480_v6, %v1482_v10 }
 0x1e3   : > { %6429 = vmatprep.subr.mxu1 %v1500_v11 }
 0x1e4   : > { %6430 = vmatpush3.msra.mxu1 %v1500_v11  ;;  %v1476_v13 = vpop.permute.xlu0 %1475 }
 0x1e5   : > { %v1641_v14 = vpop.permute.xlu1 %1640 }
 0x1e6   : > { %v1656_v15 = vsel %vm1650_vm13, %v1639_v9, %v1641_v14 }
 0x1e7   : > { %6449 = vmatprep.subr.mxu0 %v1656_v15 }
 0x1e8   : > { %6450 = vmatpush3.msra.mxu0 %v1656_v15  ;;  %v1635_v33 = vpop.permute.xlu0 %1634 }
 0x1e9   : > { %v1478_v18 = vpop.permute.xlu1 %1477 }
 0x1ea   : > { %v1499_v19 = vsel %vm1495_vm12, %v1476_v13, %v1478_v18 }
 0x1eb   : > { %6431 = vmatprep.subr.mxu1 %v1499_v19 }
 0x1ec   : > { %6432 = vmatpush3.msra.mxu1 %v1499_v19  ;;  %v1472_v22 = vpop.permute.xlu0 %1471 }
 0x1ed   : > { %v1637_v25 = vpop.permute.xlu1 %1636 }
 0x1ee   : > { %v1655_v20 = vsel %vm1650_vm13, %v1635_v33, %v1637_v25 }
 0x1ef   : > { %6451 = vmatprep.subr.mxu0 %v1655_v20 }
 0x1f0   : > { %6452 = vmatpush3.msra.mxu0 %v1655_v20  ;;  %v1631_v42 = vpop.permute.xlu0 %1630 }
 0x1f1   : > { %v1474_v28 = vpop.permute.xlu1 %1473 }
 0x1f2   : > { %v1498_v30 = vsel %vm1495_vm12, %v1472_v22, %v1474_v28 }
 0x1f3   : > { %6433 = vmatprep.subr.mxu1 %v1498_v30 }
 0x1f4   : > { %6434 = vmatpush3.msra.mxu1 %v1498_v30  ;;  %v1468_v31 = vpop.permute.xlu0 %1467 }
 0x1f5   : > { %v1633_v34 = vpop.permute.xlu1 %1632 }
 0x1f6   : > { %v1654_v21 = vsel %vm1650_vm13, %v1631_v42, %v1633_v34 }
 0x1f7   : > { %6453 = vmatprep.subr.mxu0 %v1654_v21 }
 0x1f8   : > { %6454 = vmatpush3.msra.mxu0 %v1654_v21  ;;  %v1627_v51 = vpop.permute.xlu0 %1626 }
 0x1f9   : > { %v1470_v35 = vpop.permute.xlu1 %1469 }
 0x1fa   : > { %v1497_v36 = vsel %vm1495_vm12, %v1468_v31, %v1470_v35 }
 0x1fb   : > { %6435 = vmatprep.subr.mxu1 %v1497_v36 }
 0x1fc   : > { %6436 = vmatpush3.msra.mxu1 %v1497_v36  ;;  %v1464_v37 = vpop.permute.xlu0 %1463  ;;  %v6092_v36 = vld [vmem:[%s8308_s1 + $0xf0] sm:$0xff] }
 0x1fd   : > { %v1629_v38 = vpop.permute.xlu1 %1628 }
 0x1fe   : > { %v1653_v23 = vsel %vm1650_vm13, %v1627_v51, %v1629_v38  ;;  %v6091_v51 = vld [vmem:[%s8308_s1 + $0xe8] sm:$0xff] }
 0x1ff   : > { %6455 = vmatprep.subr.mxu0 %v1653_v23 }
 0x200   : > { %6456 = vmatpush3.msra.mxu0 %v1653_v23  ;;  %v1623_v60 = vpop.permute.xlu0 %1622  ;;  %v6093_v23 = vld [vmem:[%s8308_s1 + $0xf8] sm:$0xff] }
 0x201   : > { %v1466_v39 = vpop.permute.xlu1 %1465 }
 0x202   : > { %v1496_v40 = vsel %vm1495_vm12, %v1464_v37, %v1466_v39 }
 0x203   : > { %6437 = vmatprep.subr.mxu1 %v1496_v40 }
 0x204   : > { %6438 = vmatpush3.msra.mxu1 %v1496_v40  ;;  %v1619_v24 = vpop.permute.xlu0 %1618 }
 0x205   : > { %v1625_v44 = vpop.permute.xlu1 %1624  ;;  %6440 = vmatmul.mubr.msk.f32.vlgmr.msra.gmra.mxu1 %vm791_vm9, %v6075_v41  ;;  %v6099_v41 = vld [vmem:[%s8308_s1 + $0x108] sm:$0xff] }
 0x206   : > { %v1652_v5 = vsel %vm1650_vm13, %v1623_v60, %v1625_v44  ;;  %6442 = vmatprep.mubr.msk.f32.mxu1 %vm791_vm9, %v6076_v43  ;;  %v7383_v43 = vld [vmem:[#allocation3] sm:$0xff]  ;;  %v6101_v44 = vld [vmem:[%s8308_s1 + $0x118] sm:$0xff] }
 0x207   : > { %6457 = vmatprep.subr.mxu0 %v1652_v5  ;;  %2122 = vst.msk [vmem:[#allocation3 + $0x18] sm:$0xff] %vm2119_vm1, %v7383_v43  ;;  %2120 = vst.msk [vmem:[#allocation3 + $0x8] sm:$0xff] %vm2119_vm1, %v7383_v43 }
 0x208   : > { %6458 = vmatpush3.msra.mxu0 %v1652_v5  ;;  %v1802_v47 = vpop.permute.xlu0 %1801  ;;  %2124 = vst.msk [vmem:[#allocation3 + $0x28] sm:$0xff] %vm2119_vm1, %v7383_v43  ;;  %2126 = vst.msk [vmem:[#allocation3 + $0x38] sm:$0xff] %vm2119_vm1, %v7383_v43  ;;  %vm2537_vm1 = vcmask 1031168  }
 0x209   : > { %v1621_v26 = vpop.permute.xlu1 %1620  ;;  %6443 = vmatmul.mubr.msk.f32.gmra.mxu1 %vm791_vm9, %v6077_v45 }
 0x20a   : > { %v1651_v48 = vsel %vm1650_vm13, %v1619_v24, %v1621_v26  ;;  %6483 = vmatprep.mubr.msk.f32.mxu1 %vm791_vm9, %v6090_v46  ;;  %v6100_v24 = vld [vmem:[%s8308_s1 + $0x110] sm:$0xff]  ;;  %v6353_v26 = vpop.f32.mrf.mxu1  ;;  %vm2279_vm13 = vcmask 195696  }
 0x20b   : > { %6459 = vmatprep.subr.mxu0 %v1651_v48 }
 0x20c   : > { %6460 = vmatpush3.msra.mxu0 %v1651_v48  ;;  %v1798_v12 = vpop.permute.xlu0 %1797  ;;  %v967_v48 = vpop.f32.mrf.mxu1 }
 0x20d   : > { %v1804_v52 = vpop.permute.xlu1 %1803  ;;  %6462 = vmatmul.mubr.msk.f32.vlgmr.msra.gmra.mxu0 %vm791_vm9, %v6083_v49 }
 0x20e   : > { %v1813_v53 = vsel %vm1805_vm14, %v1802_v47, %v1804_v52  ;;  %6464 = vmatprep.mubr.msk.f32.mxu0 %vm791_vm9, %v6084_v50  ;;  %v6356_v50 = vpop.f32.mrf.mxu1 }
 0x20f   : > { %6467 = vmatprep.subr.mxu1 %v1813_v53 }
 0x210   : > { %6468 = vmatpush3.msra.mxu1 %v1813_v53  ;;  %v1957_v56 = vpop.permute.xlu0 %1956  ;;  %v7398_v52 = vpop.f32.mrf.mxu1 }
 0x211   : > { %v1800_v27 = vpop.permute.xlu1 %1799  ;;  %6465 = vmatmul.mubr.msk.f32.gmra.mxu0 %vm791_vm9, %v6085_v54 }
 0x212   : > { %v1812_v57 = vsel %vm1805_vm14, %v1798_v12, %v1800_v27  ;;  %6505 = vmatprep.mubr.msk.f32.mxu0 %vm791_vm9, %v6098_v55 }
 0x213   : > { %6469 = vmatprep.subr.mxu1 %v1812_v57 }
 0x214   : > { %6470 = vmatpush3.msra.mxu1 %v1812_v57  ;;  %v1794_v58 = vpop.permute.xlu0 %1793 }
 0x215   : > { %v1959_v59 = vpop.permute.xlu1 %1958 }
 0x216   : > { %v1968_v16 = vsel %vm1960_vm15, %v1957_v56, %v1959_v59 }
 0x217   : > { %6489 = vmatprep.subr.mxu0 %v1968_v16 }
 0x218   : > { %6490 = vmatpush3.msra.mxu0 %v1968_v16  ;;  %v1953_v61 = vpop.permute.xlu0 %1952 }
 0x219   : > { %v1796_v62 = vpop.permute.xlu1 %1795 }
 0x21a   : > { %v1811_v63 = vsel %vm1805_vm14, %v1794_v58, %v1796_v62 }
 0x21b   : > { %6471 = vmatprep.subr.mxu1 %v1811_v63 }
 0x21c   : > { %6472 = vmatpush3.msra.mxu1 %v1811_v63  ;;  %v1790_v0 = vpop.permute.xlu0 %1789 }
 0x21d   : > { %v1955_v17 = vpop.permute.xlu1 %1954 }
 0x21e   : > { %v1967_v29 = vsel %vm1960_vm15, %v1953_v61, %v1955_v17 }
 0x21f   : > { %6491 = vmatprep.subr.mxu0 %v1967_v29 }
 0x220   : > { %6492 = vmatpush3.msra.mxu0 %v1967_v29  ;;  %v1949_v1 = vpop.permute.xlu0 %1948 }
 0x221   : > { %v1792_v2 = vpop.permute.xlu1 %1791 }
 0x222   : > { %v1810_v3 = vsel %vm1805_vm14, %v1790_v0, %v1792_v2 }
 0x223   : > { %6473 = vmatprep.subr.mxu1 %v1810_v3 }
 0x224   : > { %6474 = vmatpush3.msra.mxu1 %v1810_v3  ;;  %v1786_v4 = vpop.permute.xlu0 %1785 }
 0x225   : > { %v1951_v6 = vpop.permute.xlu1 %1950 }
 0x226   : > { %v1966_v32 = vsel %vm1960_vm15, %v1949_v1, %v1951_v6 }
 0x227   : > { %6493 = vmatprep.subr.mxu0 %v1966_v32 }
 0x228   : > { %6494 = vmatpush3.msra.mxu0 %v1966_v32  ;;  %v1945_v7 = vpop.permute.xlu0 %1944 }
 0x229   : > { %v1788_v8 = vpop.permute.xlu1 %1787 }
 0x22a   : > { %v1809_v9 = vsel %vm1805_vm14, %v1786_v4, %v1788_v8 }
 0x22b   : > { %6475 = vmatprep.subr.mxu1 %v1809_v9 }
 0x22c   : > { %6476 = vmatpush3.msra.mxu1 %v1809_v9  ;;  %v1782_v10 = vpop.permute.xlu0 %1781 }
 0x22d   : > { %v1947_v11 = vpop.permute.xlu1 %1946 }
 0x22e   : > { %v1965_v13 = vsel %vm1960_vm15, %v1945_v7, %v1947_v11 }
 0x22f   : > { %6495 = vmatprep.subr.mxu0 %v1965_v13 }
 0x230   : > { %6496 = vmatpush3.msra.mxu0 %v1965_v13  ;;  %v1941_v14 = vpop.permute.xlu0 %1940 }
 0x231   : > { %v1784_v15 = vpop.permute.xlu1 %1783 }
 0x232   : > { %v1808_v33 = vsel %vm1805_vm14, %v1782_v10, %v1784_v15 }
 0x233   : > { %6477 = vmatprep.subr.mxu1 %v1808_v33 }
 0x234   : > { %6478 = vmatpush3.msra.mxu1 %v1808_v33  ;;  %v1778_v18 = vpop.permute.xlu0 %1777 }
 0x235   : > { %v1943_v19 = vpop.permute.xlu1 %1942 }
 0x236   : > { %v1964_v22 = vsel %vm1960_vm15, %v1941_v14, %v1943_v19 }
 0x237   : > { %6497 = vmatprep.subr.mxu0 %v1964_v22 }
 0x238   : > { %6498 = vmatpush3.msra.mxu0 %v1964_v22  ;;  %v1937_v25 = vpop.permute.xlu0 %1936 }
 0x239   : > { %v1780_v20 = vpop.permute.xlu1 %1779 }
 0x23a   : > { %v1807_v42 = vsel %vm1805_vm14, %v1778_v18, %v1780_v20 }
 0x23b   : > { %6479 = vmatprep.subr.mxu1 %v1807_v42 }
 0x23c   : > { %6480 = vmatpush3.msra.mxu1 %v1807_v42  ;;  %v1774_v28 = vpop.permute.xlu0 %1773  ;;  %v6331_v5 = vpop.f32.mrf.mxu0 }
 0x23d   : > { %v1939_v30 = vpop.permute.xlu1 %1938  ;;  %v973_v59 = vadd.f32 %v6353_v26, %v6331_v5 }
 0x23e   : > { %v1963_v31 = vsel %vm1960_vm15, %v1937_v25, %v1939_v30  ;;  %v870_v45 = vpop.f32.mrf.mxu0 }
 0x23f   : > { %6499 = vmatprep.subr.mxu0 %v1963_v31  ;;  %v968_v63 = vadd.f32 %v967_v48, %v870_v45 }
 0x240   : > { %6500 = vmatpush3.msra.mxu0 %v1963_v31  ;;  %v1933_v35 = vpop.permute.xlu0 %1932  ;;  %v6334_v46 = vpop.f32.mrf.mxu0 }
 0x241   : > { %v1776_v34 = vpop.permute.xlu1 %1775 }
 0x242   : > { %v1806_v21 = vsel %vm1805_vm14, %v1774_v28, %v1776_v34  ;;  %v7396_v47 = vpop.f32.mrf.mxu0  ;;  %vm2245_vm14 = vcmask 1015696  }
 0x243   : > { %6481 = vmatprep.subr.mxu1 %v1806_v21 }
 0x244   : > { %6482 = vmatpush3.msra.mxu1 %v1806_v21  ;;  %v1929_v60 = vpop.permute.xlu0 %1928 }
 0x245   : > { %v1935_v37 = vpop.permute.xlu1 %1934  ;;  %6484 = vmatmul.mubr.msk.f32.vlgmr.msra.gmra.mxu1 %vm791_vm9, %v6091_v51 }
 0x246   : > { %v1962_v38 = vsel %vm1960_vm15, %v1933_v35, %v1935_v37  ;;  %6486 = vmatprep.mubr.msk.f32.mxu1 %vm791_vm9, %v6092_v36 }
 0x247   : > { %6501 = vmatprep.subr.mxu0 %v1962_v38 }
 0x248   : > { %6502 = vmatpush3.msra.mxu0 %v1962_v38  ;;  %v983_v38 = vadd.f32 %v6356_v50, %v6334_v46 }
 0x249   : > { %v1931_v39 = vpop.permute.xlu1 %1930  ;;  %6487 = vmatmul.mubr.msk.f32.gmra.mxu1 %vm791_vm9, %v6093_v23 }
 0x24a   : > { %v1961_v40 = vsel %vm1960_vm15, %v1929_v60, %v1931_v39  ;;  %2422 = vmatprep.mubr.f32.mxu1 %v7383_v43  ;;  %vm2296_vm15 = vcmask 310496  }
 0x24b   : > { %6503 = vmatprep.subr.mxu0 %v1961_v40 }
 0x24c   : > { %6504 = vmatpush3.msra.mxu0 %v1961_v40 }
 0x24d   : > { %6506 = vmatmul.mubr.msk.f32.vlgmr.msra.gmra.mxu0 %vm791_vm9, %v6099_v41 }
 0x24e   : > { %6508 = vmatprep.mubr.msk.f32.mxu0 %vm791_vm9, %v6100_v24  ;;  %v978_v24 = vadd.f32 %v7398_v52, %v7396_v47 }
 0x250   : > { %v6375_v49 = vpop.f32.mrf.mxu0 }
 0x251   : > { %6509 = vmatmul.mubr.msk.f32.gmra.mxu0 %vm791_vm9, %v6101_v44  ;;  %v1113_v62 = vadd.f32 %v6375_v49, %v973_v59  ;;  %v2100_v28 = vpop.permute.xlu0 %2099  ;;  %vm2211_vm9 = vcmask 786096  }
 0x252   : > { %2620 = vmatprep.mubr.f32.mxu0 %v7383_v43  ;;  %v1093_v12 = vpop.f32.mrf.mxu0 }
 0x253   : > { %v1112_v1 = vadd.f32 %v1093_v12, %v968_v63 }
 0x254   : > { %v6378_v53 = vpop.f32.mrf.mxu0 }
 0x255   : > { %v2085_v37 = vpop.permute.xlu0 %2084  ;;  %v1115_v60 = vadd.f32 %v6378_v53, %v983_v38 }
 0x256   : > { %v7400_v54 = vpop.f32.mrf.mxu0  ;;  %v7408_v13 = vpop.permute.xlu1 %2094 }
 0x257   : > { %v1114_v5 = vadd.f32 %v7400_v54, %v978_v24 }
 0x25a   : > { %v2090_v25 = vpop.permute.xlu1 %2089 }
 0x285   : > { %v6397_v55 = vpop.f32.mrf.mxu1 }
 0x286   : > { %v1300_v29 = vadd.f32 %v6397_v55, %v1113_v62 }
 0x287   : > { %v1280_v56 = vpop.f32.mrf.mxu1 }
 0x288   : > { %v1299_v32 = vadd.f32 %v1280_v56, %v1112_v1 }
 0x289   : > { %v6400_v57 = vpop.f32.mrf.mxu1 }
 0x28a   : > { %v1302_v40 = vadd.f32 %v6400_v57, %v1115_v60 }
 0x28b   : > { %v7402_v16 = vpop.f32.mrf.mxu1 }
 0x28c   : > { %v1301_v26 = vadd.f32 %v7402_v16, %v1114_v5 }
 0x28d   : > { %v6419_v27 = vpop.f32.mrf.mxu0 }
 0x28e   : > { %v1455_v4 = vadd.f32 %v6419_v27, %v1300_v29 }
 0x28f   : > { %v1435_v58 = vpop.f32.mrf.mxu0 }
 0x290   : > { %v1454_v11 = vadd.f32 %v1435_v58, %v1299_v32 }
 0x291   : > { %v6422_v61 = vpop.f32.mrf.mxu0 }
 0x292   : > { %v1457_v44 = vadd.f32 %v6422_v61, %v1302_v40 }
 0x293   : > { %v7404_v0 = vpop.f32.mrf.mxu0 }
 0x294   : > { %v1456_v50 = vadd.f32 %v7404_v0, %v1301_v26 }
 0x2c5   : > { %v6441_v17 = vpop.f32.mrf.mxu1 }
 0x2c6   : > { %v1610_v8 = vadd.f32 %v6441_v17, %v1455_v4 }
 0x2c7   : > { %v1590_v2 = vpop.f32.mrf.mxu1 }
 0x2c8   : > { %v1609_v18 = vadd.f32 %v1590_v2, %v1454_v11 }
 0x2c9   : > { %v6444_v6 = vpop.f32.mrf.mxu1 }
 0x2ca   : > { %v1612_v45 = vadd.f32 %v6444_v6, %v1457_v44 }
 0x2cb   : > { %v7406_v9 = vpop.f32.mrf.mxu1 }
 0x2cc   : > { %v1611_v52 = vadd.f32 %v7406_v9, %v1456_v50 }
 0x2cd   : > { %v6463_v3 = vpop.f32.mrf.mxu0 }
 0x2ce   : > { %v1765_v15 = vadd.f32 %v6463_v3, %v1610_v8 }
 0x2cf   : > { %v1745_v7 = vpop.f32.mrf.mxu0 }
 0x2d0   : > { %v1764_v30 = vadd.f32 %v1745_v7, %v1609_v18 }
 0x2d1   : > { %v6466_v10 = vpop.f32.mrf.mxu0 }
 0x2d2   : > { %v1767_v48 = vadd.f32 %v6466_v10, %v1612_v45 }
 0x2d3   : > { %v7410_v33 = vpop.f32.mrf.mxu0 }
 0x2d4   : > { %v1766_v55 = vadd.f32 %v7410_v33, %v1611_v52 }
 0x305   : > { %v6485_v14 = vpop.f32.mrf.mxu1 }
 0x306   : > { %v1920_v19 = vadd.f32 %v6485_v14, %v1765_v15 }
 0x307   : > { %v1900_v42 = vpop.f32.mrf.mxu1 }
 0x308   : > { %v1919_v21 = vadd.f32 %v1900_v42, %v1764_v30 }
 0x309   : > { %v6488_v46 = vpop.f32.mrf.mxu1 }
 0x30a   : > { %v1922_v47 = vadd.f32 %v6488_v46, %v1767_v48 }
 0x30b   : > { %v1910_v54 = vpop.f32.mrf.mxu1 }
 0x30c   : > { %v1921_v57 = vadd.f32 %v1910_v54, %v1766_v55  ;;  %v3351_v54 = vld [vmem:[%s8311_s4 + $0x8] sm:$0xff] }
 0x30d   : > { %v6507_v22 = vpop.f32.mrf.mxu0 }
 0x30e   : > { %v2075_v20 = vadd.f32 %v6507_v22, %v1920_v19 }
 0x30f   : > { %v2055_v34 = vpop.f32.mrf.mxu0 }
 0x310   : > { %v2103_v31 = vadd.f32 %v2090_v25, %v2075_v20  ;;  %v2074_v36 = vadd.f32 %v2055_v34, %v1919_v21 }
 0x311   : > { %v6510_v49 = vpop.f32.mrf.mxu0 }
 0x312   : > { %vm2107_vm0 = vcmp.ge.f32.partialorder %v2103_v31, 0.0  ;;  %v2111_v51 = vmul.f32 0.01, %v2103_v31  ;;  %v2102_v23 = vadd.f32 %v2085_v37, %v2074_v36  ;;  %v2077_v12 = vadd.f32 %v6510_v49, %v1922_v47 }
 0x313   : > { %v2065_v27 = vpop.f32.mrf.mxu0 }
 0x314   : > { %v2115_v35 = vsel %vm2107_vm0, %v2103_v31, %v2111_v51  ;;  %v2110_v39 = vmul.f32 0.01, %v2102_v23  ;;  %vm2106_vm2 = vcmp.ge.f32.partialorder %v2102_v23, 0.0  ;;  %v2105_v53 = vadd.f32 %v2100_v28, %v2077_v12 }
 0x315   : > { %2167 = vrot.lane.b32.xlu0 %v2115_v35, %s6635_s18  ;;  %2133 = vrot.lane.b32.xlu1 %v2115_v35, %s6634_s17  ;;  %v2076_v59 = vadd.f32 %v2065_v27, %v1921_v57  ;;  %v3350_v27 = vld [vmem:[%s8311_s4] sm:$0xff]  ;;  %vm2338_vm0 = vcmask 1039360  }
 0x316   : > { %v2114_v41 = vsel %vm2106_vm2, %v2102_v23, %v2110_v39  ;;  %v2113_v56 = vmul.f32 0.01, %v2105_v53  ;;  %vm2109_vm3 = vcmp.ge.f32.partialorder %v2105_v53, 0.0  ;;  %vm2351_vm2 = vcmask 261120  }
 0x317   : > { %v2104_v16 = vadd.f32 %v7408_v13, %v2076_v59 }
 0x318   : > { %v2117_v58 = vsel %vm2109_vm3, %v2105_v53, %v2113_v56  ;;  %vm2774_vm3 = vcmask 924672  }
 0x319   : > { %2184 = vrot.lane.b32.xlu0 %v2115_v35, %s6650_s16  ;;  %2150 = vrot.lane.b32.xlu1 %v2115_v35, %s6651_s28  ;;  %v2112_v61 = vmul.f32 0.01, %v2104_v16  ;;  %vm2108_vm4 = vcmp.ge.f32.partialorder %v2104_v16, 0.0 }
 0x31b   : > { %v2116_v62 = vsel %vm2108_vm4, %v2104_v16, %v2112_v61  ;;  %vm2893_vm4 = vcmask 916480  }
 0x31d   : > { %2201 = vrot.lane.b32.xlu0 %v2115_v35, %s6636_s19  ;;  %2218 = vrot.lane.b32.xlu1 %v2115_v35, %s6652_s29 }
 0x321   : > { %2252 = vrot.lane.b32.xlu0 %v2115_v35, %s6653_s14  ;;  %2131 = vrot.lane.b32.xlu1 %v2114_v41, %s6634_s17 }
 0x325   : > { %2269 = vrot.lane.b32.xlu0 %v2115_v35, %s6638_s21  ;;  %2148 = vrot.lane.b32.xlu1 %v2114_v41, %s6651_s28 }
 0x329   : > { %2235 = vrot.lane.b32.xlu0 %v2115_v35, %s6637_s20  ;;  %2165 = vrot.lane.b32.xlu1 %v2114_v41, %s6635_s18 }
 0x32d   : > { %2286 = vrot.lane.b32.xlu0 %v2115_v35, %s6654_s15  ;;  %2199 = vrot.lane.b32.xlu1 %v2114_v41, %s6636_s19 }
 0x331   : > { %2182 = vrot.lane.b32.xlu0 %v2114_v41, %s6650_s16  ;;  %2250 = vrot.lane.b32.xlu1 %v2114_v41, %s6653_s14 }
 0x335   : > { %2267 = vrot.lane.b32.xlu0 %v2114_v41, %s6638_s21  ;;  %2216 = vrot.lane.b32.xlu1 %v2114_v41, %s6652_s29 }
 0x339   : > { %2284 = vrot.lane.b32.xlu0 %v2114_v41, %s6654_s15  ;;  %2233 = vrot.lane.b32.xlu1 %v2114_v41, %s6637_s20 }
 0x33d   : > { %2154 = vrot.lane.b32.xlu0 %v2117_v58, %s6651_s28  ;;  %2137 = vrot.lane.b32.xlu1 %v2117_v58, %s6634_s17 }
 0x341   : > { %2171 = vrot.lane.b32.xlu0 %v2117_v58, %s6635_s18  ;;  %2205 = vrot.lane.b32.xlu1 %v2117_v58, %s6636_s19 }
 0x345   : > { %2188 = vrot.lane.b32.xlu0 %v2117_v58, %s6650_s16  ;;  %2222 = vrot.lane.b32.xlu1 %v2117_v58, %s6652_s29 }
 0x349   : > { %2256 = vrot.lane.b32.xlu0 %v2117_v58, %s6653_s14  ;;  %2135 = vrot.lane.b32.xlu1 %v2116_v62, %s6634_s17  ;;  %s6655_s17 = smov 113  }
 0x34d   : > { %2273 = vrot.lane.b32.xlu0 %v2117_v58, %s6638_s21  ;;  %2152 = vrot.lane.b32.xlu1 %v2116_v62, %s6651_s28  ;;  %s8322_s28 = smov 100  }
 0x351   : > { %2239 = vrot.lane.b32.xlu0 %v2117_v58, %s6637_s20  ;;  %2203 = vrot.lane.b32.xlu1 %v2116_v62, %s6636_s19 }
 0x355   : > { %2290 = vrot.lane.b32.xlu0 %v2117_v58, %s6654_s15  ;;  %2254 = vrot.lane.b32.xlu1 %v2116_v62, %s6653_s14 }
 0x359   : > { %2169 = vrot.lane.b32.xlu0 %v2116_v62, %s6635_s18  ;;  %2220 = vrot.lane.b32.xlu1 %v2116_v62, %s6652_s29 }
 0x35d   : > { %2186 = vrot.lane.b32.xlu0 %v2116_v62, %s6650_s16  ;;  %2237 = vrot.lane.b32.xlu1 %v2116_v62, %s6637_s20 }
 0x361   : > { %2271 = vrot.lane.b32.xlu0 %v2116_v62, %s6638_s21  ;;  %2288 = vrot.lane.b32.xlu1 %v2116_v62, %s6654_s15 }
 0x387   : > { %v2134_v63 = vpop.permute.xlu1 %2133  ;;  %v2168_v0 = vpop.permute.xlu0 %2167 }
 0x388   : > { %2145 = vst.msk [vmem:[#allocation3 + $0x10] sm:$0xff] %vm2143_vm5, %v2134_v63 }
 0x38b   : > { %v2151_v17 = vpop.permute.xlu1 %2150  ;;  %v2185_v29 = vpop.permute.xlu0 %2184 }
 0x38c   : > { %2162 = vst.msk [vmem:[#allocation3 + $0x10] sm:$0xff] %vm2160_vm6, %v2151_v17 }
 0x38d   : > { %2179 = vst.msk [vmem:[#allocation3 + $0x10] sm:$0xff] %vm2177_vm7, %v2168_v0 }
 0x38e   : > { %2196 = vst.msk [vmem:[#allocation3 + $0x10] sm:$0xff] %vm2194_vm8, %v2185_v29 }
 0x38f   : > { %v2219_v1 = vpop.permute.xlu1 %2218  ;;  %v2202_v2 = vpop.permute.xlu0 %2201 }
 0x390   : > { %2213 = vst.msk [vmem:[#allocation3 + $0x10] sm:$0xff] %vm2211_vm9, %v2202_v2 }
 0x391   : > { %2230 = vst.msk [vmem:[#allocation3 + $0x10] sm:$0xff] %vm2228_vm10, %v2219_v1 }
 0x393   : > { %v2132_v3 = vpop.permute.xlu1 %2131  ;;  %v2253_v4 = vpop.permute.xlu0 %2252 }
 0x394   : > { %2144 = vst.msk [vmem:[#allocation3] sm:$0xff] %vm2143_vm5, %v2132_v3 }
 0x395   : > { %2264 = vst.msk [vmem:[#allocation3 + $0x18] sm:$0xff] %vm2262_vm11, %v2253_v4 }
 0x397   : > { %v2149_v6 = vpop.permute.xlu1 %2148  ;;  %v2270_v32 = vpop.permute.xlu0 %2269 }
 0x398   : > { %2161 = vst.msk [vmem:[#allocation3] sm:$0xff] %vm2160_vm6, %v2149_v6 }
 0x399   : > { %2281 = vst.msk [vmem:[#allocation3 + $0x18] sm:$0xff] %vm2279_vm13, %v2270_v32 }
 0x39b   : > { %v2166_v7 = vpop.permute.xlu1 %2165  ;;  %v2236_v8 = vpop.permute.xlu0 %2235 }
 0x39c   : > { %2178 = vst.msk [vmem:[#allocation3] sm:$0xff] %vm2177_vm7, %v2166_v7 }
 0x39d   : > { %2247 = vst.msk [vmem:[#allocation3 + $0x10] sm:$0xff] %vm2245_vm14, %v2236_v8 }
 0x39f   : > { %v2200_v9 = vpop.permute.xlu1 %2199  ;;  %v2287_v10 = vpop.permute.xlu0 %2286 }
 0x3a0   : > { %2298 = vst.msk [vmem:[#allocation3 + $0x18] sm:$0xff] %vm2296_vm15, %v2287_v10 }
 0x3a3   : > { %v2251_v11 = vpop.permute.xlu1 %2250  ;;  %v2183_v13 = vpop.permute.xlu0 %2182 }
 0x3a4   : > { %v7477_v14 = vld [vmem:[#allocation3 + $0x10] sm:$0xff]  ;;  %2263 = vst.msk [vmem:[#allocation3 + $0x8] sm:$0xff] %vm2262_vm11, %v2251_v11 }
 0x3a5   : > { %2195 = vst.msk [vmem:[#allocation3] sm:$0xff] %vm2194_vm8, %v2183_v13  ;;  %2326 = vrot.lane.b32.xlu1 %v7477_v14, %s6641_s24 }
 0x3a6   : > { %2212 = vst.msk [vmem:[#allocation3] sm:$0xff] %vm2211_vm9, %v2200_v9 }
 0x3a7   : > { %v2217_v15 = vpop.permute.xlu1 %2216  ;;  %v2268_v33 = vpop.permute.xlu0 %2267  ;;  %v7484_v18 = vld [vmem:[#allocation3 + $0x18] sm:$0xff] }
 0x3a8   : > { %2229 = vst.msk [vmem:[#allocation3] sm:$0xff] %vm2228_vm10, %v2217_v15  ;;  %2328 = vrot.lane.b32.xlu0 %v7484_v18, %s6641_s24 }
 0x3a9   : > { %2280 = vst.msk [vmem:[#allocation3 + $0x8] sm:$0xff] %vm2279_vm13, %v2268_v33  ;;  %2525 = vrot.lane.b32.xlu1 %v7477_v14, %s6642_s27 }
 0x3ab   : > { %v2234_v19 = vpop.permute.xlu1 %2233  ;;  %v2285_v22 = vpop.permute.xlu0 %2284 }
 0x3ac   : > { %2246 = vst.msk [vmem:[#allocation3] sm:$0xff] %vm2245_vm14, %v2234_v19  ;;  %2527 = vrot.lane.b32.xlu0 %v7484_v18, %s6642_s27 }
 0x3ad   : > { %2297 = vst.msk [vmem:[#allocation3 + $0x8] sm:$0xff] %vm2296_vm15, %v2285_v22  ;;  %2644 = vrot.lane.b32.xlu1 %v7477_v14, %s8319_s11 }
 0x3af   : > { %v2138_v25 = vpop.permute.xlu1 %2137  ;;  %v2155_v20 = vpop.permute.xlu0 %2154 }
 0x3b0   : > { %2147 = vst.msk [vmem:[#allocation3 + $0x30] sm:$0xff] %vm2143_vm5, %v2138_v25  ;;  %2646 = vrot.lane.b32.xlu0 %v7484_v18, %s8319_s11 }
 0x3b1   : > { %2762 = vrot.lane.b32.xlu1 %v7477_v14, %s6655_s17  ;;  %2164 = vst.msk [vmem:[#allocation3 + $0x30] sm:$0xff] %vm2160_vm6, %v2155_v20 }
 0x3b3   : > { %v2206_v42 = vpop.permute.xlu1 %2205  ;;  %v2172_v28 = vpop.permute.xlu0 %2171  ;;  %v7522_v36 = vld [vmem:[#allocation3] sm:$0xff] }
 0x3b4   : > { %2181 = vst.msk [vmem:[#allocation3 + $0x30] sm:$0xff] %vm2177_vm7, %v2172_v28  ;;  %2764 = vrot.lane.b32.xlu0 %v7484_v18, %s6655_s17  ;;  %v7530_v23 = vld [vmem:[#allocation3 + $0x8] sm:$0xff] }
 0x3b5   : > { %2881 = vrot.lane.b32.xlu1 %v7477_v14, %s8323_s26 }
 0x3b7   : > { %v2223_v30 = vpop.permute.xlu1 %2222  ;;  %v2189_v31 = vpop.permute.xlu0 %2188 }
 0x3b8   : > { %2198 = vst.msk [vmem:[#allocation3 + $0x30] sm:$0xff] %vm2194_vm8, %v2189_v31  ;;  %2883 = vrot.lane.b32.xlu0 %v7484_v18, %s8323_s26 }
 0x3b9   : > { %3000 = vrot.lane.b32.xlu1 %v7477_v14, %s8322_s28  ;;  %2215 = vst.msk [vmem:[#allocation3 + $0x30] sm:$0xff] %vm2211_vm9, %v2206_v42 }
 0x3ba   : > { %2232 = vst.msk [vmem:[#allocation3 + $0x30] sm:$0xff] %vm2228_vm10, %v2223_v30 }
 0x3bb   : > { %v2136_v34 = vpop.permute.xlu1 %2135  ;;  %v2257_v21 = vpop.permute.xlu0 %2256 }
 0x3bc   : > { %2146 = vst.msk [vmem:[#allocation3 + $0x20] sm:$0xff] %vm2143_vm5, %v2136_v34  ;;  %3002 = vrot.lane.b32.xlu0 %v7484_v18, %s8322_s28  ;;  %vm3012_vm5 = vcmask 818176  }
 0x3bd   : > { %2266 = vst.msk [vmem:[#allocation3 + $0x38] sm:$0xff] %vm2262_vm11, %v2257_v21  ;;  %3119 = vrot.lane.b32.xlu1 %v7477_v14, %s6658_s13 }
 0x3bf   : > { %v2153_v51 = vpop.permute.xlu1 %2152  ;;  %v2274_v35 = vpop.permute.xlu0 %2273 }
 0x3c0   : > { %2163 = vst.msk [vmem:[#allocation3 + $0x20] sm:$0xff] %vm2160_vm6, %v2153_v51  ;;  %3121 = vrot.lane.b32.xlu0 %v7484_v18, %s6658_s13  ;;  %vm3250_vm6 = vcmask 801792  }
 0x3c1   : > { %2283 = vst.msk [vmem:[#allocation3 + $0x38] sm:$0xff] %vm2279_vm13, %v2274_v35  ;;  %2322 = vrot.lane.b32.xlu1 %v7522_v36, %s6641_s24 }
 0x3c3   : > { %v2204_v37 = vpop.permute.xlu1 %2203  ;;  %v2240_v38 = vpop.permute.xlu0 %2239 }
 0x3c4   : > { %2249 = vst.msk [vmem:[#allocation3 + $0x30] sm:$0xff] %vm2245_vm14, %v2240_v38  ;;  %2324 = vrot.lane.b32.xlu0 %v7530_v23, %s6641_s24 }
 0x3c5   : > { %2521 = vrot.lane.b32.xlu1 %v7522_v36, %s6642_s27 }
 0x3c7   : > { %v2255_v60 = vpop.permute.xlu1 %2254  ;;  %v2291_v39 = vpop.permute.xlu0 %2290 }
 0x3c8   : > { %2265 = vst.msk [vmem:[#allocation3 + $0x28] sm:$0xff] %vm2262_vm11, %v2255_v60  ;;  %2523 = vrot.lane.b32.xlu0 %v7530_v23, %s6642_s27  ;;  %vm3380_vm11 = vcmask 130048  }
 0x3c9   : > { %2300 = vst.msk [vmem:[#allocation3 + $0x38] sm:$0xff] %vm2296_vm15, %v2291_v39  ;;  %2640 = vrot.lane.b32.xlu1 %v7522_v36, %s8319_s11 }
 0x3cb   : > { %v2221_v40 = vpop.permute.xlu1 %2220  ;;  %v2170_v41 = vpop.permute.xlu0 %2169  ;;  %v7562_v46 = vld [vmem:[#allocation3 + $0x30] sm:$0xff] }
 0x3cc   : > { %2180 = vst.msk [vmem:[#allocation3 + $0x20] sm:$0xff] %vm2177_vm7, %v2170_v41  ;;  %2642 = vrot.lane.b32.xlu0 %v7530_v23, %s8319_s11  ;;  %vm3131_vm7 = vcmask 809984  }
 0x3cd   : > { %2758 = vrot.lane.b32.xlu1 %v7522_v36, %s6655_s17 }
 0x3cf   : > { %v2238_v24 = vpop.permute.xlu1 %2237  ;;  %v2187_v44 = vpop.permute.xlu0 %2186 }
 0x3d0   : > { %2197 = vst.msk [vmem:[#allocation3 + $0x20] sm:$0xff] %vm2194_vm8, %v2187_v44  ;;  %2760 = vrot.lane.b32.xlu0 %v7530_v23, %s6655_s17  ;;  %v7568_v26 = vld [vmem:[#allocation3 + $0x38] sm:$0xff] }
 0x3d1   : > { %2877 = vrot.lane.b32.xlu1 %v7522_v36, %s8323_s26  ;;  %2214 = vst.msk [vmem:[#allocation3 + $0x20] sm:$0xff] %vm2211_vm9, %v2204_v37 }
 0x3d2   : > { %2231 = vst.msk [vmem:[#allocation3 + $0x20] sm:$0xff] %vm2228_vm10, %v2221_v40 }
 0x3d3   : > { %2248 = vst.msk [vmem:[#allocation3 + $0x20] sm:$0xff] %vm2245_vm14, %v2238_v24  ;;  %v2289_v5 = vpop.permute.xlu1 %2288  ;;  %v2272_v45 = vpop.permute.xlu0 %2271  ;;  %vm3393_vm14 = vcmask 376080  }
 0x3d4   : > { %2282 = vst.msk [vmem:[#allocation3 + $0x28] sm:$0xff] %vm2279_vm13, %v2272_v45  ;;  %2879 = vrot.lane.b32.xlu0 %v7530_v23, %s8323_s26 }
 0x3d5   : > { %2996 = vrot.lane.b32.xlu1 %v7522_v36, %s8322_s28  ;;  %2299 = vst.msk [vmem:[#allocation3 + $0x28] sm:$0xff] %vm2296_vm15, %v2289_v5  ;;  %v6106_v5 = vld [vmem:[%s8310_s3 + $0x10] sm:$0xff]  ;;  %vm3447_vm15 = vcmask 113680  }
 0x3d8   : > { %2998 = vrot.lane.b32.xlu0 %v7530_v23, %s8322_s28 }
 0x3d9   : > { %2334 = vrot.lane.b32.xlu1 %v7562_v46, %s6641_s24 }
 0x3da   : > { %v7598_v48 = vld [vmem:[#allocation3 + $0x20] sm:$0xff] }
 0x3dc   : > { %2336 = vrot.lane.b32.xlu0 %v7568_v26, %s6641_s24  ;;  %v7604_v49 = vld [vmem:[#allocation3 + $0x28] sm:$0xff] }
 0x3dd   : > { %2533 = vrot.lane.b32.xlu1 %v7562_v46, %s6642_s27 }
 0x3e0   : > { %2535 = vrot.lane.b32.xlu0 %v7568_v26, %s6642_s27 }
 0x3e1   : > { %2652 = vrot.lane.b32.xlu1 %v7562_v46, %s8319_s11 }
 0x3e4   : > { %2654 = vrot.lane.b32.xlu0 %v7568_v26, %s8319_s11 }
 0x3e5   : > { %2770 = vrot.lane.b32.xlu1 %v7562_v46, %s6655_s17 }
 0x3e8   : > { %2772 = vrot.lane.b32.xlu0 %v7568_v26, %s6655_s17 }
 0x3e9   : > { %2889 = vrot.lane.b32.xlu1 %v7562_v46, %s8323_s26 }
 0x3ec   : > { %2891 = vrot.lane.b32.xlu0 %v7568_v26, %s8323_s26 }
 0x3ed   : > { %3008 = vrot.lane.b32.xlu1 %v7562_v46, %s8322_s28 }
 0x3f0   : > { %3010 = vrot.lane.b32.xlu0 %v7568_v26, %s8322_s28 }
 0x3f1   : > { %3127 = vrot.lane.b32.xlu1 %v7562_v46, %s6658_s13 }
 0x3f4   : > { %3129 = vrot.lane.b32.xlu0 %v7568_v26, %s6658_s13 }
 0x3f5   : > { %3246 = vrot.lane.b32.xlu1 %v7562_v46, %s8321_s25 }
 0x3f8   : > { %3248 = vrot.lane.b32.xlu0 %v7568_v26, %s8321_s25 }
 0x3f9   : > { %2330 = vrot.lane.b32.xlu1 %v7598_v48, %s6641_s24 }
 0x3fc   : > { %2332 = vrot.lane.b32.xlu0 %v7604_v49, %s6641_s24 }
 0x3fd   : > { %3115 = vrot.lane.b32.xlu1 %v7522_v36, %s6658_s13 }
 0x400   : > { %2531 = vrot.lane.b32.xlu0 %v7604_v49, %s6642_s27 }
 0x401   : > { %3238 = vrot.lane.b32.xlu1 %v7477_v14, %s8321_s25 }
 0x404   : > { %2650 = vrot.lane.b32.xlu0 %v7604_v49, %s8319_s11 }
 0x405   : > { %2529 = vrot.lane.b32.xlu1 %v7598_v48, %s6642_s27 }
 0x408   : > { %2768 = vrot.lane.b32.xlu0 %v7604_v49, %s6655_s17 }
 0x409   : > { %2648 = vrot.lane.b32.xlu1 %v7598_v48, %s8319_s11  ;;  %s6666_s11 = smov 96  }
 0x40c   : > { %2887 = vrot.lane.b32.xlu0 %v7604_v49, %s8323_s26 }
 0x40d   : > { %2766 = vrot.lane.b32.xlu1 %v7598_v48, %s6655_s17  ;;  %s6664_s17 = smov 111  }
 0x410   : > { %3006 = vrot.lane.b32.xlu0 %v7604_v49, %s8322_s28 }
 0x411   : > { %2885 = vrot.lane.b32.xlu1 %v7598_v48, %s8323_s26 }
 0x414   : > { %3125 = vrot.lane.b32.xlu0 %v7604_v49, %s6658_s13 }
 0x415   : > { %3004 = vrot.lane.b32.xlu1 %v7598_v48, %s8322_s28  ;;  %s6663_s28 = smov 94  }
 0x417   : > { %v7634_v47 = vpop.permute.xlu1 %2326 }
 0x418   : > { %3244 = vrot.lane.b32.xlu0 %v7604_v49, %s8321_s25 }
 0x419   : > { %3123 = vrot.lane.b32.xlu1 %v7598_v48, %s6658_s13 }
 0x41a   : > { %v7642_v12 = vpop.permute.xlu0 %2328 }
 0x41b   : > { %v7640_v50 = vpop.permute.xlu1 %2525  ;;  %v2340_v41 = vsel %vm2338_vm0, %v7634_v47, %v7642_v12 }
 0x41c   : > { %3117 = vrot.lane.b32.xlu0 %v7530_v23, %s6658_s13  ;;  %s6665_s13 = smov 110  }
 0x41d   : > { %3242 = vrot.lane.b32.xlu1 %v7598_v48, %s8321_s25 }
 0x41e   : > { %v7650_v53 = vpop.permute.xlu0 %2527 }
 0x41f   : > { %v7648_v52 = vpop.permute.xlu1 %2644 }
 0x420   : > { %3240 = vrot.lane.b32.xlu0 %v7484_v18, %s8321_s25 }
 0x421   : > { %3234 = vrot.lane.b32.xlu1 %v7522_v36, %s8321_s25 }
 0x422   : > { %v7661_v56 = vpop.permute.xlu0 %2646 }
 0x423   : > { %v7659_v55 = vpop.permute.xlu1 %2762 }
 0x424   : > { %3236 = vrot.lane.b32.xlu0 %v7530_v23, %s8321_s25  ;;  %s6660_s25 = smov 52  }
 0x425   : > { %3359 = vperm.xlu1 %6615, %v3351_v54  }
 0x426   : > { %v7670_v58 = vpop.permute.xlu0 %2764 }
 0x427   : > { %v7668_v57 = vpop.permute.xlu1 %2881 }
 0x428   : > { %3354 = vperm.xlu0 %6614, %v3350_v27  }
 0x42a   : > { %v7674_v16 = vpop.permute.xlu0 %2883 }
 0x42b   : > { %v7672_v59 = vpop.permute.xlu1 %3000 }
 0x42e   : > { %v7678_v62 = vpop.permute.xlu0 %3002 }
 0x42f   : > { %v7676_v61 = vpop.permute.xlu1 %3119 }
 0x432   : > { %v7680_v0 = vpop.permute.xlu0 %3121 }
 0x433   : > { %v2323_v63 = vpop.permute.xlu1 %2322 }
 0x436   : > { %v2325_v29 = vpop.permute.xlu0 %2324 }
 0x437   : > { %v7682_v17 = vpop.permute.xlu1 %2521  ;;  %v2339_v45 = vsel %vm2338_vm0, %v2323_v63, %v2325_v29 }
 0x43a   : > { %v7686_v2 = vpop.permute.xlu0 %2523 }
 0x43b   : > { %v7684_v1 = vpop.permute.xlu1 %2640 }
 0x43e   : > { %v7690_v4 = vpop.permute.xlu0 %2642 }
 0x43f   : > { %v7688_v3 = vpop.permute.xlu1 %2758 }
 0x442   : > { %v7694_v32 = vpop.permute.xlu0 %2760 }
 0x443   : > { %v7692_v6 = vpop.permute.xlu1 %2877 }
 0x446   : > { %v7698_v8 = vpop.permute.xlu0 %2879 }
 0x447   : > { %v7696_v7 = vpop.permute.xlu1 %2996 }
 0x44a   : > { %v7700_v10 = vpop.permute.xlu0 %2998 }
 0x44b   : > { %v2335_v9 = vpop.permute.xlu1 %2334 }
 0x44e   : > { %v2337_v13 = vpop.permute.xlu0 %2336 }
 0x44f   : > { %v2534_v11 = vpop.permute.xlu1 %2533  ;;  %2382 = vmatprep.subr.mxu1 %v2337_v13  ;;  %v2342_v15 = vsel %vm2338_vm0, %v2335_v9, %v2337_v13  ;;  %v2657_v13 = vsel %vm1495_vm12, %v7648_v52, %v7661_v56  ;;  %v2656_v52 = vsel %vm1495_vm12, %v7684_v1, %v7690_v4 }
 0x450   : > { %2383 = vmatpush1.msra.mxu1 %v2342_v15  ;;  %v2776_v15 = vsel %vm2774_vm3, %v7659_v55, %v7670_v58  ;;  %v2775_v55 = vsel %vm2774_vm3, %v7688_v3, %v7694_v32 }
 0x452   : > { %v2536_v19 = vpop.permute.xlu0 %2535 }
 0x453   : > { %v7703_v33 = vpop.permute.xlu1 %2652  ;;  %2580 = vmatprep.subr.mxu0 %v2536_v19  ;;  %v2541_v22 = vsel %vm2537_vm1, %v2534_v11, %v2536_v19 }
 0x454   : > { %2581 = vmatpush1.msra.mxu0 %v2541_v22  ;;  %v6117_v22 = vld [vmem:[%s8310_s3 + $0x38] sm:$0xff] }
 0x456   : > { %v2655_v20 = vpop.permute.xlu0 %2654 }
 0x457   : > { %v7706_v25 = vpop.permute.xlu1 %2770 }
 0x45a   : > { %v2773_v28 = vpop.permute.xlu0 %2772 }
 0x45b   : > { %v7708_v42 = vpop.permute.xlu1 %2889 }
 0x45e   : > { %v7712_v31 = vpop.permute.xlu0 %2891 }
 0x45f   : > { %v7710_v30 = vpop.permute.xlu1 %3008  ;;  %v2897_v3 = vsel %vm2893_vm4, %v7708_v42, %v7712_v31 }
 0x462   : > { %v7716_v21 = vpop.permute.xlu0 %3010 }
 0x463   : > { %v7714_v34 = vpop.permute.xlu1 %3127 }
 0x466   : > { %v7720_v35 = vpop.permute.xlu0 %3129 }
 0x467   : > { %v7718_v51 = vpop.permute.xlu1 %3246 }
 0x46a   : > { %v7722_v38 = vpop.permute.xlu0 %3248 }
 0x46b   : > { %v2331_v37 = vpop.permute.xlu1 %2330 }
 0x46e   : > { %v2333_v39 = vpop.permute.xlu0 %2332 }
 0x46f   : > { %v7724_v60 = vpop.permute.xlu1 %3115  ;;  %2384 = vmatprep.subr.mxu1 %v2333_v39  ;;  %v2341_v40 = vsel %vm2338_vm0, %v2331_v37, %v2333_v39  ;;  %v2894_v37 = vsel %vm2893_vm4, %v7692_v6, %v7698_v8  ;;  %v3135_v6 = vsel %vm3131_vm7, %v7714_v34, %v7720_v35  ;;  %v7874_v39 = vld [vmem:[#allocation4] sm:$0xff]  ;;  %v6129_v34 = vld [vmem:[%s8310_s3 + $0x68] sm:$0xff] }
 0x470   : > { %2385 = vmatpush1.msra.mxu1 %v2341_v40  ;;  %v6132_v40 = vld [vmem:[%s8310_s3 + $0x70] sm:$0xff]  ;;  %3381 = vst.msk [vmem:[#allocation4 + $0x10] sm:$0xff] %vm3380_vm11, %v7874_v39  ;;  %3384 = vst.msk [vmem:[#allocation4 + $0x28] sm:$0xff] %vm3380_vm11, %v7874_v39 }
 0x471   : > { %2386 = vmatprep.subr.mxu1 %v7642_v12  ;;  %v6107_v12 = vld [vmem:[%s8310_s3 + $0x18] sm:$0xff] }
 0x472   : > { %2387 = vmatpush1.msra.mxu1 %v2340_v41  ;;  %v2532_v44 = vpop.permute.xlu0 %2531 }
 0x473   : > { %v7731_v24 = vpop.permute.xlu1 %3238  ;;  %2388 = vmatprep.subr.mxu1 %v2325_v29  ;;  %2582 = vmatprep.subr.mxu0 %v2532_v44 }
 0x474   : > { %2389 = vmatpush1.msra.mxu1 %v2339_v45 }
 0x475   : > { %6108 = vmatmul.mubr.msk.f32.vlgmr.msra.gmra.mxu1 %vm2351_vm2, %v6106_v5  ;;  %2465 = vmatprep.subr.mxu1 %v7568_v26  ;;  %v2539_v26 = vsel %vm2537_vm1, %v7640_v50, %v7650_v53  ;;  %v2778_v50 = vsel %vm2774_vm3, %v7706_v25, %v2773_v28 }
 0x476   : > { %2466 = vmatpush1.msra.mxu1 %v7562_v46  ;;  %v2651_v47 = vpop.permute.xlu0 %2650  ;;  %2428 = vmatprep.mubr.f32.mxu1 %v7383_v43 }
 0x477   : > { %v2530_v54 = vpop.permute.xlu1 %2529  ;;  %2467 = vmatprep.subr.mxu1 %v7604_v49 }
 0x478   : > { %v2540_v27 = vsel %vm2537_vm1, %v2530_v54, %v2532_v44  ;;  %2468 = vmatpush1.msra.mxu1 %v7598_v48  ;;  %v2301_v48 = vld [vmem:[%s8310_s3] sm:$0xff] }
 0x479   : > { %2583 = vmatpush1.msra.mxu0 %v2540_v27  ;;  %6109 = vmatmul.mubr.msk.f32.gmra.mxu1 %vm2351_vm2, %v6107_v12 }
 0x47a   : > { %2469 = vmatprep.subr.mxu1 %v7484_v18  ;;  %2584 = vmatprep.subr.mxu0 %v7650_v53  ;;  %v2769_v63 = vpop.permute.xlu0 %2768  ;;  %v6112_v18 = vld [vmem:[%s8310_s3 + $0x20] sm:$0xff] }
 0x47b   : > { %v2649_v46 = vpop.permute.xlu1 %2648  ;;  %2470 = vmatpush1.msra.mxu1 %v7477_v14  ;;  %2585 = vmatpush1.msra.mxu0 %v2539_v26  ;;  %v2538_v14 = vsel %vm2537_vm1, %v7682_v17, %v7686_v2  ;;  %v2302_v17 = vld [vmem:[%s8310_s3 + $0x8] sm:$0xff] }
 0x47c   : > { %2471 = vmatprep.subr.mxu1 %v7530_v23  ;;  %2586 = vmatprep.subr.mxu0 %v7686_v2  ;;  %v2658_v29 = vsel %vm1495_vm12, %v2649_v46, %v2651_v47  ;;  %v6113_v2 = vld [vmem:[%s8310_s3 + $0x28] sm:$0xff] }
 0x47d   : > { %2472 = vmatpush1.msra.mxu1 %v7522_v36  ;;  %2505 = vmatprep.mubr.f32.mxu1 %v7383_v43  ;;  %v2659_v36 = vsel %vm1495_vm12, %v7703_v33, %v2655_v20  ;;  %v6116_v33 = vld [vmem:[%s8310_s3 + $0x30] sm:$0xff] }
 0x47e   : > { %2587 = vmatpush1.msra.mxu0 %v2538_v14  ;;  %6110 = vmatmul.mubr.msk.f32.vlgmr.msra.gmra.mxu1 %vm2351_vm2, %v2301_v48  ;;  %v2888_v49 = vpop.permute.xlu0 %2887 }
 0x47f   : > { %2698 = vmatprep.subr.mxu1 %v2655_v20  ;;  %v2767_v23 = vpop.permute.xlu1 %2766  ;;  %2817 = vmatprep.subr.mxu0 %v2773_v28  ;;  %v6121_v20 = vld [vmem:[%s8310_s3 + $0x48] sm:$0xff] }
 0x480   : > { %6114 = vmatmul.mubr.msk.f32.vlgmr.msra.gmra.mxu0 %vm2351_vm2, %v6112_v18  ;;  %v2777_v53 = vsel %vm2774_vm3, %v2767_v23, %v2769_v63  ;;  %2699 = vmatpush1.msra.mxu1 %v2659_v36  ;;  %vm3411_vm3 = vcmask 638480  }
 0x481   : > { %2818 = vmatpush1.msra.mxu0 %v2778_v50  ;;  %2700 = vmatprep.subr.mxu1 %v2651_v47 }
 0x482   : > { %2819 = vmatprep.subr.mxu0 %v2769_v63  ;;  %2511 = vmatprep.mubr.f32.mxu1 %v7383_v43  ;;  %v3007_v9 = vpop.permute.xlu0 %3006 }
 0x483   : > { %2701 = vmatpush1.msra.mxu1 %v2658_v29  ;;  %2820 = vmatpush1.msra.mxu0 %v2777_v53  ;;  %v2886_v11 = vpop.permute.xlu1 %2885 }
 0x484   : > { %6111 = vmatmul.mubr.msk.f32.gmra.mxu1 %vm2351_vm2, %v2302_v17  ;;  %2626 = vmatprep.mubr.f32.mxu0 %v7383_v43  ;;  %v2896_v25 = vsel %vm2893_vm4, %v2886_v11, %v2888_v49 }
 0x485   : > { %2702 = vmatprep.subr.mxu1 %v7661_v56  ;;  %2821 = vmatprep.subr.mxu0 %v7670_v58  ;;  %v6120_v56 = vld [vmem:[%s8310_s3 + $0x40] sm:$0xff] }
 0x486   : > { %6115 = vmatmul.mubr.msk.f32.gmra.mxu0 %vm2351_vm2, %v6113_v2  ;;  %2703 = vmatpush1.msra.mxu1 %v2657_v13  ;;  %v7796_v19 = vpop.permute.xlu0 %3125 }
 0x487   : > { %2822 = vmatpush1.msra.mxu0 %v2776_v15  ;;  %2704 = vmatprep.subr.mxu1 %v7690_v4  ;;  %v3005_v58 = vpop.permute.xlu1 %3004  ;;  %v3016_v4 = vsel %vm3012_vm5, %v7710_v30, %v7716_v21  ;;  %v2895_v30 = vsel %vm2893_vm4, %v7668_v57, %v7674_v16  ;;  %v3013_v57 = vsel %vm3012_vm5, %v7696_v7, %v7700_v10 }
 0x488   : > { %2823 = vmatprep.subr.mxu0 %v7694_v32  ;;  %2705 = vmatpush1.msra.mxu1 %v2656_v52  ;;  %v3015_v32 = vsel %vm3012_vm5, %v3005_v58, %v3007_v9  ;;  %v3254_v7 = vsel %vm3250_vm6, %v7718_v51, %v7722_v38  ;;  %v3133_v51 = vsel %vm3131_vm7, %v7676_v61, %v7680_v0 }
 0x489   : > { %2738 = vmatprep.mubr.f32.mxu1 %v7383_v43  ;;  %2824 = vmatpush1.msra.mxu0 %v2775_v55 }
 0x48a   : > { %6118 = vmatmul.mubr.msk.f32.vlgmr.msra.gmra.mxu1 %vm2351_vm2, %v6116_v33  ;;  %2857 = vmatprep.mubr.f32.mxu0 %v7383_v43  ;;  %v3245_v1 = vpop.permute.xlu0 %3244 }
 0x48b   : > { %2936 = vmatprep.subr.mxu1 %v7712_v31  ;;  %3055 = vmatprep.subr.mxu0 %v7716_v21  ;;  %v3124_v42 = vpop.permute.xlu1 %3123  ;;  %v3014_v31 = vsel %vm3012_vm5, %v7672_v59, %v7678_v62  ;;  %v6124_v21 = vld [vmem:[%s8310_s3 + $0x50] sm:$0xff]  ;;  %v6128_v59 = vld [vmem:[%s8310_s3 + $0x60] sm:$0xff] }
 0x48c   : > { %6122 = vmatmul.mubr.msk.f32.vlgmr.msra.gmra.mxu0 %vm2351_vm2, %v6120_v56  ;;  %2937 = vmatpush1.msra.mxu1 %v2897_v3 }
 0x48d   : > { %3056 = vmatpush1.msra.mxu0 %v3016_v4  ;;  %2938 = vmatprep.subr.mxu1 %v2888_v49 }
 0x48e   : > { %3057 = vmatprep.subr.mxu0 %v3007_v9  ;;  %2744 = vmatprep.mubr.f32.mxu1 %v7383_v43  ;;  %v3118_v28 = vpop.permute.xlu0 %3117 }
 0x48f   : > { %2939 = vmatpush1.msra.mxu1 %v2896_v25  ;;  %3058 = vmatpush1.msra.mxu0 %v3015_v32  ;;  %v3132_v44 = vsel %vm3131_vm7, %v7724_v60, %v3118_v28  ;;  %v6137_v60 = vld [vmem:[%s8310_s3 + $0x88] sm:$0xff] }
 0x490   : > { %6119 = vmatmul.mubr.msk.f32.gmra.mxu1 %vm2351_vm2, %v6117_v22  ;;  %2863 = vmatprep.mubr.f32.mxu0 %v7383_v43 }
 0x491   : > { %2940 = vmatprep.subr.mxu1 %v7674_v16  ;;  %3059 = vmatprep.subr.mxu0 %v7678_v62  ;;  %v3243_v16 = vpop.permute.xlu1 %3242 }
 0x492   : > { %6123 = vmatmul.mubr.msk.f32.gmra.mxu0 %vm2351_vm2, %v6121_v20  ;;  %2941 = vmatpush1.msra.mxu1 %v2895_v30  ;;  %v3241_v62 = vpop.permute.xlu0 %3240 }
 0x493   : > { %3060 = vmatpush1.msra.mxu0 %v3014_v31  ;;  %2942 = vmatprep.subr.mxu1 %v7698_v8  ;;  %v3253_v8 = vsel %vm3250_vm6, %v3243_v16, %v3245_v1 }
 0x494   : > { %3061 = vmatprep.subr.mxu0 %v7700_v10  ;;  %2943 = vmatpush1.msra.mxu1 %v2894_v37  ;;  %v3134_v10 = vsel %vm3131_vm7, %v3124_v42, %v7796_v19  ;;  %vm3456_vm7 = vcmask 244880  }
 0x495   : > { %2976 = vmatprep.mubr.f32.mxu1 %v7383_v43  ;;  %3062 = vmatpush1.msra.mxu0 %v3013_v57  ;;  %v3235_v41 = vpop.permute.xlu1 %3234 }
 0x496   : > { %6126 = vmatmul.mubr.msk.f32.vlgmr.msra.gmra.mxu1 %vm2351_vm2, %v6124_v21  ;;  %3095 = vmatprep.mubr.f32.mxu0 %v7383_v43  ;;  %v6125_v43 = vld [vmem:[%s8310_s3 + $0x58] sm:$0xff] }
 0x497   : > { %3174 = vmatprep.subr.mxu1 %v7720_v35  ;;  %3293 = vmatprep.subr.mxu0 %v7722_v38  ;;  %v3237_v35 = vpop.permute.xlu0 %3236  ;;  %v3252_v38 = vsel %vm3250_vm6, %v7731_v24, %v3241_v62  ;;  %v6133_v24 = vld [vmem:[%s8310_s3 + $0x78] sm:$0xff] }
 0x498   : > { %6130 = vmatmul.mubr.msk.f32.vlgmr.msra.gmra.mxu0 %vm2351_vm2, %v6128_v59  ;;  %3175 = vmatpush1.msra.mxu1 %v3135_v6  ;;  %v3251_v61 = vsel %vm3250_vm6, %v3235_v41, %v3237_v35  ;;  %vm3420_vm6 = vcmask 769680  }
 0x499   : > { %3294 = vmatpush1.msra.mxu0 %v3254_v7  ;;  %3176 = vmatprep.subr.mxu1 %v7796_v19 }
 0x49a   : > { %3295 = vmatprep.subr.mxu0 %v3245_v1  ;;  %2982 = vmatprep.mubr.f32.mxu1 %v7874_v39 }
 0x49b   : > { %3177 = vmatpush1.msra.mxu1 %v3134_v10  ;;  %3296 = vmatpush1.msra.mxu0 %v3253_v8 }
 0x49c   : > { %6127 = vmatmul.mubr.msk.f32.gmra.mxu1 %vm2351_vm2, %v6125_v43  ;;  %3178 = vmatprep.subr.mxu1 %v7680_v0  ;;  %v6136_v0 = vld [vmem:[%s8310_s3 + $0x80] sm:$0xff] }
 0x49d   : > { %3101 = vmatprep.mubr.f32.mxu0 %v7874_v39  ;;  %3179 = vmatpush1.msra.mxu1 %v3133_v51 }
 0x49e   : > { %6131 = vmatmul.mubr.msk.f32.gmra.mxu0 %vm2351_vm2, %v6129_v34  ;;  %3180 = vmatprep.subr.mxu1 %v3118_v28 }
 0x49f   : > { %3297 = vmatprep.subr.mxu0 %v3241_v62  ;;  %3181 = vmatpush1.msra.mxu1 %v3132_v44 }
 0x4a0   : > { %3214 = vmatprep.mubr.f32.mxu1 %v7874_v39  ;;  %3298 = vmatpush1.msra.mxu0 %v3252_v38 }
 0x4a1   : > { %6134 = vmatmul.mubr.msk.f32.vlgmr.msra.gmra.mxu1 %vm2351_vm2, %v6132_v40  ;;  %3299 = vmatprep.subr.mxu0 %v3237_v35 }
 0x4a2   : > { %3220 = vmatprep.mubr.f32.mxu1 %v7874_v39  ;;  %3300 = vmatpush1.msra.mxu0 %v3251_v61 }
 0x4a3   : > { %3333 = vmatprep.mubr.f32.mxu0 %v7874_v39  ;;  %v3355_v62 = vpop.permute.xlu0 %3354 }
 0x4a4   : > { %6138 = vmatmul.mubr.msk.f32.vlgmr.msra.gmra.mxu0 %vm2351_vm2, %v6136_v0 }
 0x4a5   : > { %6135 = vmatmul.mubr.msk.f32.gmra.mxu1 %vm2351_vm2, %v6133_v24  ;;  %3339 = vmatprep.mubr.f32.mxu0 %v7874_v39 }
 0x4a6   : > { %3592 = vmatprep.mubr.f32.mxu1 %v7874_v39 }
 0x4a8   : > { %6139 = vmatmul.mubr.msk.f32.gmra.mxu0 %vm2351_vm2, %v6137_v60  ;;  %vm3402_vm2 = vcmask 507280  }
 0x4a9   : > { %3756 = vmatprep.mubr.f32.mxu0 %v7874_v39 }
 0x535   : > { %v2424_v5 = vpop.f32.mrf.mxu1 }
 0x537   : > { %v2426_v45 = vpop.f32.mrf.mxu1 }
 0x539   : > { %v2430_v54 = vpop.f32.mrf.mxu1 }
 0x53b   : > { %v7914_v47 = vpop.f32.mrf.mxu1 }
 0x53e   : > { %v2507_v12 = vpop.f32.mrf.mxu1 }
 0x53f   : > { %v2508_v17 = vadd.f32 %v2507_v12, %v2424_v5 }
 0x540   : > { %v2622_v27 = vpop.f32.mrf.mxu0  ;;  %v2509_v46 = vpop.f32.mrf.mxu1 }
 0x541   : > { %v2633_v11 = vadd.f32 %v2622_v27, %v2508_v17  ;;  %v2510_v15 = vadd.f32 %v2509_v46, %v2426_v45 }
 0x542   : > { %v2624_v26 = vpop.f32.mrf.mxu0 }
 0x543   : > { %v2634_v56 = vadd.f32 %v2624_v26, %v2510_v15 }
 0x544   : > { %v2513_v63 = vpop.f32.mrf.mxu1 }
 0x545   : > { %v2514_v25 = vadd.f32 %v2513_v63, %v2430_v54  ;;  %v3360_v54 = vpop.permute.xlu1 %3359 }
 0x546   : > { %v2515_v48 = vpop.f32.mrf.mxu1  ;;  %v2628_v14 = vpop.f32.mrf.mxu0 }
 0x547   : > { %v2635_v31 = vadd.f32 %v2628_v14, %v2514_v25  ;;  %v2516_v60 = vadd.f32 %v2515_v48, %v7914_v47 }
 0x548   : > { %v7916_v18 = vpop.f32.mrf.mxu0 }
 0x549   : > { %v2636_v12 = vadd.f32 %v7916_v18, %v2516_v60 }
 0x54a   : > { %v2740_v23 = vpop.f32.mrf.mxu1 }
 0x54b   : > { %v2751_v33 = vadd.f32 %v2740_v23, %v2633_v11 }
 0x54c   : > { %v2742_v49 = vpop.f32.mrf.mxu1  ;;  %v2859_v36 = vpop.f32.mrf.mxu0 }
 0x54d   : > { %v2870_v58 = vadd.f32 %v2859_v36, %v2751_v33  ;;  %v2752_v3 = vadd.f32 %v2742_v49, %v2634_v56 }
 0x54e   : > { %v2861_v50 = vpop.f32.mrf.mxu0 }
 0x54f   : > { %v2871_v20 = vadd.f32 %v2861_v50, %v2752_v3 }
 0x550   : > { %v2746_v53 = vpop.f32.mrf.mxu1 }
 0x551   : > { %v2753_v59 = vadd.f32 %v2746_v53, %v2635_v31 }
 0x552   : > { %v2748_v29 = vpop.f32.mrf.mxu1  ;;  %v2865_v2 = vpop.f32.mrf.mxu0 }
 0x553   : > { %v2872_v10 = vadd.f32 %v2865_v2, %v2753_v59  ;;  %v2754_v26 = vadd.f32 %v2748_v29, %v2636_v12  ;;  %v7953_v2 = vld [vmem:[#allocation4 + $0x10] sm:$0xff] }
 0x554   : > { %v7918_v9 = vpop.f32.mrf.mxu0 }
 0x555   : > { %v2873_v47 = vadd.f32 %v7918_v9, %v2754_v26  ;;  %v4143_v9 = vld [vmem:[#allocation4 + $0x28] sm:$0xff] }
 0x556   : > { %v2978_v13 = vpop.f32.mrf.mxu1 }
 0x557   : > { %v2989_v4 = vadd.f32 %v2978_v13, %v2870_v58 }
 0x558   : > { %v2980_v19 = vpop.f32.mrf.mxu1  ;;  %v3097_v52 = vpop.f32.mrf.mxu0 }
 0x559   : > { %v3108_v42 = vadd.f32 %v3097_v52, %v2989_v4  ;;  %v2990_v21 = vadd.f32 %v2980_v19, %v2871_v20 }
 0x55a   : > { %v3099_v55 = vpop.f32.mrf.mxu0 }
 0x55b   : > { %v3109_v7 = vadd.f32 %v3099_v55, %v2990_v21 }
 0x55c   : > { %v2984_v1 = vpop.f32.mrf.mxu1 }
 0x55d   : > { %v2991_v35 = vadd.f32 %v2984_v1, %v2872_v10 }
 0x55e   : > { %v2986_v32 = vpop.f32.mrf.mxu1  ;;  %v3103_v22 = vpop.f32.mrf.mxu0 }
 0x55f   : > { %v3110_v44 = vadd.f32 %v3103_v22, %v2991_v35  ;;  %v2992_v48 = vadd.f32 %v2986_v32, %v2873_v47 }
 0x560   : > { %v3105_v30 = vpop.f32.mrf.mxu0 }
 0x561   : > { %v3216_v28 = vpop.f32.mrf.mxu1  ;;  %v3111_v23 = vadd.f32 %v3105_v30, %v2992_v48 }
 0x562   : > { %v3227_v37 = vadd.f32 %v3216_v28, %v3108_v42 }
 0x563   : > { %v3218_v6 = vpop.f32.mrf.mxu1 }
 0x564   : > { %v3335_v57 = vpop.f32.mrf.mxu0  ;;  %v3228_v34 = vadd.f32 %v3218_v6, %v3109_v7 }
 0x565   : > { %v3346_v16 = vadd.f32 %v3335_v57, %v3227_v37  ;;  %v3222_v41 = vpop.f32.mrf.mxu1 }
 0x566   : > { %v3337_v43 = vpop.f32.mrf.mxu0  ;;  %v3229_v24 = vadd.f32 %v3222_v41, %v3110_v44 }
 0x567   : > { %v3362_v8 = vadd.f32 %v3355_v62, %v3346_v16  ;;  %v3347_v40 = vadd.f32 %v3337_v43, %v3228_v34  ;;  %v3224_v18 = vpop.f32.mrf.mxu1 }
 0x568   : > { %v3341_v0 = vpop.f32.mrf.mxu0  ;;  %v3230_v36 = vadd.f32 %v3224_v18, %v3111_v23 }
 0x569   : > { %vm3366_vm8 = vcmp.ge.f32.partialorder %v3362_v8, 0.0  ;;  %v3370_v51 = vmul.f32 0.01, %v3362_v8  ;;  %v3363_v61 = vadd.f32 %v3355_v62, %v3347_v40  ;;  %v3348_v45 = vadd.f32 %v3341_v0, %v3229_v24 }
 0x56a   : > { %v3343_v49 = vpop.f32.mrf.mxu0 }
 0x56b   : > { %v3374_v38 = vsel %vm3366_vm8, %v3362_v8, %v3370_v51  ;;  %v3371_v5 = vmul.f32 0.01, %v3363_v61  ;;  %vm3367_vm9 = vcmp.ge.f32.partialorder %v3363_v61, 0.0  ;;  %v3364_v27 = vadd.f32 %v3360_v54, %v3348_v45  ;;  %v4346_v51 = vld [vmem:[%s8313_s6] sm:$0xff] }
 0x56c   : > { %3405 = vrot.lane.b32.xlu0 %v3374_v38, %s6636_s19  ;;  %3387 = vrot.lane.b32.xlu1 %v3374_v38, %s6635_s18  ;;  %v3349_v50 = vadd.f32 %v3343_v49, %v3230_v36  ;;  %vm3477_vm8 = vcmask 424960  }
 0x56d   : > { %v3375_v46 = vsel %vm3367_vm9, %v3363_v61, %v3371_v5  ;;  %v3372_v63 = vmul.f32 0.01, %v3364_v27  ;;  %vm3368_vm10 = vcmp.ge.f32.partialorder %v3364_v27, 0.0  ;;  %vm3429_vm9 = vcmask 900880  }
 0x56e   : > { %v3365_v53 = vadd.f32 %v3360_v54, %v3349_v50 }
 0x56f   : > { %v3376_v14 = vsel %vm3368_vm10, %v3364_v27, %v3372_v63  ;;  %vm3438_vm10 = vcmask 1032080  }
 0x570   : > { %3459 = vrot.lane.b32.xlu0 %v3374_v38, %s6639_s22  ;;  %3441 = vrot.lane.b32.xlu1 %v3374_v38, %s6638_s21  ;;  %v3373_v17 = vmul.f32 0.01, %v3365_v53  ;;  %vm3369_vm13 = vcmp.ge.f32.partialorder %v3365_v53, 0.0 }
 0x572   : > { %v3377_v29 = vsel %vm3369_vm13, %v3365_v53, %v3373_v17  ;;  %v6140_v53 = vld [vmem:[%s8312_s5 + $0x8] sm:$0xff]  ;;  %vm3867_vm13 = vcmask 908288  }
 0x574   : > { %3414 = vrot.lane.b32.xlu0 %v3374_v38, %s6652_s29  ;;  %3396 = vrot.lane.b32.xlu1 %v3374_v38, %s6650_s16 }
 0x578   : > { %3471 = vrot.lane.b32.xlu0 %v3375_v46, %s6660_s25  ;;  %3450 = vrot.lane.b32.xlu1 %v3374_v38, %s6654_s15 }
 0x57c   : > { %3484 = vrot.lane.b32.xlu0 %v3375_v46, %s6640_s23  ;;  %3469 = vrot.lane.b32.xlu1 %v3374_v38, %s6660_s25 }
 0x580   : > { %3443 = vrot.lane.b32.xlu0 %v3376_v14, %s6638_s21  ;;  %3423 = vrot.lane.b32.xlu1 %v3374_v38, %s6637_s20 }
 0x584   : > { %3452 = vrot.lane.b32.xlu0 %v3376_v14, %s6654_s15  ;;  %3389 = vrot.lane.b32.xlu1 %v3376_v14, %s6635_s18  ;;  %s6661_s18 = smov 56  }
 0x588   : > { %3407 = vrot.lane.b32.xlu0 %v3376_v14, %s6636_s19  ;;  %3398 = vrot.lane.b32.xlu1 %v3376_v14, %s6650_s16  ;;  %s6662_s16 = smov 95  }
 0x58c   : > { %3461 = vrot.lane.b32.xlu0 %v3376_v14, %s6639_s22  ;;  %3473 = vrot.lane.b32.xlu1 %v3376_v14, %s6660_s25 }
 0x590   : > { %3416 = vrot.lane.b32.xlu0 %v3376_v14, %s6652_s29  ;;  %3425 = vrot.lane.b32.xlu1 %v3376_v14, %s6637_s20 }
 0x594   : > { %3475 = vrot.lane.b32.xlu0 %v3377_v29, %s6660_s25  ;;  %3434 = vrot.lane.b32.xlu1 %v3376_v14, %s6653_s14 }
 0x598   : > { %3494 = vrot.lane.b32.xlu0 %v3377_v29, %s6661_s18  ;;  %3486 = vrot.lane.b32.xlu1 %v3377_v29, %s6640_s23 }
 0x59c   : > { %3492 = vrot.lane.b32.xlu0 %v3375_v46, %s6661_s18  ;;  %3432 = vrot.lane.b32.xlu1 %v3374_v38, %s6653_s14 }
 0x5a0   : > { %4154 = vrot.lane.b32.xlu1 %v7953_v2, %s6662_s16  ;;  %4160 = vrot.lane.b32.xlu0 %v4143_v9, %s6662_s16 }
 0x5a4   : > { %4259 = vrot.lane.b32.xlu1 %v4143_v9, %s6663_s28 }
 0x5de   : > { %v3406_v11 = vpop.permute.xlu0 %3405  ;;  %v3388_v13 = vpop.permute.xlu1 %3387 }
 0x5df   : > { %3394 = vst.msk [vmem:[#allocation4] sm:$0xff] %vm3393_vm14, %v3388_v13 }
 0x5e2   : > { %v3460_v15 = vpop.permute.xlu0 %3459  ;;  %v3442_v33 = vpop.permute.xlu1 %3441 }
 0x5e3   : > { %3448 = vst.msk [vmem:[#allocation4 + $0x8] sm:$0xff] %vm3447_vm15, %v3442_v33  ;;  %v6143_v33 = vld [vmem:[%s8312_s5 + $0x10] sm:$0xff] }
 0x5e6   : > { %v3415_v19 = vpop.permute.xlu0 %3414  ;;  %v3397_v52 = vpop.permute.xlu1 %3396 }
 0x5e7   : > { %3403 = vst.msk [vmem:[#allocation4] sm:$0xff] %vm3402_vm2, %v3397_v52  ;;  %v6145_v52 = vld [vmem:[%s8312_s5 + $0x18] sm:$0xff] }
 0x5e8   : > { %3412 = vst.msk [vmem:[#allocation4] sm:$0xff] %vm3411_vm3, %v3406_v11  ;;  %v3500_v11 = vld [vmem:[%s8312_s5] sm:$0xff] }
 0x5e9   : > { %3421 = vst.msk [vmem:[#allocation4] sm:$0xff] %vm3420_vm6, %v3415_v19 }
 0x5ea   : > { %v3472_v55 = vpop.permute.xlu0 %3471  ;;  %v3451_v56 = vpop.permute.xlu1 %3450 }
 0x5eb   : > { %3457 = vst.msk [vmem:[#allocation4 + $0x8] sm:$0xff] %vm3456_vm7, %v3451_v56 }
 0x5ec   : > { %3465 = vst.msk [vmem:[#allocation4 + $0x8] sm:$0xff] %vm3393_vm14, %v3460_v15 }
 0x5ee   : > { %v3485_v58 = vpop.permute.xlu0 %3484  ;;  %v3470_v1 = vpop.permute.xlu1 %3469 }
 0x5ef   : > { %v3478_v3 = vsel %vm3477_vm8, %v3470_v1, %v3472_v55 }
 0x5f0   : > { %3482 = vst.msk [vmem:[#allocation4 + $0x8] sm:$0xff] %vm3402_vm2, %v3478_v3  ;;  %v6147_v3 = vld [vmem:[%s8312_s5 + $0x20] sm:$0xff] }
 0x5f1   : > { %3490 = vst.msk [vmem:[#allocation4 + $0x8] sm:$0xff] %vm3411_vm3, %v3485_v58 }
 0x5f2   : > { %v3444_v4 = vpop.permute.xlu0 %3443  ;;  %v3424_v32 = vpop.permute.xlu1 %3423 }
 0x5f3   : > { %3449 = vst.msk [vmem:[#allocation4 + $0x20] sm:$0xff] %vm3447_vm15, %v3444_v4  ;;  %vm4162_vm15 = vcmask 777216  }
 0x5f4   : > { %3430 = vst.msk [vmem:[#allocation4] sm:$0xff] %vm3429_vm9, %v3424_v32 }
 0x5f6   : > { %v3453_v22 = vpop.permute.xlu0 %3452  ;;  %v3390_v25 = vpop.permute.xlu1 %3389 }
 0x5f7   : > { %3458 = vst.msk [vmem:[#allocation4 + $0x20] sm:$0xff] %vm3456_vm7, %v3453_v22  ;;  %vm4393_vm7 = vcmask 113664  }
 0x5f8   : > { %3395 = vst.msk [vmem:[#allocation4 + $0x18] sm:$0xff] %vm3393_vm14, %v3390_v25 }
 0x5fa   : > { %v3408_v20 = vpop.permute.xlu0 %3407  ;;  %v3399_v42 = vpop.permute.xlu1 %3398 }
 0x5fb   : > { %3404 = vst.msk [vmem:[#allocation4 + $0x18] sm:$0xff] %vm3402_vm2, %v3399_v42 }
 0x5fc   : > { %3413 = vst.msk [vmem:[#allocation4 + $0x18] sm:$0xff] %vm3411_vm3, %v3408_v20  ;;  %v6149_v20 = vld [vmem:[%s8312_s5 + $0x28] sm:$0xff] }
 0x5fe   : > { %v3462_v28 = vpop.permute.xlu0 %3461  ;;  %v3474_v30 = vpop.permute.xlu1 %3473 }
 0x5ff   : > { %3466 = vst.msk [vmem:[#allocation4 + $0x20] sm:$0xff] %vm3393_vm14, %v3462_v28  ;;  %vm4053_vm14 = vcmask 785408  }
 0x602   : > { %v3417_v31 = vpop.permute.xlu0 %3416  ;;  %v3426_v21 = vpop.permute.xlu1 %3425 }
 0x603   : > { %3422 = vst.msk [vmem:[#allocation4 + $0x18] sm:$0xff] %vm3420_vm6, %v3417_v31 }
 0x604   : > { %3431 = vst.msk [vmem:[#allocation4 + $0x18] sm:$0xff] %vm3429_vm9, %v3426_v21  ;;  %vm4403_vm9 = vcmask 408864  }
 0x606   : > { %v3476_v37 = vpop.permute.xlu0 %3475  ;;  %v3435_v57 = vpop.permute.xlu1 %3434 }
 0x607   : > { %v3479_v59 = vsel %vm3477_vm8, %v3474_v30, %v3476_v37  ;;  %3440 = vst.msk [vmem:[#allocation4 + $0x18] sm:$0xff] %vm3438_vm10, %v3435_v57  ;;  %v6151_v57 = vld [vmem:[%s8312_s5 + $0x30] sm:$0xff]  ;;  %vm4398_vm8 = vcmask 261264  }
 0x608   : > { %3483 = vst.msk [vmem:[#allocation4 + $0x20] sm:$0xff] %vm3402_vm2, %v3479_v59  ;;  %vm4261_vm2 = vcmask 769024  }
 0x60a   : > { %v3495_v16 = vpop.permute.xlu0 %3494  ;;  %v3487_v62 = vpop.permute.xlu1 %3486 }
 0x60b   : > { %3491 = vst.msk [vmem:[#allocation4 + $0x20] sm:$0xff] %vm3411_vm3, %v3487_v62 }
 0x60c   : > { %3499 = vst.msk [vmem:[#allocation4 + $0x20] sm:$0xff] %vm3420_vm6, %v3495_v16 }
 0x60e   : > { %v3493_v6 = vpop.permute.xlu0 %3492  ;;  %v3433_v7 = vpop.permute.xlu1 %3432  ;;  %v8007_v10 = vld [vmem:[#allocation4 + $0x18] sm:$0xff] }
 0x60f   : > { %3498 = vst.msk [vmem:[#allocation4 + $0x8] sm:$0xff] %vm3420_vm6, %v3493_v6  ;;  %vm4362_vm6 = vcmask 703488  }
 0x610   : > { %3439 = vst.msk [vmem:[#allocation4] sm:$0xff] %vm3438_vm10, %v3433_v7  ;;  %vm4409_vm10 = vcmask 556464  }
 0x611   : > { %4363 = vst.msk [vmem:[#allocation5 + $0x10] sm:$0xff] %vm4362_vm6, %v7874_v39  ;;  %vm4424_vm6 = vcmask 999264  }
 0x612   : > { %v8042_v35 = vpop.permute.xlu1 %4154  ;;  %v8044_v38 = vpop.permute.xlu0 %4160 }
 0x613   : > { %v3504_v34 = vld [vmem:[#allocation4 + $0x20] sm:$0xff] }
 0x616   : > { %v7983_v8 = vld [vmem:[#allocation4 + $0x8] sm:$0xff]  ;;  %v8046_v40 = vpop.permute.xlu1 %4259 }
 0x617   : > { %v7985_v43 = vld [vmem:[#allocation4] sm:$0xff]  ;;  %3513 = vrot.lane.b32.xlu0 %v7983_v8, %s6641_s24 }
 0x618   : > { %3511 = vrot.lane.b32.xlu1 %v7985_v43, %s6641_s24 }
 0x61b   : > { %3677 = vrot.lane.b32.xlu0 %v7983_v8, %s6642_s27 }
 0x61c   : > { %3675 = vrot.lane.b32.xlu1 %v7985_v43, %s6642_s27 }
 0x61f   : > { %3769 = vrot.lane.b32.xlu0 %v7983_v8, %s8323_s26 }
 0x620   : > { %3767 = vrot.lane.b32.xlu1 %v7985_v43, %s8323_s26 }
 0x623   : > { %3861 = vrot.lane.b32.xlu0 %v7983_v8, %s6664_s17 }
 0x624   : > { %3859 = vrot.lane.b32.xlu1 %v7985_v43, %s6664_s17 }
 0x627   : > { %3954 = vrot.lane.b32.xlu0 %v7983_v8, %s6665_s13 }
 0x628   : > { %3952 = vrot.lane.b32.xlu1 %v7985_v43, %s6665_s13 }
 0x62b   : > { %4047 = vrot.lane.b32.xlu0 %v7983_v8, %s6666_s11 }
 0x62c   : > { %4045 = vrot.lane.b32.xlu1 %v7985_v43, %s6666_s11 }
 0x62f   : > { %4152 = vrot.lane.b32.xlu0 %v7983_v8, %s6662_s16 }
 0x630   : > { %3515 = vrot.lane.b32.xlu1 %v8007_v10, %s6641_s24 }
 0x633   : > { %4150 = vrot.lane.b32.xlu0 %v7985_v43, %s6662_s16 }
 0x634   : > { %3679 = vrot.lane.b32.xlu1 %v8007_v10, %s6642_s27 }
 0x637   : > { %4251 = vrot.lane.b32.xlu0 %v7983_v8, %s6663_s28 }
 0x638   : > { %3771 = vrot.lane.b32.xlu1 %v8007_v10, %s8323_s26 }
 0x63b   : > { %3517 = vrot.lane.b32.xlu0 %v3504_v34, %s6641_s24 }
 0x63c   : > { %3863 = vrot.lane.b32.xlu1 %v8007_v10, %s6664_s17 }
 0x63f   : > { %3681 = vrot.lane.b32.xlu0 %v3504_v34, %s6642_s27 }
 0x640   : > { %3956 = vrot.lane.b32.xlu1 %v8007_v10, %s6665_s13 }
 0x643   : > { %3773 = vrot.lane.b32.xlu0 %v3504_v34, %s8323_s26 }
 0x644   : > { %4049 = vrot.lane.b32.xlu1 %v8007_v10, %s6666_s11 }
 0x647   : > { %3865 = vrot.lane.b32.xlu0 %v3504_v34, %s6664_s17 }
 0x648   : > { %4158 = vrot.lane.b32.xlu1 %v3504_v34, %s6662_s16 }
 0x64b   : > { %3958 = vrot.lane.b32.xlu0 %v3504_v34, %s6665_s13 }
 0x64c   : > { %4156 = vrot.lane.b32.xlu1 %v8007_v10, %s6662_s16 }
 0x64f   : > { %4051 = vrot.lane.b32.xlu0 %v3504_v34, %s6666_s11 }
 0x650   : > { %4255 = vrot.lane.b32.xlu1 %v8007_v10, %s6663_s28 }
 0x653   : > { %4257 = vrot.lane.b32.xlu0 %v3504_v34, %s6663_s28 }
 0x654   : > { %4253 = vrot.lane.b32.xlu1 %v7953_v2, %s6663_s28 }
 0x657   : > { %4249 = vrot.lane.b32.xlu0 %v7985_v43, %s6663_s28  ;;  %s6186_s28 = sshll.u32 %s8333_s10, 3  ;;  %s8325_s10 = smov 112  }
 0x658   : > { %4349 = vperm.xlu1 %6615, %v4346_v51   ;;  %s8266_s12 = scalar_lea.vmem %s8316_s9, %s6186_s28 }
 0x689   : > { %v3514_v41 = vpop.permute.xlu0 %3513 }
 0x68a   : > { %v3512_v44 = vpop.permute.xlu1 %3511 }
 0x68b   : > { %v3519_v50 = vsel %vm2338_vm0, %v3512_v44, %v3514_v41 }
 0x68d   : > { %v3678_v61 = vpop.permute.xlu0 %3677 }
 0x68e   : > { %v3676_v0 = vpop.permute.xlu1 %3675 }
 0x68f   : > { %v3683_v9 = vsel %vm2537_vm1, %v3676_v0, %v3678_v61 }
 0x691   : > { %v3770_v24 = vpop.permute.xlu0 %3769 }
 0x692   : > { %v3768_v60 = vpop.permute.xlu1 %3767 }
 0x693   : > { %v3775_v55 = vsel %vm2893_vm4, %v3768_v60, %v3770_v24 }
 0x695   : > { %v3862_v5 = vpop.permute.xlu0 %3861 }
 0x696   : > { %v3860_v45 = vpop.permute.xlu1 %3859 }
 0x697   : > { %v3868_v4 = vsel %vm3867_vm13, %v3860_v45, %v3862_v5 }
 0x699   : > { %v8048_v54 = vpop.permute.xlu0 %3954 }
 0x69a   : > { %v8050_v12 = vpop.permute.xlu1 %3952 }
 0x69d   : > { %v8052_v27 = vpop.permute.xlu0 %4047 }
 0x69e   : > { %v8054_v46 = vpop.permute.xlu1 %4045 }
 0x69f   : > { %v4054_v59 = vsel %vm4053_vm14, %v8054_v46, %v8052_v27 }
 0x6a1   : > { %v8056_v26 = vpop.permute.xlu0 %4152 }
 0x6a2   : > { %v3516_v63 = vpop.permute.xlu1 %3515  ;;  %v4164_v16 = vsel %vm4162_vm15, %v8056_v26, %v8042_v35  ;;  %v6155_v35 = vld [vmem:[%s8312_s5 + $0x40] sm:$0xff] }
 0x6a5   : > { %v8058_v47 = vpop.permute.xlu0 %4150 }
 0x6a6   : > { %v3680_v48 = vpop.permute.xlu1 %3679  ;;  %v4163_v62 = vsel %vm4162_vm15, %v8058_v47, %v8056_v26 }
 0x6a9   : > { %v8060_v14 = vpop.permute.xlu0 %4251 }
 0x6aa   : > { %v3772_v18 = vpop.permute.xlu1 %3771 }
 0x6ad   : > { %v3518_v23 = vpop.permute.xlu0 %3517 }
 0x6ae   : > { %v3864_v49 = vpop.permute.xlu1 %3863  ;;  %v3520_v36 = vsel %vm2338_vm0, %v3516_v63, %v3518_v23  ;;  %3556 = vmatprep.subr.mxu1 %v3518_v23 }
 0x6af   : > { %3557 = vmatpush1.msra.mxu1 %v3520_v36 }
 0x6b0   : > { %3558 = vmatprep.subr.mxu1 %v3514_v41 }
 0x6b1   : > { %v3682_v17 = vpop.permute.xlu0 %3681  ;;  %3559 = vmatpush1.msra.mxu1 %v3519_v50 }
 0x6b2   : > { %v3957_v29 = vpop.permute.xlu1 %3956  ;;  %v3684_v2 = vsel %vm2537_vm1, %v3680_v48, %v3682_v17  ;;  %3630 = vmatprep.subr.mxu1 %v3504_v34  ;;  %3720 = vmatprep.subr.mxu0 %v3682_v17 }
 0x6b3   : > { %6141 = vmatmul.mubr.msk.f32.vlgmr.msra.gmra.mxu1 %vm3380_vm11, %v6140_v53  ;;  %3721 = vmatpush1.msra.mxu0 %v3684_v2 }
 0x6b4   : > { %3631 = vmatpush1.msra.mxu1 %v8007_v10  ;;  %3722 = vmatprep.subr.mxu0 %v3678_v61 }
 0x6b5   : > { %3632 = vmatprep.subr.mxu1 %v7983_v8  ;;  %v3774_v13 = vpop.permute.xlu0 %3773  ;;  %3723 = vmatpush1.msra.mxu0 %v3683_v9  ;;  %v6153_v8 = vld [vmem:[%s8312_s5 + $0x38] sm:$0xff] }
 0x6b6   : > { %v4050_v15 = vpop.permute.xlu1 %4049  ;;  %v3776_v19 = vsel %vm2893_vm4, %v3772_v18, %v3774_v13  ;;  %3633 = vmatpush1.msra.mxu1 %v7985_v43  ;;  %3666 = vmatprep.mubr.f32.mxu1 %v7874_v39  ;;  %vm3960_vm4 = vcmask 900096  }
 0x6b7   : > { %3812 = vmatprep.subr.mxu1 %v3774_v13  ;;  %6142 = vmatmul.mubr.msk.f32.vlgmr.msra.gmra.mxu1 %vm3380_vm11, %v3500_v11  ;;  %v3961_v42 = vsel %vm3960_vm4, %v8050_v12, %v8048_v54 }
 0x6b8   : > { %3813 = vmatpush1.msra.mxu1 %v3776_v19  ;;  %6144 = vmatmul.mubr.msk.f32.vlgmr.msra.gmra.mxu0 %vm3380_vm11, %v6143_v33 }
 0x6b9   : > { %3814 = vmatprep.subr.mxu1 %v3770_v24  ;;  %v3866_v56 = vpop.permute.xlu0 %3865  ;;  %3848 = vmatprep.mubr.f32.mxu1 %v7874_v39 }
 0x6ba   : > { %v4159_v58 = vpop.permute.xlu1 %4158  ;;  %v3869_v1 = vsel %vm3867_vm13, %v3864_v49, %v3866_v56  ;;  %3815 = vmatpush1.msra.mxu1 %v3775_v55  ;;  %3905 = vmatprep.subr.mxu0 %v3866_v56  ;;  %vm4368_vm13 = vcmask 425264  }
 0x6bb   : > { %3906 = vmatpush1.msra.mxu0 %v3869_v1  ;;  %6146 = vmatmul.mubr.msk.f32.vlgmr.msra.gmra.mxu1 %vm3380_vm11, %v6145_v52  ;;  %v4166_v21 = vsel %vm4162_vm15, %v4159_v58, %v8044_v38 }
 0x6bc   : > { %3907 = vmatprep.subr.mxu0 %v3862_v5  ;;  %3941 = vmatprep.mubr.f32.mxu0 %v7874_v39 }
 0x6bd   : > { %v3959_v32 = vpop.permute.xlu0 %3958  ;;  %3908 = vmatpush1.msra.mxu0 %v3868_v4  ;;  %4034 = vmatprep.mubr.f32.mxu1 %v7874_v39 }
 0x6be   : > { %v4157_v22 = vpop.permute.xlu1 %4156  ;;  %v3962_v25 = vsel %vm3960_vm4, %v3957_v29, %v3959_v32  ;;  %6148 = vmatmul.mubr.msk.f32.vlgmr.msra.gmra.mxu0 %vm3380_vm11, %v6147_v3  ;;  %3998 = vmatprep.subr.mxu1 %v3959_v32 }
 0x6bf   : > { %3999 = vmatpush1.msra.mxu1 %v3962_v25  ;;  %4127 = vmatprep.mubr.f32.mxu0 %v7874_v39  ;;  %v4165_v37 = vsel %vm4162_vm15, %v4157_v22, %v4159_v58  ;;  %vm4373_vm15 = vcmask 572864  }
 0x6c0   : > { %4000 = vmatprep.subr.mxu1 %v8048_v54 }
 0x6c1   : > { %v4052_v28 = vpop.permute.xlu0 %4051  ;;  %4001 = vmatpush1.msra.mxu1 %v3961_v42 }
 0x6c2   : > { %v4256_v30 = vpop.permute.xlu1 %4255  ;;  %v4055_v31 = vsel %vm4053_vm14, %v4050_v15, %v4052_v28  ;;  %6150 = vmatmul.mubr.msk.f32.vlgmr.msra.gmra.mxu1 %vm3380_vm11, %v6149_v20  ;;  %4091 = vmatprep.subr.mxu0 %v4052_v28  ;;  %vm4414_vm14 = vcmask 704064  }
 0x6c3   : > { %4202 = vmatprep.subr.mxu1 %v4166_v21  ;;  %4092 = vmatpush1.msra.mxu0 %v4055_v31 }
 0x6c4   : > { %4203 = vmatpush1.msra.mxu1 %v4165_v37  ;;  %4093 = vmatprep.subr.mxu0 %v8052_v27 }
 0x6c5   : > { %4204 = vmatprep.subr.mxu1 %v4164_v16  ;;  %v4258_v6 = vpop.permute.xlu0 %4257  ;;  %4094 = vmatpush1.msra.mxu0 %v4054_v59 }
 0x6c6   : > { %v4254_v7 = vpop.permute.xlu1 %4253  ;;  %v4264_v43 = vsel %vm4261_vm2, %v4256_v30, %v4258_v6  ;;  %4205 = vmatpush1.msra.mxu1 %v4163_v62  ;;  %6152 = vmatmul.mubr.msk.f32.vlgmr.msra.gmra.mxu0 %vm3380_vm11, %v6151_v57  ;;  %v4265_v10 = vsel %vm4261_vm2, %v4258_v6, %v8046_v40 }
 0x6c7   : > { %4238 = vmatprep.mubr.f32.mxu1 %v7874_v39  ;;  %4301 = vmatprep.subr.mxu0 %v4265_v10  ;;  %v4263_v34 = vsel %vm4261_vm2, %v8060_v14, %v4254_v7  ;;  %v5872_v10 = vld [vmem:[%s8315_s8] sm:$0x7] }
 0x6c8   : > { %6154 = vmatmul.mubr.msk.f32.vlgmr.msra.gmra.mxu1 %vm3380_vm11, %v6153_v8  ;;  %4302 = vmatpush1.msra.mxu0 %v4264_v43 }
 0x6c9   : > { %v4250_v51 = vpop.permute.xlu0 %4249  ;;  %4303 = vmatprep.subr.mxu0 %v4263_v34  ;;  %4337 = vmatprep.mubr.f32.mxu0 %v7874_v39  ;;  %v6157_v34 = vld [vmem:[%s8314_s7 + $0x4] sm:$0x7] }
 0x6ca   : > { %v4262_v38 = vsel %vm4261_vm2, %v4250_v51, %v8060_v14  ;;  %4526 = vmatprep.mubr.f32.mxu1 %v7874_v39  ;;  %vm4419_vm2 = vcmask 851664  }
 0x6cb   : > { %4304 = vmatpush1.msra.mxu0 %v4262_v38  ;;  %v4438_v38 = vld [vmem:[%s8314_s7] sm:$0x7] }
 0x6cc   : > { %6156 = vmatmul.mubr.msk.f32.vlgmr.msra.gmra.mxu0 %vm3380_vm11, %v6155_v35  ;;  %6511 = vmatprep.subr.mxu0 %v7874_v39 }
 0x6d3   : > { %v4350_v19 = vpop.permute.xlu1 %4349 }
 0x773   : > { %v3594_v40 = vpop.f32.mrf.mxu1 }
 0x775   : > { %v3596_v41 = vpop.f32.mrf.mxu1 }
 0x777   : > { %v3668_v44 = vpop.f32.mrf.mxu1 }
 0x778   : > { %v3669_v61 = vadd.f32 %v3668_v44, %v3594_v40  ;;  %v3758_v0 = vpop.f32.mrf.mxu0  ;;  %v6162_v44 = vld [vmem:[%s8314_s7 + $0x8] sm:$0x7] }
 0x779   : > { %v3670_v24 = vpop.f32.mrf.mxu1 }
 0x77a   : > { %v3671_v60 = vadd.f32 %v3670_v24, %v3596_v41  ;;  %v3763_v5 = vadd.f32 %v3758_v0, %v3669_v61  ;;  %v3760_v45 = vpop.f32.mrf.mxu0  ;;  %v6165_v24 = vld [vmem:[%s8314_s7 + $0xc] sm:$0x7] }
 0x77b   : > { %v3850_v54 = vpop.f32.mrf.mxu1 }
 0x77c   : > { %v3764_v12 = vadd.f32 %v3760_v45, %v3671_v60  ;;  %v3855_v27 = vadd.f32 %v3850_v54, %v3763_v5 }
 0x77d   : > { %v3852_v46 = vpop.f32.mrf.mxu1 }
 0x77e   : > { %v3943_v26 = vpop.f32.mrf.mxu0  ;;  %v3856_v63 = vadd.f32 %v3852_v46, %v3764_v12  ;;  %v6168_v46 = vld [vmem:[%s8314_s7 + $0x10] sm:$0x7] }
 0x77f   : > { %v3948_v47 = vadd.f32 %v3943_v26, %v3855_v27 }
 0x780   : > { %v3945_v48 = vpop.f32.mrf.mxu0 }
 0x781   : > { %v3949_v23 = vadd.f32 %v3945_v48, %v3856_v63 }
 0x782   : > { %v4036_v14 = vpop.f32.mrf.mxu1 }
 0x783   : > { %v4041_v49 = vadd.f32 %v4036_v14, %v3948_v47  ;;  %v6171_v14 = vld [vmem:[%s8314_s7 + $0x14] sm:$0x7] }
 0x784   : > { %v4038_v18 = vpop.f32.mrf.mxu1 }
 0x785   : > { %v4042_v50 = vadd.f32 %v4038_v18, %v3949_v23 }
 0x786   : > { %v4129_v36 = vpop.f32.mrf.mxu0 }
 0x787   : > { %v4134_v53 = vadd.f32 %v4129_v36, %v4041_v49 }
 0x788   : > { %v4131_v17 = vpop.f32.mrf.mxu0  ;;  %v4240_v29 = vpop.f32.mrf.mxu1 }
 0x789   : > { %v4135_v2 = vadd.f32 %v4131_v17, %v4042_v50  ;;  %v4245_v11 = vadd.f32 %v4240_v29, %v4134_v53 }
 0x78a   : > { %v4242_v9 = vpop.f32.mrf.mxu1 }
 0x78b   : > { %v4246_v15 = vadd.f32 %v4242_v9, %v4135_v2  ;;  %v6174_v2 = vld [vmem:[%s8314_s7 + $0x18] sm:$0x7] }
 0x78c   : > { %v4339_v13 = vpop.f32.mrf.mxu0 }
 0x78d   : > { %v4344_v33 = vadd.f32 %v4339_v13, %v4245_v11 }
 0x78e   : > { %v4341_v52 = vpop.f32.mrf.mxu0 }
 0x78f   : > { %v4352_v55 = vadd.f32 %v4350_v19, %v4344_v33  ;;  %v4345_v56 = vadd.f32 %v4341_v52, %v4246_v15 }
 0x791   : > { %vm4354_vm11 = vcmp.ge.f32.partialorder %v4352_v55, 0.0  ;;  %v4356_v58 = vmul.f32 0.01, %v4352_v55  ;;  %v4353_v3 = vadd.f32 %v4350_v19, %v4345_v56  ;;  %v6177_v19 = vld [vmem:[%s8314_s7 + $0x1c] sm:$0x7] }
 0x793   : > { %v4358_v1 = vsel %vm4354_vm11, %v4352_v55, %v4356_v58  ;;  %v4357_v4 = vmul.f32 0.01, %v4353_v3  ;;  %vm4355_vm3 = vcmp.ge.f32.partialorder %v4353_v3, 0.0  ;;  %vm4378_vm11 = vcmask 720464  }
 0x794   : > { %4395 = vrot.lane.b32.xlu1 %v4358_v1, %s6639_s22  ;;  %4390 = vrot.lane.b32.xlu0 %v4358_v1, %s6654_s15  ;;  %s6667_s22 = smov 58   ;;  %s6668_s15 = smov 60  }
 0x795   : > { %v4359_v32 = vsel %vm4355_vm3, %v4353_v3, %v4357_v4  ;;  %vm4383_vm3 = vcmask 868064  }
 0x798   : > { %4380 = vrot.lane.b32.xlu1 %v4358_v1, %s6653_s14  ;;  %4400 = vrot.lane.b32.xlu0 %v4358_v1, %s6660_s25  ;;  %s6669_s14 = smov 62   ;;  %s6670_s25 = smov 64  }
 0x79c   : > { %4406 = vrot.lane.b32.xlu1 %v4359_v32, %s6640_s23  ;;  %4365 = vrot.lane.b32.xlu0 %v4358_v1, %s6636_s19  ;;  %s6672_s19 = smov 109   ;;  %s6675_s23 = smov 91  }
 0x7a0   : > { %4411 = vrot.lane.b32.xlu1 %v4359_v32, %s6661_s18  ;;  %4370 = vrot.lane.b32.xlu0 %v4358_v1, %s6652_s29  ;;  %s8331_s29 = smov 98  }
 0x7a4   : > { %4416 = vrot.lane.b32.xlu1 %v4359_v32, %s6667_s22  ;;  %4375 = vrot.lane.b32.xlu0 %v4358_v1, %s6637_s20  ;;  %s6673_s20 = smov 108   ;;  %s6677_s22 = smov 120  }
 0x7a8   : > { %4421 = vrot.lane.b32.xlu1 %v4359_v32, %s6668_s15  ;;  %4426 = vrot.lane.b32.xlu0 %v4359_v32, %s6669_s14  ;;  %s6678_s15 = smov 124   ;;  %s6679_s14 = smov 122  }
 0x7ac   : > { %4385 = vrot.lane.b32.xlu1 %v4358_v1, %s6638_s21  ;;  %4433 = vrot.lane.b32.xlu0 %v4359_v32, %s6670_s25  ;;  %s6674_s21 = smov 92   ;;  %v6180_v32 = vld [vmem:[%s8314_s7 + $0x20] sm:$0x7]  ;;  %s6680_s25 = smov 118  }
 0x806   : > { %v4396_v22 = vpop.permute.xlu1 %4395  ;;  %v4391_v25 = vpop.permute.xlu0 %4390 }
 0x807   : > { %4394 = vst.msk [vmem:[#allocation5 + $0x8] sm:$0xff] %vm4393_vm7, %v4391_v25  ;;  %vm4431_vm7 = vcmask 97280  }
 0x808   : > { %4399 = vst.msk [vmem:[#allocation5 + $0x8] sm:$0xff] %vm4398_vm8, %v4396_v22  ;;  %vm4429_vm8 = vcmask 1048560  }
 0x80a   : > { %v4381_v20 = vpop.permute.xlu1 %4380  ;;  %v4401_v42 = vpop.permute.xlu0 %4400 }
 0x80b   : > { %4404 = vst.msk [vmem:[#allocation5 + $0x8] sm:$0xff] %vm4403_vm9, %v4401_v42  ;;  %vm6671_vm9 = vmmov 0  }
 0x80c   : > { %6513 = vmatprep.mubr.msk.f32.mxu0 %vm6671_vm9, %v7874_v39 }
 0x80e   : > { %v4407_v28 = vpop.permute.xlu1 %4406  ;;  %v4366_v30 = vpop.permute.xlu0 %4365 }
 0x80f   : > { %4410 = vst.msk [vmem:[#allocation5 + $0x8] sm:$0xff] %vm4409_vm10, %v4407_v28  ;;  %vm4388_vm10 = vcmask 1015664  }
 0x810   : > { %4369 = vst.msk [vmem:[#allocation5] sm:$0xff] %vm4368_vm13, %v4366_v30  ;;  %vm4436_vm13 = vcmask 244864  }
 0x812   : > { %v4412_v31 = vpop.permute.xlu1 %4411  ;;  %v4371_v21 = vpop.permute.xlu0 %4370 }
 0x813   : > { %4415 = vst.msk [vmem:[#allocation5 + $0x8] sm:$0xff] %vm4414_vm14, %v4412_v31  ;;  %vm4458_vm14 = vcmask 64512  }
 0x814   : > { %4374 = vst.msk [vmem:[#allocation5] sm:$0xff] %vm4373_vm15, %v4371_v21  ;;  %vm5558_vm15 = vcmask 744448  }
 0x816   : > { %v4417_v37 = vpop.permute.xlu1 %4416  ;;  %v4376_v57 = vpop.permute.xlu0 %4375 }
 0x817   : > { %4420 = vst.msk [vmem:[#allocation5 + $0x8] sm:$0xff] %vm4419_vm2, %v4417_v37  ;;  %vm5719_vm2 = vcmask 736256  }
 0x818   : > { %4379 = vst.msk [vmem:[#allocation5] sm:$0xff] %vm4378_vm11, %v4376_v57 }
 0x819   : > { %4384 = vst.msk [vmem:[#allocation5] sm:$0xff] %vm4383_vm3, %v4381_v20 }
 0x81a   : > { %v4422_v59 = vpop.permute.xlu1 %4421  ;;  %v4427_v16 = vpop.permute.xlu0 %4426 }
 0x81b   : > { %4425 = vst.msk [vmem:[#allocation5 + $0x8] sm:$0xff] %vm4424_vm6, %v4422_v59 }
 0x81c   : > { %4432 = vst.msk [vmem:[#allocation5 + $0x10] sm:$0xff] %vm4431_vm7, %v4427_v16  ;;  %vm5896_vm7 = vcmask 124928  }
 0x81d   : > { %4430 = vst.msk [vmem:[#allocation5 + $0x8] sm:$0xff] %vm4429_vm8, %v4427_v16  ;;  %vm5902_vm8 = vcmask 256128  }
 0x81e   : > { %v4386_v62 = vpop.permute.xlu1 %4385  ;;  %v4434_v6 = vpop.permute.xlu0 %4433 }
 0x81f   : > { %4389 = vst.msk [vmem:[#allocation5] sm:$0xff] %vm4388_vm10, %v4386_v62  ;;  %vm5912_vm10 = vcmask 518528  }
 0x820   : > { %4437 = vst.msk [vmem:[#allocation5 + $0x10] sm:$0xff] %vm4436_vm13, %v4434_v6  ;;  %vm5917_vm13 = vcmask 649728  }
 0x824   : > { %v4440_v43 = vld [vmem:[#allocation5 + $0x8] sm:$0xff] }
 0x826   : > { %v8155_v8 = vld [vmem:[#allocation5] sm:$0xff] }
 0x827   : > { %v4441_v7 = vld [vmem:[#allocation5 + $0x10] sm:$0xff] }
 0x828   : > { %4753 = vrot.lane.b32.xlu0 %v4441_v7, %s6642_s27  ;;  %4451 = vrot.lane.b32.xlu1 %v4441_v7, %s6641_s24 }
 0x82c   : > { %4447 = vrot.lane.b32.xlu0 %v8155_v8, %s6641_s24  ;;  %4913 = vrot.lane.b32.xlu1 %v4441_v7, %s6665_s13 }
 0x830   : > { %4909 = vrot.lane.b32.xlu0 %v8155_v8, %s6665_s13  ;;  %4749 = vrot.lane.b32.xlu1 %v8155_v8, %s6642_s27 }
 0x834   : > { %4449 = vrot.lane.b32.xlu0 %v4440_v43, %s6641_s24  ;;  %5069 = vrot.lane.b32.xlu1 %v8155_v8, %s6672_s19  ;;  %s6676_s24 = smov 90  }
 0x838   : > { %5073 = vrot.lane.b32.xlu0 %v4441_v7, %s6672_s19  ;;  %4751 = vrot.lane.b32.xlu1 %v4440_v43, %s6642_s27 }
 0x83c   : > { %5230 = vrot.lane.b32.xlu0 %v8155_v8, %s6673_s20  ;;  %5234 = vrot.lane.b32.xlu1 %v4441_v7, %s6673_s20 }
 0x840   : > { %4911 = vrot.lane.b32.xlu0 %v4440_v43, %s6665_s13  ;;  %5071 = vrot.lane.b32.xlu1 %v4440_v43, %s6672_s19  ;;  %s6681_s19 = smov 106  }
 0x844   : > { %5395 = vrot.lane.b32.xlu0 %v4441_v7, %s6674_s21  ;;  %5391 = vrot.lane.b32.xlu1 %v8155_v8, %s6674_s21 }
 0x848   : > { %5232 = vrot.lane.b32.xlu0 %v4440_v43, %s6673_s20  ;;  %5393 = vrot.lane.b32.xlu1 %v4440_v43, %s6674_s21  ;;  %s8327_s21 = smov 104  }
 0x84c   : > { %5552 = vrot.lane.b32.xlu0 %v8155_v8, %s6675_s23  ;;  %5556 = vrot.lane.b32.xlu1 %v4441_v7, %s6675_s23 }
 0x850   : > { %5554 = vrot.lane.b32.xlu0 %v4440_v43, %s6675_s23  ;;  %5715 = vrot.lane.b32.xlu1 %v4440_v43, %s6676_s24  ;;  %s8328_s23 = smov 114  }
 0x854   : > { %5717 = vrot.lane.b32.xlu0 %v4441_v7, %s6676_s24  ;;  %5713 = vrot.lane.b32.xlu1 %v8155_v8, %s6676_s24  ;;  %s8329_s24 = smov 102  }
 0x858   : > { %5875 = vperm.xlu0 %6614, %v5872_v10  }
 0x89a   : > { %v4754_v51 = vpop.permute.xlu0 %4753  ;;  %v4452_v35 = vpop.permute.xlu1 %4451 }
 0x89b   : > { %6512 = vmatpush3.msra.mxu0 %v4452_v35 }
 0x89c   : > { %6514 = vmatmul.mubr.msk.f32.vlgmr.msra.gmra.mxu0 %vm4458_vm14, %v6157_v34  ;;  %6516 = vmatprep.subr.mxu0 %v7874_v39 }
 0x89d   : > { %6517 = vmatpush3.msra.mxu0 %v4441_v7  ;;  %6518 = vmatprep.mubr.msk.f32.mxu0 %vm6671_vm9, %v7874_v39 }
 0x89e   : > { %v4448_v40 = vpop.permute.xlu0 %4447  ;;  %v4914_v41 = vpop.permute.xlu1 %4913  ;;  %6521 = vmatprep.subr.mxu0 %v7874_v39 }
 0x8a0   : > { %6519 = vmatmul.mubr.msk.f32.vlgmr.msra.gmra.mxu0 %vm4458_vm14, %v4438_v38 }
 0x8a1   : > { %6522 = vmatpush3.msra.mxu0 %v4754_v51  ;;  %6523 = vmatprep.mubr.msk.f32.mxu0 %vm6671_vm9, %v7874_v39 }
 0x8a2   : > { %v4910_v61 = vpop.permute.xlu0 %4909  ;;  %v4750_v0 = vpop.permute.xlu1 %4749  ;;  %6526 = vmatprep.subr.mxu0 %v7874_v39 }
 0x8a4   : > { %6524 = vmatmul.mubr.msk.f32.vlgmr.msra.gmra.mxu0 %vm4458_vm14, %v6162_v44 }
 0x8a5   : > { %6527 = vmatpush3.msra.mxu0 %v4914_v41  ;;  %6528 = vmatprep.mubr.msk.f32.mxu0 %vm6671_vm9, %v7874_v39 }
 0x8a6   : > { %v4450_v60 = vpop.permute.xlu0 %4449  ;;  %v5070_v5 = vpop.permute.xlu1 %5069  ;;  %6531 = vmatprep.subr.mxu0 %v7874_v39 }
 0x8a7   : > { %v4453_v45 = vsel %vm2338_vm0, %v4448_v40, %v4450_v60  ;;  %v4454_v54 = vsel %vm2338_vm0, %v4450_v60, %v4452_v35  ;;  %vm5075_vm0 = vcmask 891904  }
 0x8a8   : > { %4492 = vmatprep.subr.mxu1 %v4454_v54  ;;  %6529 = vmatmul.mubr.msk.f32.vlgmr.msra.gmra.mxu0 %vm4458_vm14, %v6165_v24 }
 0x8a9   : > { %4493 = vmatpush1.msra.mxu1 %v4453_v45  ;;  %6533 = vmatprep.mubr.msk.f32.mxu0 %vm6671_vm9, %v7874_v39 }
 0x8aa   : > { %v5074_v12 = vpop.permute.xlu0 %5073  ;;  %6158 = vmatmul.mubr.msk.f32.vlgmr.msra.gmra.mxu1 %vm4458_vm14, %v6157_v34  ;;  %4636 = vmatprep.subr.mxu1 %v4440_v43  ;;  %v4752_v27 = vpop.permute.xlu1 %4751 }
 0x8ab   : > { %4637 = vmatpush1.msra.mxu1 %v8155_v8  ;;  %6532 = vmatpush3.msra.mxu0 %v5074_v12  ;;  %v4756_v26 = vsel %vm2537_vm1, %v4752_v27, %v4754_v51  ;;  %v4755_v63 = vsel %vm2537_vm1, %v4750_v0, %v4752_v27  ;;  %vm5236_vm1 = vcmask 883712  }
 0x8ac   : > { %4793 = vmatprep.subr.mxu1 %v4756_v26  ;;  %4670 = vmatprep.mubr.f32.mxu1 %v7874_v39 }
 0x8ad   : > { %6536 = vmatprep.subr.mxu0 %v7874_v39  ;;  %6534 = vmatmul.mubr.msk.f32.vlgmr.msra.gmra.mxu0 %vm4458_vm14, %v6168_v46 }
 0x8ae   : > { %v5231_v47 = vpop.permute.xlu0 %5230  ;;  %6160 = vmatmul.mubr.msk.f32.vlgmr.msra.gmra.mxu1 %vm4458_vm14, %v4438_v38  ;;  %v5235_v48 = vpop.permute.xlu1 %5234  ;;  %6538 = vmatprep.mubr.msk.f32.mxu0 %vm6671_vm9, %v7874_v39 }
 0x8af   : > { %4794 = vmatpush1.msra.mxu1 %v4755_v63  ;;  %6537 = vmatpush3.msra.mxu0 %v5235_v48 }
 0x8b0   : > { %4827 = vmatprep.mubr.f32.mxu1 %v7874_v39  ;;  %6541 = vmatprep.subr.mxu0 %v7874_v39 }
 0x8b1   : > { %6539 = vmatmul.mubr.msk.f32.vlgmr.msra.gmra.mxu0 %vm4458_vm14, %v6171_v14 }
 0x8b2   : > { %v4912_v18 = vpop.permute.xlu0 %4911  ;;  %6163 = vmatmul.mubr.msk.f32.vlgmr.msra.gmra.mxu1 %vm4458_vm14, %v6162_v44  ;;  %v5072_v23 = vpop.permute.xlu1 %5071  ;;  %6543 = vmatprep.mubr.msk.f32.mxu0 %vm6671_vm9, %v7874_v39 }
 0x8b3   : > { %v4915_v49 = vsel %vm3960_vm4, %v4910_v61, %v4912_v18  ;;  %v4916_v36 = vsel %vm3960_vm4, %v4912_v18, %v4914_v41  ;;  %4987 = vmatprep.mubr.f32.mxu1 %v7874_v39  ;;  %v5077_v50 = vsel %vm5075_vm0, %v5072_v23, %v5074_v12  ;;  %v5076_v53 = vsel %vm5075_vm0, %v5070_v5, %v5072_v23 }
 0x8b4   : > { %4953 = vmatprep.subr.mxu1 %v4916_v36  ;;  %vm5397_vm4 = vcmask 752640   ;;  %vm5927_vm0 = vcmask 912128  }
 0x8b5   : > { %4954 = vmatpush1.msra.mxu1 %v4915_v49 }
 0x8b6   : > { %v5396_v17 = vpop.permute.xlu0 %5395  ;;  %6166 = vmatmul.mubr.msk.f32.vlgmr.msra.gmra.mxu1 %vm4458_vm14, %v6165_v24  ;;  %5114 = vmatprep.subr.mxu1 %v5077_v50  ;;  %v5392_v29 = vpop.permute.xlu1 %5391 }
 0x8b7   : > { %5115 = vmatpush1.msra.mxu1 %v5076_v53  ;;  %6542 = vmatpush3.msra.mxu0 %v5396_v17 }
 0x8b8   : > { %5148 = vmatprep.mubr.f32.mxu1 %v7874_v39  ;;  %6546 = vmatprep.subr.mxu0 %v7874_v39 }
 0x8b9   : > { %6544 = vmatmul.mubr.msk.f32.vlgmr.msra.gmra.mxu0 %vm4458_vm14, %v6174_v2 }
 0x8ba   : > { %v5233_v9 = vpop.permute.xlu0 %5232  ;;  %6169 = vmatmul.mubr.msk.f32.vlgmr.msra.gmra.mxu1 %vm4458_vm14, %v6168_v46  ;;  %v5394_v11 = vpop.permute.xlu1 %5393  ;;  %6548 = vmatprep.mubr.msk.f32.mxu0 %vm6671_vm9, %v7874_v39 }
 0x8bb   : > { %v5237_v13 = vsel %vm5236_vm1, %v5231_v47, %v5233_v9  ;;  %v5238_v15 = vsel %vm5236_vm1, %v5233_v9, %v5235_v48  ;;  %5309 = vmatprep.mubr.f32.mxu1 %v7874_v39  ;;  %v5399_v33 = vsel %vm5397_vm4, %v5394_v11, %v5396_v17  ;;  %v5398_v52 = vsel %vm5397_vm4, %v5392_v29, %v5394_v11 }
 0x8bc   : > { %5275 = vmatprep.subr.mxu1 %v5238_v15  ;;  %vm5936_vm1 = vcmask 1043328  }
 0x8bd   : > { %5276 = vmatpush1.msra.mxu1 %v5237_v13 }
 0x8be   : > { %v5553_v55 = vpop.permute.xlu0 %5552  ;;  %6172 = vmatmul.mubr.msk.f32.vlgmr.msra.gmra.mxu1 %vm4458_vm14, %v6171_v14  ;;  %5436 = vmatprep.subr.mxu1 %v5399_v33  ;;  %v5557_v56 = vpop.permute.xlu1 %5556 }
 0x8bf   : > { %5437 = vmatpush1.msra.mxu1 %v5398_v52  ;;  %6547 = vmatpush3.msra.mxu0 %v5557_v56 }
 0x8c0   : > { %5470 = vmatprep.mubr.f32.mxu1 %v7874_v39  ;;  %6549 = vmatmul.mubr.msk.f32.vlgmr.msra.gmra.mxu0 %vm4458_vm14, %v6177_v19 }
 0x8c1   : > { %6551 = vmatprep.subr.mxu0 %v7874_v39  ;;  %6553 = vmatprep.mubr.msk.f32.mxu0 %vm6671_vm9, %v7874_v39  ;;  %vm5907_vm9 = vcmask 387328  }
 0x8c2   : > { %v5555_v58 = vpop.permute.xlu0 %5554  ;;  %6175 = vmatmul.mubr.msk.f32.vlgmr.msra.gmra.mxu1 %vm4458_vm14, %v6174_v2  ;;  %v5716_v1 = vpop.permute.xlu1 %5715 }
 0x8c3   : > { %v5559_v3 = vsel %vm5558_vm15, %v5553_v55, %v5555_v58  ;;  %v5560_v4 = vsel %vm5558_vm15, %v5555_v58, %v5557_v56  ;;  %5631 = vmatprep.mubr.f32.mxu1 %v7874_v39 }
 0x8c4   : > { %5597 = vmatprep.subr.mxu1 %v5560_v4 }
 0x8c5   : > { %5598 = vmatpush1.msra.mxu1 %v5559_v3 }
 0x8c6   : > { %v5718_v22 = vpop.permute.xlu0 %5717  ;;  %6178 = vmatmul.mubr.msk.f32.vlgmr.msra.gmra.mxu1 %vm4458_vm14, %v6177_v19  ;;  %v5714_v25 = vpop.permute.xlu1 %5713 }
 0x8c7   : > { %v5720_v20 = vsel %vm5719_vm2, %v5714_v25, %v5716_v1  ;;  %6552 = vmatpush3.msra.mxu0 %v5718_v22  ;;  %v5721_v42 = vsel %vm5719_vm2, %v5716_v1, %v5718_v22  ;;  %5792 = vmatprep.mubr.f32.mxu1 %v7874_v39 }
 0x8c8   : > { %5758 = vmatprep.subr.mxu1 %v5721_v42  ;;  %6554 = vmatmul.mubr.msk.f32.vlgmr.msra.gmra.mxu0 %vm4458_vm14, %v6180_v32 }
 0x8c9   : > { %5759 = vmatpush1.msra.mxu1 %v5720_v20 }
 0x8ca   : > { %6181 = vmatmul.mubr.msk.f32.vlgmr.msra.gmra.mxu1 %vm4458_vm14, %v6180_v32  ;;  %vm5922_vm14 = vcmask 780928  }
 0x8d3   : > { %v5876_v3 = vpop.permute.xlu0 %5875 }
 0x95c   : > { %v4599_v28 = vpop.f32.mrf.mxu0 }
 0x95e   : > { %v6515_v30 = vpop.f32.mrf.mxu0 }
 0x960   : > { %v4743_v31 = vpop.f32.mrf.mxu0 }
 0x961   : > { %v4744_v51 = vadd.f32 %v4743_v31, %v4599_v28 }
 0x962   : > { %v6520_v21 = vpop.f32.mrf.mxu0 }
 0x964   : > { %v4900_v37 = vpop.f32.mrf.mxu0 }
 0x965   : > { %v4906_v41 = vadd.f32 %v4900_v37, %v4744_v51 }
 0x966   : > { %v6525_v57 = vpop.f32.mrf.mxu0 }
 0x968   : > { %v5060_v59 = vpop.f32.mrf.mxu0 }
 0x969   : > { %v5066_v24 = vadd.f32 %v5060_v59, %v4906_v41 }
 0x96a   : > { %v4528_v16 = vpop.f32.mrf.mxu1  ;;  %v6530_v62 = vpop.f32.mrf.mxu0 }
 0x96c   : > { %v4530_v6 = vpop.f32.mrf.mxu1 }
 0x96d   : > { %v5221_v7 = vpop.f32.mrf.mxu0 }
 0x96e   : > { %v4672_v8 = vpop.f32.mrf.mxu1  ;;  %v5227_v46 = vadd.f32 %v5221_v7, %v5066_v24 }
 0x96f   : > { %v6535_v43 = vpop.f32.mrf.mxu0  ;;  %v4673_v45 = vadd.f32 %v4672_v8, %v4528_v16 }
 0x970   : > { %v4674_v39 = vpop.f32.mrf.mxu1 }
 0x971   : > { %v5382_v10 = vpop.f32.mrf.mxu0  ;;  %v4675_v12 = vadd.f32 %v4674_v39, %v4530_v6 }
 0x972   : > { %v4829_v34 = vpop.f32.mrf.mxu1  ;;  %v5388_v36 = vadd.f32 %v5382_v10, %v5227_v46 }
 0x973   : > { %v6540_v35 = vpop.f32.mrf.mxu0  ;;  %v4904_v27 = vadd.f32 %v4829_v34, %v4673_v45 }
 0x974   : > { %v4831_v38 = vpop.f32.mrf.mxu1 }
 0x975   : > { %v4905_v47 = vadd.f32 %v4831_v38, %v4675_v12 }
 0x976   : > { %v4989_v40 = vpop.f32.mrf.mxu1 }
 0x977   : > { %v5064_v48 = vadd.f32 %v4989_v40, %v4904_v27 }
 0x978   : > { %v4991_v44 = vpop.f32.mrf.mxu1 }
 0x979   : > { %v5543_v61 = vpop.f32.mrf.mxu0  ;;  %v5065_v23 = vadd.f32 %v4991_v44, %v4905_v47 }
 0x97a   : > { %v5150_v0 = vpop.f32.mrf.mxu1  ;;  %v5549_v9 = vadd.f32 %v5543_v61, %v5388_v36 }
 0x97b   : > { %v6545_v60 = vpop.f32.mrf.mxu0  ;;  %v5225_v49 = vadd.f32 %v5150_v0, %v5064_v48 }
 0x97c   : > { %v5152_v5 = vpop.f32.mrf.mxu1 }
 0x97d   : > { %v5226_v53 = vadd.f32 %v5152_v5, %v5065_v23 }
 0x97e   : > { %v5311_v54 = vpop.f32.mrf.mxu1 }
 0x97f   : > { %v5386_v17 = vadd.f32 %v5311_v54, %v5225_v49 }
 0x980   : > { %v5313_v26 = vpop.f32.mrf.mxu1  ;;  %v5704_v63 = vpop.f32.mrf.mxu0 }
 0x981   : > { %v5387_v2 = vadd.f32 %v5313_v26, %v5226_v53  ;;  %v5710_v56 = vadd.f32 %v5704_v63, %v5549_v9 }
 0x982   : > { %v5472_v14 = vpop.f32.mrf.mxu1  ;;  %v6550_v18 = vpop.f32.mrf.mxu0 }
 0x983   : > { %v5547_v11 = vadd.f32 %v5472_v14, %v5386_v17 }
 0x984   : > { %v5474_v50 = vpop.f32.mrf.mxu1 }
 0x985   : > { %v5548_v33 = vadd.f32 %v5474_v50, %v5387_v2 }
 0x986   : > { %v5633_v29 = vpop.f32.mrf.mxu1 }
 0x987   : > { %v5708_v19 = vadd.f32 %v5633_v29, %v5547_v11 }
 0x988   : > { %v5635_v13 = vpop.f32.mrf.mxu1  ;;  %v5865_v15 = vpop.f32.mrf.mxu0 }
 0x989   : > { %v5709_v58 = vadd.f32 %v5635_v13, %v5548_v33  ;;  %v5871_v25 = vadd.f32 %v5865_v15, %v5710_v56 }
 0x98a   : > { %v5794_v52 = vpop.f32.mrf.mxu1  ;;  %v6555_v55 = vpop.f32.mrf.mxu0 }
 0x98b   : > { %v5869_v1 = vadd.f32 %v5794_v52, %v5708_v19  ;;  %v5880_v21 = vadd.f32 %v5876_v3, %v5871_v25 }
 0x98c   : > { %v5796_v4 = vpop.f32.mrf.mxu1 }
 0x98d   : > { %v5878_v32 = vadd.f32 %v5876_v3, %v5869_v1  ;;  %v5870_v22 = vadd.f32 %v5796_v4, %v5709_v58  ;;  %v5886_v59 = vmul.f32 0.01, %v5880_v21  ;;  %vm5883_vm6 = vcmp.ge.f32.partialorder %v5880_v21, 0.0 }
 0x98f   : > { %vm5881_vm11 = vcmp.ge.f32.partialorder %v5878_v32, 0.0  ;;  %v5884_v20 = vmul.f32 0.01, %v5878_v32  ;;  %v5879_v42 = vadd.f32 %v5876_v3, %v5870_v22  ;;  %v5889_v16 = vsel %vm5883_vm6, %v5880_v21, %v5886_v59 }
 0x990   : > { %v5892_v62 = vmul.f32 0.5, %v5889_v16 }
 0x991   : > { %v5887_v28 = vsel %vm5881_vm11, %v5878_v32, %v5884_v20  ;;  %vm5882_vm3 = vcmp.ge.f32.partialorder %v5879_v42, 0.0  ;;  %v5885_v30 = vmul.f32 0.01, %v5879_v42 }
 0x992   : > { %v5890_v31 = vmul.f32 0.5, %v5887_v28 }
 0x993   : > { %v5888_v37 = vsel %vm5882_vm3, %v5879_v42, %v5885_v30 }
 0x994   : > { %6616 = vtanh.f32 %v5890_v31  ;;  %v5891_v57 = vmul.f32 0.5, %v5888_v37 }
 0x996   : > { %6618 = vtanh.f32 %v5891_v57 }
 0x997   : > { %6620 = vtanh.f32 %v5892_v62 }
 0x9a1   : > { %v6617_v6 = vpop.eup %6616 }
 0x9a2   : > { %5914 = vrot.lane.b32.xlu1 %v6617_v6, %s6677_s22  ;;  %5899 = vrot.lane.b32.xlu0 %v6617_v6, %s6642_s27  ;;  %5897 = vst.msk [vmem:[%s8266_s12] sm:$0x7] %vm5896_vm7, %v6617_v6  ;;  %s8326_s27 = smov 100  }
 0x9a3   : > { %v6619_v7 = vpop.eup %6618 }
 0x9a4   : > { %v6621_v8 = vpop.eup %6620  ;;  %v5930_v39 = vcombine.low %v6617_v6, %v6619_v7 }
 0x9a5   : > { %v5963_v43 = vcombine.low %v6619_v7, %v6621_v8 }
 0x9a6   : > { %5904 = vrot.lane.b32.xlu0 %v6617_v6, %s6678_s15  ;;  %5938 = vrot.lane.b32.xlu1 %v6619_v7, %s8325_s10 }
 0x9aa   : > { %5909 = vrot.lane.b32.xlu0 %v6617_v6, %s6679_s14  ;;  %5942 = vrot.lane.b32.xlu1 %v6619_v7, %s6665_s13  ;;  %s8330_s13 = smov 116  }
 0x9ae   : > { %5919 = vrot.lane.b32.xlu0 %v6617_v6, %s6680_s25  ;;  %5946 = vrot.lane.b32.xlu1 %v6619_v7, %s6673_s20 }
 0x9b2   : > { %5950 = vrot.lane.b32.xlu1 %v6619_v7, %s6681_s19  ;;  %5964 = vrot.lane.b32.xlu0 %v5963_v43, %s8326_s27 }
 0x9b6   : > { %5954 = vrot.lane.b32.xlu1 %v6619_v7, %s8327_s21  ;;  %5931 = vrot.lane.b32.xlu0 %v5930_v39, %s8328_s23 }
 0x9ba   : > { %5958 = vrot.lane.b32.xlu1 %v6619_v7, %s8329_s24  ;;  %5924 = vrot.lane.b32.xlu0 %v6617_v6, %s8330_s13 }
 0x9be   : > { %5970 = vrot.lane.b32.xlu1 %v6621_v8, %s8331_s29 }
 0xa14   : > { %v5915_v10 = vpop.permute.xlu1 %5914  ;;  %v5900_v34 = vpop.permute.xlu0 %5899 }
 0xa15   : > { %5903 = vst.msk [vmem:[%s8266_s12] sm:$0x7] %vm5902_vm8, %v5900_v34 }
 0xa18   : > { %v5905_v51 = vpop.permute.xlu0 %5904  ;;  %v5939_v35 = vpop.permute.xlu1 %5938 }
 0xa19   : > { %5908 = vst.msk [vmem:[%s8266_s12] sm:$0x7] %vm5907_vm9, %v5905_v51 }
 0xa1a   : > { %5941 = vst.msk [vmem:[%s8266_s12 + $0x4] sm:$0x7] %vm5896_vm7, %v5939_v35 }
 0xa1c   : > { %v5910_v38 = vpop.permute.xlu0 %5909  ;;  %v5943_v40 = vpop.permute.xlu1 %5942 }
 0xa1d   : > { %5913 = vst.msk [vmem:[%s8266_s12] sm:$0x7] %vm5912_vm10, %v5910_v38 }
 0xa1e   : > { %5945 = vst.msk [vmem:[%s8266_s12 + $0x4] sm:$0x7] %vm5902_vm8, %v5943_v40 }
 0xa1f   : > { %5918 = vst.msk [vmem:[%s8266_s12] sm:$0x7] %vm5917_vm13, %v5915_v10 }
 0xa20   : > { %v5920_v41 = vpop.permute.xlu0 %5919  ;;  %v5947_v44 = vpop.permute.xlu1 %5946 }
 0xa21   : > { %5923 = vst.msk [vmem:[%s8266_s12] sm:$0x7] %vm5922_vm14, %v5920_v41 }
 0xa22   : > { %5949 = vst.msk [vmem:[%s8266_s12 + $0x4] sm:$0x7] %vm5907_vm9, %v5947_v44 }
 0xa24   : > { %v5951_v61 = vpop.permute.xlu1 %5950  ;;  %v5965_v0 = vpop.permute.xlu0 %5964 }
 0xa25   : > { %5953 = vst.msk [vmem:[%s8266_s12 + $0x4] sm:$0x7] %vm5912_vm10, %v5951_v61  ;;  %v5966_v5 = vrot.slane %v5965_v0, 4 }
 0xa27   : > { %v5967_v27 = vsel %vm3012_vm5, %v5965_v0, %v5966_v5 }
 0xa28   : > { %v5955_v24 = vpop.permute.xlu1 %5954  ;;  %v5932_v60 = vpop.permute.xlu0 %5931 }
 0xa29   : > { %5957 = vst.msk [vmem:[%s8266_s12 + $0x4] sm:$0x7] %vm5917_vm13, %v5955_v24  ;;  %v5933_v45 = vrot.slane %v5932_v60, 4 }
 0xa2b   : > { %v5934_v46 = vsel %vm1495_vm12, %v5932_v60, %v5933_v45 }
 0xa2c   : > { %v5959_v54 = vpop.permute.xlu1 %5958  ;;  %v5925_v12 = vpop.permute.xlu0 %5924 }
 0xa2d   : > { %5961 = vst.msk [vmem:[%s8266_s12 + $0x4] sm:$0x7] %vm5922_vm14, %v5959_v54 }
 0xa2e   : > { %5928 = vst.msk [vmem:[%s8266_s12] sm:$0x7] %vm5927_vm0, %v5925_v12  ;;  %5969 = vst.msk [vmem:[%s8266_s12 + $0x4] sm:$0x7] %vm5927_vm0, %v5967_v27 }
 0xa2f   : > { %5937 = vst.msk [vmem:[%s8266_s12] sm:$0x7] %vm5936_vm1, %v5934_v46 }
 0xa30   : > { %v5971_v26 = vpop.permute.xlu1 %5970 }
 0xa31   : > { %5973 = vst.msk [vmem:[%s8266_s12 + $0x4] sm:$0x7] %vm5936_vm1, %v5971_v26 }
 0xa32 PF: > { %s19_s30 = sadd.s32 1, %s6630_s30  }
 0xa33   : > { %p16_p4 = scmp.ge.s32.totalorder %s19_s30, 4  }
 0xa35   :  { %18 = sbr.rel (!%p16_p4) target bundleno = 1 (0x1), region = 118 }

</bundles_post_ra>
